<compile_context>
chip_gen: v7x
topology: tpu7x:2x2x1
jax: 0.10.0
libtpu: 0.0.40
codegen_flags: <defaults>
</compile_context>

<pallas_src>
import math
from functools import partial

import jax
import jax.numpy as jnp
from jax.experimental import pallas as pl
from jax.experimental.pallas import tpu as pltpu


NEG_INF = -1e30          # finite "masked" value (no NaN for fully-masked rows)
_LN_EPS = 1e-5


def _round_up(v, m):
    return ((v + m - 1) // m) * m


def _vmem_limit_bytes():
    """Raise the scoped-VMEM limit on 128-MiB parts, stay conservative on v7x."""
    cap = 64 * 1024 * 1024
    try:
        info = pltpu.get_tpu_info()
        cap = int(getattr(info, "vmem_capacity_bytes", cap))
    except Exception:
        pass
    return max(32 * 1024 * 1024, min(cap * 3 // 4, 96 * 1024 * 1024))


_VMEM_LIMIT = _vmem_limit_bytes()


def _cparams():
    return pltpu.CompilerParams(dimension_semantics=("parallel",),
                                vmem_limit_bytes=_VMEM_LIMIT)


# ----------------------------------------------------------------------------
# In-kernel building blocks (operate on VMEM-resident values)
# ----------------------------------------------------------------------------

def _ln(z, g, b):
    mean = jnp.mean(z, axis=-1, keepdims=True)
    var = jnp.mean(jnp.square(z - mean), axis=-1, keepdims=True)
    inv = jax.lax.rsqrt(var + _LN_EPS)
    return (z - mean) * inv * g + b


def _heads_attention(q, k, v, m, nhead):
    """q:(Lq,E) (already scaled), k,v:(Lk,E) f32, m additive (Lq,Lk) or (1,Lk)."""
    E = q.shape[-1]
    d = E // nhead
    outs = []
    for h in range(nhead):           # static unroll over heads (H is small)
        sl = slice(h * d, (h + 1) * d)
        qh = q[:, sl].astype(jnp.bfloat16)
        kh = k[:, sl].astype(jnp.bfloat16)
        vh = v[:, sl].astype(jnp.bfloat16)
        # q @ k^T without materializing a transpose (contract last dims)
        s = jax.lax.dot_general(qh, kh, (((1,), (1,)), ((), ())),
                                preferred_element_type=jnp.float32)
        s = s + m
        s = s - jnp.max(s, axis=-1, keepdims=True)
        p = jnp.exp(s)
        p = p * pl.reciprocal(jnp.sum(p, axis=-1, keepdims=True), approx=True)
        outs.append(jnp.dot(p.astype(jnp.bfloat16), vh,
                            preferred_element_type=jnp.float32))
    return jnp.concatenate(outs, axis=-1)          # (Lq, E)


def _mm(x, w_ref, b_ref):
    return jnp.dot(x.astype(jnp.bfloat16), w_ref[...],
                   preferred_element_type=jnp.float32) + b_ref[...]


# ----------------------------------------------------------------------------
# Fused per-layer kernels (one grid step == one batch element)
# ----------------------------------------------------------------------------

def _encoder_layer_kernel(x_ref, qkv_w, qkv_b, out_w, out_b,
                          n1_g, n1_b, w1, b1, w2, b2, n2_g, n2_b,
                          attn_m, pad_m, o_ref, *, nhead, emb):
    x = x_ref[...]                                            # (S, E) f32
    qkv = _mm(x, qkv_w, qkv_b)                                # (S, 3E)
    m = attn_m[...] + pad_m[...]                              # (S,S) + (1,S)
    a = _heads_attention(qkv[:, :emb], qkv[:, emb:2 * emb], qkv[:, 2 * emb:],
                         m, nhead)                            # (S, E)
    z = _ln(x + _mm(a, out_w, out_b), n1_g[...], n1_b[...])
    h = jnp.maximum(_mm(z, w1, b1), 0.0)
    o_ref[...] = _ln(z + _mm(h, w2, b2), n2_g[...], n2_b[...])


def _decoder_layer_kernel(y_ref, mem_ref,
                          sa_qkv_w, sa_qkv_b, sa_out_w, sa_out_b, n1_g, n1_b,
                          ca_q_w, ca_q_b, ca_kv_w, ca_kv_b, ca_out_w, ca_out_b,
                          n2_g, n2_b, w1, b1, w2, b2, n3_g, n3_b,
                          tgt_attn_m, tgt_pad_m, mem_pad_m,
                          o_ref, *, nhead, emb):
    y = y_ref[...]                                            # (T, E)
    mem = mem_ref[...]                                        # (S, E)

    # masked self-attention
    qkv = _mm(y, sa_qkv_w, sa_qkv_b)                          # (T, 3E)
    m_self = tgt_attn_m[...] + tgt_pad_m[...]                 # (T,T) + (1,T)
    a = _heads_attention(qkv[:, :emb], qkv[:, emb:2 * emb], qkv[:, 2 * emb:],
                         m_self, nhead)
    y1 = _ln(y + _mm(a, sa_out_w, sa_out_b), n1_g[...], n1_b[...])

    # cross-attention (q from decoder, k/v from encoder memory)
    q = _mm(y1, ca_q_w, ca_q_b)                               # (T, E)
    kv = _mm(mem, ca_kv_w, ca_kv_b)                           # (S, 2E)
    a = _heads_attention(q, kv[:, :emb], kv[:, emb:], mem_pad_m[...], nhead)
    y2 = _ln(y1 + _mm(a, ca_out_w, ca_out_b), n2_g[...], n2_b[...])

    # feed-forward
    h = jnp.maximum(_mm(y2, w1, b1), 0.0)
    o_ref[...] = _ln(y2 + _mm(h, w2, b2), n3_g[...], n3_b[...])


def _ln_kernel(x_ref, g_ref, b_ref, o_ref):
    o_ref[...] = _ln(x_ref[...], g_ref[...], b_ref[...])


def _ln_linear_kernel(x_ref, g_ref, b_ref, w_ref, bias_ref, o_ref):
    z = _ln(x_ref[...], g_ref[...], b_ref[...])
    o_ref[...] = jnp.dot(z.astype(jnp.bfloat16), w_ref[...],
                         preferred_element_type=jnp.float32) + bias_ref[...]


# ----------------------------------------------------------------------------
# pallas_call wrappers
# ----------------------------------------------------------------------------

def _full(shape):
    return pl.BlockSpec(shape, lambda b: (0,) * len(shape))


def pallas_encoder_layer(x, p, attn_add, pad_add, *, nhead):
    B, S, E = x.shape
    F = p["linear1_w"].shape[1]
    in_specs = [
        pl.BlockSpec((None, S, E), lambda b: (b, 0, 0)),   # x[b]
        _full((E, 3 * E)), _full((1, 3 * E)),              # qkv proj
        _full((E, E)), _full((1, E)),                      # out proj
        _full((1, E)), _full((1, E)),                      # norm1
        _full((E, F)), _full((1, F)),                      # linear1
        _full((F, E)), _full((1, E)),                      # linear2
        _full((1, E)), _full((1, E)),                      # norm2
        _full((S, S)),                                     # shared additive attn mask
        pl.BlockSpec((None, 1, S), lambda b: (b, 0, 0)),   # per-batch key-pad mask
    ]
    return pl.pallas_call(
        partial(_encoder_layer_kernel, nhead=nhead, emb=E),
        out_shape=jax.ShapeDtypeStruct((B, S, E), jnp.float32),
        grid=(B,),
        in_specs=in_specs,
        out_specs=pl.BlockSpec((None, S, E), lambda b: (b, 0, 0)),
        compiler_params=_cparams(),
    )(x, p["qkv_w"], p["qkv_b"], p["out_w"], p["out_b"],
      p["norm1_g"], p["norm1_b"],
      p["linear1_w"], p["linear1_b"], p["linear2_w"], p["linear2_b"],
      p["norm2_g"], p["norm2_b"],
      attn_add, pad_add)


def pallas_decoder_layer(y, memory, p, tgt_attn_add, tgt_pad_add, mem_pad_add,
                         *, nhead):
    B, T, E = y.shape
    S = memory.shape[1]
    F = p["linear1_w"].shape[1]
    in_specs = [
        pl.BlockSpec((None, T, E), lambda b: (b, 0, 0)),   # y[b]
        pl.BlockSpec((None, S, E), lambda b: (b, 0, 0)),   # memory[b]
        _full((E, 3 * E)), _full((1, 3 * E)),              # self-attn qkv
        _full((E, E)), _full((1, E)),                      # self-attn out
        _full((1, E)), _full((1, E)),                      # norm1
        _full((E, E)), _full((1, E)),                      # cross q
        _full((E, 2 * E)), _full((1, 2 * E)),              # cross kv
        _full((E, E)), _full((1, E)),                      # cross out
        _full((1, E)), _full((1, E)),                      # norm2
        _full((E, F)), _full((1, F)),                      # linear1
        _full((F, E)), _full((1, E)),                      # linear2
        _full((1, E)), _full((1, E)),                      # norm3
        _full((T, T)),                                     # causal/attn additive mask
        pl.BlockSpec((None, 1, T), lambda b: (b, 0, 0)),   # tgt key-pad mask
        pl.BlockSpec((None, 1, S), lambda b: (b, 0, 0)),   # memory key-pad mask
    ]
    return pl.pallas_call(
        partial(_decoder_layer_kernel, nhead=nhead, emb=E),
        out_shape=jax.ShapeDtypeStruct((B, T, E), jnp.float32),
        grid=(B,),
        in_specs=in_specs,
        out_specs=pl.BlockSpec((None, T, E), lambda b: (b, 0, 0)),
        compiler_params=_cparams(),
    )(y, memory,
      p["sa_qkv_w"], p["sa_qkv_b"], p["sa_out_w"], p["sa_out_b"],
      p["norm1_g"], p["norm1_b"],
      p["ca_q_w"], p["ca_q_b"], p["ca_kv_w"], p["ca_kv_b"],
      p["ca_out_w"], p["ca_out_b"],
      p["norm2_g"], p["norm2_b"],
      p["linear1_w"], p["linear1_b"], p["linear2_w"], p["linear2_b"],
      p["norm3_g"], p["norm3_b"],
      tgt_attn_add, tgt_pad_add, mem_pad_add)


def _row_tile(M):
    return M if M <= 256 else 256


def pallas_layernorm(x2d, g, b):
    M, D = x2d.shape
    tm = _row_tile(M)
    return pl.pallas_call(
        _ln_kernel,
        out_shape=jax.ShapeDtypeStruct((M, D), jnp.float32),
        grid=(pl.cdiv(M, tm),),
        in_specs=[pl.BlockSpec((tm, D), lambda i: (i, 0)),
                  pl.BlockSpec((1, D), lambda i: (0, 0)),
                  pl.BlockSpec((1, D), lambda i: (0, 0))],
        out_specs=pl.BlockSpec((tm, D), lambda i: (i, 0)),
        compiler_params=_cparams(),
    )(x2d, g, b)


def pallas_ln_linear(x2d, g, b, w, bias):
    """LayerNorm then x @ w + bias (fused final decoder norm + generator)."""
    M, E = x2d.shape
    N = w.shape[1]
    tm = _row_tile(M)
    return pl.pallas_call(
        _ln_linear_kernel,
        out_shape=jax.ShapeDtypeStruct((M, N), jnp.float32),
        grid=(pl.cdiv(M, tm),),
        in_specs=[pl.BlockSpec((tm, E), lambda i: (i, 0)),
                  pl.BlockSpec((1, E), lambda i: (0, 0)),
                  pl.BlockSpec((1, E), lambda i: (0, 0)),
                  pl.BlockSpec((E, N), lambda i: (0, 0)),
                  pl.BlockSpec((1, N), lambda i: (0, 0))],
        out_specs=pl.BlockSpec((tm, N), lambda i: (i, 0)),
        compiler_params=_cparams(),
    )(x2d, g, b, w, bias)


# ----------------------------------------------------------------------------
# Forward pass (jit'ed; thin XLA glue around the fused kernels)
# ----------------------------------------------------------------------------

def _attn_additive(mask, L):
    if mask is None:
        return jnp.zeros((L, L), jnp.float32)
    if mask.dtype == jnp.bool_:
        return jnp.where(mask, NEG_INF, 0.0).astype(jnp.float32)
    return jnp.maximum(mask.astype(jnp.float32), NEG_INF)     # clamp -inf


def _pad_additive(pad_mask, B, L):
    if pad_mask is None:
        return jnp.zeros((B, 1, L), jnp.float32)
    return jnp.where(pad_mask, NEG_INF, 0.0).astype(jnp.float32)[:, None, :]


@partial(jax.jit, static_argnames=("nhead", "tgt_vocab_size"))
def seq2seq_forward(params, src, trg, src_mask, tgt_mask,
                    src_padding_mask, tgt_padding_mask, memory_key_padding_mask,
                    *, nhead, tgt_vocab_size):
    E = params["src_emb"].shape[1]
    S, B = src.shape
    T = trg.shape[0]
    sqrt_e = math.sqrt(E)

    # batch-major (B, L, E) embeddings; positional encoding added on seq axis.
    src_e = jnp.take(params["src_emb"], src.T, axis=0) * sqrt_e \
        + params["pos_emb"][None, :S, :]
    tgt_e = jnp.take(params["tgt_emb"], trg.T, axis=0) * sqrt_e \
        + params["pos_emb"][None, :T, :]

    # small additive masks shared by every layer (combined inside the kernels)
    src_attn_add = _attn_additive(src_mask, S)                    # (S, S)
    tgt_attn_add = _attn_additive(tgt_mask, T)                    # (T, T)
    src_pad_add = _pad_additive(src_padding_mask, B, S)           # (B, 1, S)
    tgt_pad_add = _pad_additive(tgt_padding_mask, B, T)           # (B, 1, T)
    mem_pad_add = _pad_additive(memory_key_padding_mask, B, S)    # (B, 1, S)

    # encoder
    x = src_e
    for lp in params["encoder_layers"]:
        x = pallas_encoder_layer(x, lp, src_attn_add, src_pad_add, nhead=nhead)
    memory = pallas_layernorm(x.reshape(B * S, E),
                              params["enc_norm_g"],
                              params["enc_norm_b"]).reshape(B, S, E)

    # decoder
    y = tgt_e
    for lp in params["decoder_layers"]:
        y = pallas_decoder_layer(y, memory, lp, tgt_attn_add, tgt_pad_add,
                                 mem_pad_add, nhead=nhead)

    # fused final decoder LayerNorm + generator (lane-dense padded vocab)
    logits_p = pallas_ln_linear(y.reshape(B * T, E),
                                params["dec_norm_g"], params["dec_norm_b"],
                                params["gen_w"], params["gen_b"])
    vpad = params["gen_w"].shape[1]
    logits = logits_p.reshape(B, T, vpad)[:, :, :tgt_vocab_size]
    return jnp.transpose(logits, (1, 0, 2))                       # (T, B, V)


# ----------------------------------------------------------------------------
# Deterministic parameter initialization (torch-shaped; weights pre-transposed
# to (in, out) and cast to bf16; biases / LayerNorm params f32; softmax scale
# folded into the q projection)
# ----------------------------------------------------------------------------

def _linear_params(key, out_dim, in_dim):
    k1, k2 = jax.random.split(key)
    bound = 1.0 / math.sqrt(in_dim)
    w = jax.random.uniform(k1, (out_dim, in_dim), jnp.float32, -bound, bound)
    b = jax.random.uniform(k2, (out_dim,), jnp.float32, -bound, bound)
    return w.T, b.reshape(1, out_dim)


def _init_mha(key, E, scale):
    k1, k2 = jax.random.split(key)
    in_w, in_b = _linear_params(k1, 3 * E, E)          # (E, 3E), (1, 3E)
    in_w = in_w.at[:, :E].multiply(scale)              # fold 1/sqrt(d) into q
    in_b = in_b.at[:, :E].multiply(scale)
    out_w, out_b = _linear_params(k2, E, E)
    return dict(qkv_w=in_w.astype(jnp.bfloat16), qkv_b=in_b,
                q_w=in_w[:, :E].astype(jnp.bfloat16), q_b=in_b[:, :E],
                kv_w=in_w[:, E:].astype(jnp.bfloat16), kv_b=in_b[:, E:],
                out_w=out_w.astype(jnp.bfloat16), out_b=out_b)


def _ln_pair(E):
    return jnp.ones((1, E), jnp.float32), jnp.zeros((1, E), jnp.float32)


def _init_encoder_layer(key, E, F, nhead):
    ks = jax.random.split(key, 3)
    mha = _init_mha(ks[0], E, 1.0 / math.sqrt(E // nhead))
    l1w, l1b = _linear_params(ks[1], F, E)
    l2w, l2b = _linear_params(ks[2], E, F)
    n1g, n1b = _ln_pair(E)
    n2g, n2b = _ln_pair(E)
    return dict(qkv_w=mha["qkv_w"], qkv_b=mha["qkv_b"],
                out_w=mha["out_w"], out_b=mha["out_b"],
                linear1_w=l1w.astype(jnp.bfloat16), linear1_b=l1b,
                linear2_w=l2w.astype(jnp.bfloat16), linear2_b=l2b,
                norm1_g=n1g, norm1_b=n1b, norm2_g=n2g, norm2_b=n2b)


def _init_decoder_layer(key, E, F, nhead):
    ks = jax.random.split(key, 4)
    scale = 1.0 / math.sqrt(E // nhead)
    sa = _init_mha(ks[0], E, scale)
    ca = _init_mha(ks[1], E, scale)
    l1w, l1b = _linear_params(ks[2], F, E)
    l2w, l2b = _linear_params(ks[3], E, F)
    n1g, n1b = _ln_pair(E)
    n2g, n2b = _ln_pair(E)
    n3g, n3b = _ln_pair(E)
    return dict(sa_qkv_w=sa["qkv_w"], sa_qkv_b=sa["qkv_b"],
                sa_out_w=sa["out_w"], sa_out_b=sa["out_b"],
                ca_q_w=ca["q_w"], ca_q_b=ca["q_b"],
                ca_kv_w=ca["kv_w"], ca_kv_b=ca["kv_b"],
                ca_out_w=ca["out_w"], ca_out_b=ca["out_b"],
                linear1_w=l1w.astype(jnp.bfloat16), linear1_b=l1b,
                linear2_w=l2w.astype(jnp.bfloat16), linear2_b=l2b,
                norm1_g=n1g, norm1_b=n1b, norm2_g=n2g, norm2_b=n2b,
                norm3_g=n3g, norm3_b=n3b)


def _init_generator(key, E, V, vpad):
    w, b = _linear_params(key, V, E)                   # (E, V), (1, V)
    w_p = jnp.zeros((E, vpad), jnp.float32).at[:, :V].set(w)
    b_p = jnp.zeros((1, vpad), jnp.float32).at[:, :V].set(b)
    return w_p.astype(jnp.bfloat16), b_p


def positional_encoding_table(emb_size, maxlen=5000):
    den = jnp.exp(-jnp.arange(0, emb_size, 2, dtype=jnp.float32)
                  * (math.log(10000.0) / emb_size))
    pos = jnp.arange(0, maxlen, dtype=jnp.float32)[:, None]
    pe = jnp.zeros((maxlen, emb_size), jnp.float32)
    pe = pe.at[:, 0::2].set(jnp.sin(pos * den))
    pe = pe.at[:, 1::2].set(jnp.cos(pos * den))
    return pe                                           # (maxlen, emb_size)


def init_params(key, *, num_encoder_layers, num_decoder_layers, emb_size, nhead,
                src_vocab_size, tgt_vocab_size, dim_feedforward, maxlen=5000):
    keys = jax.random.split(key, 3 + num_encoder_layers + num_decoder_layers)
    src_emb = jax.random.normal(keys[0], (src_vocab_size, emb_size), jnp.float32)
    tgt_emb = jax.random.normal(keys[1], (tgt_vocab_size, emb_size), jnp.float32)
    vpad = _round_up(tgt_vocab_size, 128)
    gen_w, gen_b = _init_generator(keys[2], emb_size, tgt_vocab_size, vpad)
    enc_layers = [_init_encoder_layer(keys[3 + i], emb_size, dim_feedforward, nhead)
                  for i in range(num_encoder_layers)]
    dec_layers = [_init_decoder_layer(keys[3 + num_encoder_layers + i],
                                      emb_size, dim_feedforward, nhead)
                  for i in range(num_decoder_layers)]
    enc_ng, enc_nb = _ln_pair(emb_size)
    dec_ng, dec_nb = _ln_pair(emb_size)
    return dict(
        src_emb=src_emb, tgt_emb=tgt_emb,
        pos_emb=positional_encoding_table(emb_size, maxlen),
        encoder_layers=enc_layers, decoder_layers=dec_layers,
        enc_norm_g=enc_ng, enc_norm_b=enc_nb,
        dec_norm_g=dec_ng, dec_norm_b=dec_nb,
        gen_w=gen_w, gen_b=gen_b,
    )


# ----------------------------------------------------------------------------
# Example run
# ----------------------------------------------------------------------------

if __name__ == "__main__":
    S, T, B = 8, 8, 2
    EMB, NHEAD, FF = 32, 4, 64
    SRC_VOCAB, TGT_VOCAB = 23, 19
    NUM_ENC, NUM_DEC = 2, 2

    key = jax.random.PRNGKey(0)
    kparam, ksrc, ktrg = jax.random.split(key, 3)

    params = init_params(kparam,
                         num_encoder_layers=NUM_ENC, num_decoder_layers=NUM_DEC,
                         emb_size=EMB, nhead=NHEAD,
                         src_vocab_size=SRC_VOCAB, tgt_vocab_size=TGT_VOCAB,
                         dim_feedforward=FF)

    src = jax.random.randint(ksrc, (S, B), 0, SRC_VOCAB, dtype=jnp.int32)
    trg = jax.random.randint(ktrg, (T, B), 0, TGT_VOCAB, dtype=jnp.int32)

    src_mask = jnp.zeros((S, S), jnp.float32)
    causal = jnp.triu(jnp.ones((T, T), dtype=bool), k=1)
    tgt_mask = jnp.where(causal, -1e9, 0.0).astype(jnp.float32)
    src_padding_mask = jnp.zeros((B, S), dtype=bool).at[1, S - 1].set(True)
    tgt_padding_mask = jnp.zeros((B, T), dtype=bool).at[1, T - 1].set(True)
    memory_key_padding_mask = src_padding_mask

    logits = seq2seq_forward(params, src, trg, src_mask, tgt_mask,
                             src_padding_mask, tgt_padding_mask,
                             memory_key_padding_mask,
                             nhead=NHEAD, tgt_vocab_size=TGT_VOCAB)
    jax.block_until_ready(logits)

    assert logits.shape == (T, B, TGT_VOCAB)
    assert bool(jnp.all(jnp.isfinite(logits)))
    print("KERNEL_OK")
</pallas_src>

<mosaic_0001>
module attributes {stable_mosaic.version = 11 : i64} {
  func.func @_ln_kernel(%arg0: i32, %arg1: memref<16x32xf32, #tpu.memory_space<vmem>>, %arg2: memref<1x32xf32, #tpu.memory_space<vmem>>, %arg3: memref<1x32xf32, #tpu.memory_space<vmem>>, %arg4: memref<16x32xf32, #tpu.memory_space<vmem>>) attributes {dimension_semantics = [#tpu.dimension_semantics<parallel>], iteration_bounds = array<i64: 1>, scalar_prefetch = 0 : i64, scratch_operands = 0 : i64, tpu.core_type = #tpu.core_type<tc>, window_params = [{transform_indices = @transform_0, window_bounds = array<i64: 16, 32>}, {pipeline_mode = #tpu.pipeline_mode<synchronous>, transform_indices = @transform_1, window_bounds = array<i64: 1, 32>}, {pipeline_mode = #tpu.pipeline_mode<synchronous>, transform_indices = @transform_2, window_bounds = array<i64: 1, 32>}, {transform_indices = @transform_3, window_bounds = array<i64: 16, 32>}]} {
    %c0 = arith.constant 0 : index
    %c0_0 = arith.constant 0 : index
    %0 = vector.load %arg1[%c0, %c0_0] : memref<16x32xf32, #tpu.memory_space<vmem>>, vector<16x32xf32>
    %c0_1 = arith.constant 0 : index
    %c0_2 = arith.constant 0 : index
    %1 = vector.load %arg2[%c0_1, %c0_2] : memref<1x32xf32, #tpu.memory_space<vmem>>, vector<1x32xf32>
    %c0_3 = arith.constant 0 : index
    %c0_4 = arith.constant 0 : index
    %2 = vector.load %arg3[%c0_3, %c0_4] : memref<1x32xf32, #tpu.memory_space<vmem>>, vector<1x32xf32>
    %cst = arith.constant dense<0.000000e+00> : vector<16xf32>
    %3 = vector.multi_reduction <add>, %0, %cst [1] : vector<16x32xf32> to vector<16xf32>
    %4 = vector.shape_cast %3 : vector<16xf32> to vector<16x1xf32>
    %cst_5 = arith.constant 3.200000e+01 : f32
    %5 = vector.broadcast %cst_5 : f32 to vector<16x1xf32>
    %6 = arith.divf %4, %5 : vector<16x1xf32>
    %7 = vector.broadcast %6 : vector<16x1xf32> to vector<16x32xf32>
    %8 = arith.subf %0, %7 : vector<16x32xf32>
    %9 = arith.mulf %8, %8 : vector<16x32xf32>
    %cst_6 = arith.constant dense<0.000000e+00> : vector<16xf32>
    %10 = vector.multi_reduction <add>, %9, %cst_6 [1] : vector<16x32xf32> to vector<16xf32>
    %11 = vector.shape_cast %10 : vector<16xf32> to vector<16x1xf32>
    %cst_7 = arith.constant 3.200000e+01 : f32
    %12 = vector.broadcast %cst_7 : f32 to vector<16x1xf32>
    %13 = arith.divf %11, %12 : vector<16x1xf32>
    %cst_8 = arith.constant 9.99999974E-6 : f32
    %14 = vector.broadcast %cst_8 : f32 to vector<16x1xf32>
    %15 = arith.addf %13, %14 : vector<16x1xf32>
    %16 = math.rsqrt %15 : vector<16x1xf32>
    %17 = vector.broadcast %6 : vector<16x1xf32> to vector<16x32xf32>
    %18 = arith.subf %0, %17 : vector<16x32xf32>
    %19 = vector.broadcast %16 : vector<16x1xf32> to vector<16x32xf32>
    %20 = arith.mulf %18, %19 : vector<16x32xf32>
    %21 = vector.broadcast %1 : vector<1x32xf32> to vector<16x32xf32>
    %22 = arith.mulf %20, %21 : vector<16x32xf32>
    %23 = vector.broadcast %2 : vector<1x32xf32> to vector<16x32xf32>
    %24 = arith.addf %22, %23 : vector<16x32xf32>
    %c0_9 = arith.constant 0 : index
    %c0_10 = arith.constant 0 : index
    %25 = vector.load %arg4[%c0_9, %c0_10] : memref<16x32xf32, #tpu.memory_space<vmem>>, vector<16x32xf32>
    tpu.vector_store %arg4[%c0_9, %c0_10], %24 {strides = array<i32>} : memref<16x32xf32, #tpu.memory_space<vmem>>, vector<16x32xf32>,
    return
  }
  func.func @transform_0(%arg0: i32) -> (i32, i32) {
    %c0_i32 = arith.constant 0 : i32
    %c0_i32_0 = arith.constant 0 : i32
    return %arg0, %c0_i32 : i32, i32
  }
  func.func @transform_1(%arg0: i32) -> (i32, i32) {
    %c0_i32 = arith.constant 0 : i32
    %c0_i32_0 = arith.constant 0 : i32
    %c0_i32_1 = arith.constant 0 : i32
    return %c0_i32, %c0_i32_0 : i32, i32
  }
  func.func @transform_2(%arg0: i32) -> (i32, i32) {
    %c0_i32 = arith.constant 0 : i32
    %c0_i32_0 = arith.constant 0 : i32
    %c0_i32_1 = arith.constant 0 : i32
    return %c0_i32, %c0_i32_0 : i32, i32
  }
  func.func @transform_3(%arg0: i32) -> (i32, i32) {
    %c0_i32 = arith.constant 0 : i32
    %c0_i32_0 = arith.constant 0 : i32
    return %arg0, %c0_i32 : i32, i32
  }
}

module attributes {stable_mosaic.version = 11 : i64} {
  func.func @_encoder_layer_kernel(%arg0: i32, %arg1: memref<1x8x32xf32, #tpu.memory_space<vmem>>, %arg2: memref<32x96xbf16, #tpu.memory_space<vmem>>, %arg3: memref<1x96xf32, #tpu.memory_space<vmem>>, %arg4: memref<32x32xbf16, #tpu.memory_space<vmem>>, %arg5: memref<1x32xf32, #tpu.memory_space<vmem>>, %arg6: memref<1x32xf32, #tpu.memory_space<vmem>>, %arg7: memref<1x32xf32, #tpu.memory_space<vmem>>, %arg8: memref<32x64xbf16, #tpu.memory_space<vmem>>, %arg9: memref<1x64xf32, #tpu.memory_space<vmem>>, %arg10: memref<64x32xbf16, #tpu.memory_space<vmem>>, %arg11: memref<1x32xf32, #tpu.memory_space<vmem>>, %arg12: memref<1x32xf32, #tpu.memory_space<vmem>>, %arg13: memref<1x32xf32, #tpu.memory_space<vmem>>, %arg14: memref<8x8xf32, #tpu.memory_space<vmem>>, %arg15: memref<1x1x8xf32, #tpu.memory_space<vmem>>, %arg16: memref<1x8x32xf32, #tpu.memory_space<vmem>>) attributes {dimension_semantics = [#tpu.dimension_semantics<parallel>], iteration_bounds = array<i64: 2>, scalar_prefetch = 0 : i64, scratch_operands = 0 : i64, tpu.core_type = #tpu.core_type<tc>, window_params = [{transform_indices = @transform_0, window_bounds = array<i64: 1, 8, 32>}, {pipeline_mode = #tpu.pipeline_mode<synchronous>, transform_indices = @transform_1, window_bounds = array<i64: 32, 96>}, {pipeline_mode = #tpu.pipeline_mode<synchronous>, transform_indices = @transform_2, window_bounds = array<i64: 1, 96>}, {pipeline_mode = #tpu.pipeline_mode<synchronous>, transform_indices = @transform_3, window_bounds = array<i64: 32, 32>}, {pipeline_mode = #tpu.pipeline_mode<synchronous>, transform_indices = @transform_4, window_bounds = array<i64: 1, 32>}, {pipeline_mode = #tpu.pipeline_mode<synchronous>, transform_indices = @transform_5, window_bounds = array<i64: 1, 32>}, {pipeline_mode = #tpu.pipeline_mode<synchronous>, transform_indices = @transform_6, window_bounds = array<i64: 1, 32>}, {pipeline_mode = #tpu.pipeline_mode<synchronous>, transform_indices = @transform_7, window_bounds = array<i64: 32, 64>}, {pipeline_mode = #tpu.pipeline_mode<synchronous>, transform_indices = @transform_8, window_bounds = array<i64: 1, 64>}, {pipeline_mode = #tpu.pipeline_mode<synchronous>, transform_indices = @transform_9, window_bounds = array<i64: 64, 32>}, {pipeline_mode = #tpu.pipeline_mode<synchronous>, transform_indices = @transform_10, window_bounds = array<i64: 1, 32>}, {pipeline_mode = #tpu.pipeline_mode<synchronous>, transform_indices = @transform_11, window_bounds = array<i64: 1, 32>}, {pipeline_mode = #tpu.pipeline_mode<synchronous>, transform_indices = @transform_12, window_bounds = array<i64: 1, 32>}, {pipeline_mode = #tpu.pipeline_mode<synchronous>, transform_indices = @transform_13, window_bounds = array<i64: 8, 8>}, {transform_indices = @transform_14, window_bounds = array<i64: 1, 1, 8>}, {transform_indices = @transform_15, window_bounds = array<i64: 1, 8, 32>}]} {
    %c0 = arith.constant 0 : index
    %c0_0 = arith.constant 0 : index
    %c0_1 = arith.constant 0 : index
    %0 = vector.load %arg1[%c0, %c0_0, %c0_1] : memref<1x8x32xf32, #tpu.memory_space<vmem>>, vector<1x8x32xf32>
    %1 = vector.shape_cast %0 : vector<1x8x32xf32> to vector<8x32xf32>
    %2 = arith.truncf %1 : vector<8x32xf32> to vector<8x32xbf16>
    %c0_2 = arith.constant 0 : index
    %c0_3 = arith.constant 0 : index
    %3 = vector.load %arg2[%c0_2, %c0_3] : memref<32x96xbf16, #tpu.memory_space<vmem>>, vector<32x96xbf16>
    %cst = arith.constant dense<0.000000e+00> : vector<8x96xf32>
    %4 = tpu.matmul %2, %3, %cst {dimension_numbers = #tpu.dot_dimension_numbers<[1], [0], [0], [1], [0, 0, 1, 1], [], []>} : vector<8x32xbf16>, vector<32x96xbf16>, vector<8x96xf32> -> vector<8x96xf32>
    %c0_4 = arith.constant 0 : index
    %c0_5 = arith.constant 0 : index
    %5 = vector.load %arg3[%c0_4, %c0_5] : memref<1x96xf32, #tpu.memory_space<vmem>>, vector<1x96xf32>
    %6 = vector.broadcast %5 : vector<1x96xf32> to vector<8x96xf32>
    %7 = arith.addf %4, %6 : vector<8x96xf32>
    %c0_6 = arith.constant 0 : index
    %c0_7 = arith.constant 0 : index
    %8 = vector.load %arg14[%c0_6, %c0_7] : memref<8x8xf32, #tpu.memory_space<vmem>>, vector<8x8xf32>
    %c0_8 = arith.constant 0 : index
    %c0_9 = arith.constant 0 : index
    %c0_10 = arith.constant 0 : index
    %9 = vector.load %arg15[%c0_8, %c0_9, %c0_10] : memref<1x1x8xf32, #tpu.memory_space<vmem>>, vector<1x1x8xf32>
    %10 = vector.shape_cast %9 : vector<1x1x8xf32> to vector<1x8xf32>
    %11 = vector.broadcast %10 : vector<1x8xf32> to vector<8x8xf32>
    %12 = arith.addf %8, %11 : vector<8x8xf32>
    %13 = vector.extract_strided_slice %7 {offsets = [0, 0], sizes = [8, 32], strides = [1, 1]} : vector<8x96xf32> to vector<8x32xf32>
    %14 = vector.extract_strided_slice %7 {offsets = [0, 32], sizes = [8, 32], strides = [1, 1]} : vector<8x96xf32> to vector<8x32xf32>
    %15 = vector.extract_strided_slice %7 {offsets = [0, 64], sizes = [8, 32], strides = [1, 1]} : vector<8x96xf32> to vector<8x32xf32>
    %16 = vector.extract_strided_slice %13 {offsets = [0, 0], sizes = [8, 8], strides = [1, 1]} : vector<8x32xf32> to vector<8x8xf32>
    %17 = arith.truncf %16 : vector<8x8xf32> to vector<8x8xbf16>
    %18 = vector.extract_strided_slice %14 {offsets = [0, 0], sizes = [8, 8], strides = [1, 1]} : vector<8x32xf32> to vector<8x8xf32>
    %19 = arith.truncf %18 : vector<8x8xf32> to vector<8x8xbf16>
    %20 = vector.extract_strided_slice %15 {offsets = [0, 0], sizes = [8, 8], strides = [1, 1]} : vector<8x32xf32> to vector<8x8xf32>
    %21 = arith.truncf %20 : vector<8x8xf32> to vector<8x8xbf16>
    %cst_11 = arith.constant dense<0.000000e+00> : vector<8x8xf32>
    %22 = tpu.matmul %17, %19, %cst_11 {dimension_numbers = #tpu.dot_dimension_numbers<[1], [1], [0], [0], [0, 0, 1, 0], [], []>} : vector<8x8xbf16>, vector<8x8xbf16>, vector<8x8xf32> -> vector<8x8xf32>
    %23 = arith.addf %22, %12 : vector<8x8xf32>
    %cst_12 = arith.constant dense<0xFF800000> : vector<8xf32>
    %24 = vector.multi_reduction <maximumf>, %23, %cst_12 [1] : vector<8x8xf32> to vector<8xf32>
    %25 = vector.shape_cast %24 : vector<8xf32> to vector<8x1xf32>
    %26 = vector.broadcast %25 : vector<8x1xf32> to vector<8x8xf32>
    %27 = arith.subf %23, %26 : vector<8x8xf32>
    %28 = math.exp %27 : vector<8x8xf32>
    %cst_13 = arith.constant dense<0.000000e+00> : vector<8xf32>
    %29 = vector.multi_reduction <add>, %28, %cst_13 [1] : vector<8x8xf32> to vector<8xf32>
    %30 = vector.shape_cast %29 : vector<8xf32> to vector<8x1xf32>
    %31 = tpu.reciprocal %30 {approx = true} : vector<8x1xf32> -> vector<8x1xf32>
    %32 = vector.broadcast %31 : vector<8x1xf32> to vector<8x8xf32>
    %33 = arith.mulf %28, %32 : vector<8x8xf32>
    %34 = arith.truncf %33 : vector<8x8xf32> to vector<8x8xbf16>
    %cst_14 = arith.constant dense<0.000000e+00> : vector<8x8xf32>
    %35 = tpu.matmul %34, %21, %cst_14 {dimension_numbers = #tpu.dot_dimension_numbers<[1], [0], [0], [1], [0, 0, 1, 1], [], []>} : vector<8x8xbf16>, vector<8x8xbf16>, vector<8x8xf32> -> vector<8x8xf32>
    %36 = vector.extract_strided_slice %13 {offsets = [0, 8], sizes = [8, 8], strides = [1, 1]} : vector<8x32xf32> to vector<8x8xf32>
    %37 = arith.truncf %36 : vector<8x8xf32> to vector<8x8xbf16>
    %38 = vector.extract_strided_slice %14 {offsets = [0, 8], sizes = [8, 8], strides = [1, 1]} : vector<8x32xf32> to vector<8x8xf32>
    %39 = arith.truncf %38 : vector<8x8xf32> to vector<8x8xbf16>
    %40 = vector.extract_strided_slice %15 {offsets = [0, 8], sizes = [8, 8], strides = [1, 1]} : vector<8x32xf32> to vector<8x8xf32>
    %41 = arith.truncf %40 : vector<8x8xf32> to vector<8x8xbf16>
    %cst_15 = arith.constant dense<0.000000e+00> : vector<8x8xf32>
    %42 = tpu.matmul %37, %39, %cst_15 {dimension_numbers = #tpu.dot_dimension_numbers<[1], [1], [0], [0], [0, 0, 1, 0], [], []>} : vector<8x8xbf16>, vector<8x8xbf16>, vector<8x8xf32> -> vector<8x8xf32>
    %43 = arith.addf %42, %12 : vector<8x8xf32>
    %cst_16 = arith.constant dense<0xFF800000> : vector<8xf32>
    %44 = vector.multi_reduction <maximumf>, %43, %cst_16 [1] : vector<8x8xf32> to vector<8xf32>
    %45 = vector.shape_cast %44 : vector<8xf32> to vector<8x1xf32>
    %46 = vector.broadcast %45 : vector<8x1xf32> to vector<8x8xf32>
    %47 = arith.subf %43, %46 : vector<8x8xf32>
    %48 = math.exp %47 : vector<8x8xf32>
    %cst_17 = arith.constant dense<0.000000e+00> : vector<8xf32>
    %49 = vector.multi_reduction <add>, %48, %cst_17 [1] : vector<8x8xf32> to vector<8xf32>
    %50 = vector.shape_cast %49 : vector<8xf32> to vector<8x1xf32>
    %51 = tpu.reciprocal %50 {approx = true} : vector<8x1xf32> -> vector<8x1xf32>
    %52 = vector.broadcast %51 : vector<8x1xf32> to vector<8x8xf32>
    %53 = arith.mulf %48, %52 : vector<8x8xf32>
    %54 = arith.truncf %53 : vector<8x8xf32> to vector<8x8xbf16>
    %cst_18 = arith.constant dense<0.000000e+00> : vector<8x8xf32>
    %55 = tpu.matmul %54, %41, %cst_18 {dimension_numbers = #tpu.dot_dimension_numbers<[1], [0], [0], [1], [0, 0, 1, 1], [], []>} : vector<8x8xbf16>, vector<8x8xbf16>, vector<8x8xf32> -> vector<8x8xf32>
    %56 = vector.extract_strided_slice %13 {offsets = [0, 16], sizes = [8, 8], strides = [1, 1]} : vector<8x32xf32> to vector<8x8xf32>
    %57 = arith.truncf %56 : vector<8x8xf32> to vector<8x8xbf16>
    %58 = vector.extract_strided_slice %14 {offsets = [0, 16], sizes = [8, 8], strides = [1, 1]} : vector<8x32xf32> to vector<8x8xf32>
    %59 = arith.truncf %58 : vector<8x8xf32> to vector<8x8xbf16>
    %60 = vector.extract_strided_slice %15 {offsets = [0, 16], sizes = [8, 8], strides = [1, 1]} : vector<8x32xf32> to vector<8x8xf32>
    %61 = arith.truncf %60 : vector<8x8xf32> to vector<8x8xbf16>
    %cst_19 = arith.constant dense<0.000000e+00> : vector<8x8xf32>
    %62 = tpu.matmul %57, %59, %cst_19 {dimension_numbers = #tpu.dot_dimension_numbers<[1], [1], [0], [0], [0, 0, 1, 0], [], []>} : vector<8x8xbf16>, vector<8x8xbf16>, vector<8x8xf32> -> vector<8x8xf32>
    %63 = arith.addf %62, %12 : vector<8x8xf32>
    %cst_20 = arith.constant dense<0xFF800000> : vector<8xf32>
    %64 = vector.multi_reduction <maximumf>, %63, %cst_20 [1] : vector<8x8xf32> to vector<8xf32>
    %65 = vector.shape_cast %64 : vector<8xf32> to vector<8x1xf32>
    %66 = vector.broadcast %65 : vector<8x1xf32> to vector<8x8xf32>
    %67 = arith.subf %63, %66 : vector<8x8xf32>
    %68 = math.exp %67 : vector<8x8xf32>
    %cst_21 = arith.constant dense<0.000000e+00> : vector<8xf32>
    %69 = vector.multi_reduction <add>, %68, %cst_21 [1] : vector<8x8xf32> to vector<8xf32>
    %70 = vector.shape_cast %69 : vector<8xf32> to vector<8x1xf32>
    %71 = tpu.reciprocal %70 {approx = true} : vector<8x1xf32> -> vector<8x1xf32>
    %72 = vector.broadcast %71 : vector<8x1xf32> to vector<8x8xf32>
    %73 = arith.mulf %68, %72 : vector<8x8xf32>
    %74 = arith.truncf %73 : vector<8x8xf32> to vector<8x8xbf16>
    %cst_22 = arith.constant dense<0.000000e+00> : vector<8x8xf32>
    %75 = tpu.matmul %74, %61, %cst_22 {dimension_numbers = #tpu.dot_dimension_numbers<[1], [0], [0], [1], [0, 0, 1, 1], [], []>} : vector<8x8xbf16>, vector<8x8xbf16>, vector<8x8xf32> -> vector<8x8xf32>
    %76 = vector.extract_strided_slice %13 {offsets = [0, 24], sizes = [8, 8], strides = [1, 1]} : vector<8x32xf32> to vector<8x8xf32>
    %77 = arith.truncf %76 : vector<8x8xf32> to vector<8x8xbf16>
    %78 = vector.extract_strided_slice %14 {offsets = [0, 24], sizes = [8, 8], strides = [1, 1]} : vector<8x32xf32> to vector<8x8xf32>
    %79 = arith.truncf %78 : vector<8x8xf32> to vector<8x8xbf16>
    %80 = vector.extract_strided_slice %15 {offsets = [0, 24], sizes = [8, 8], strides = [1, 1]} : vector<8x32xf32> to vector<8x8xf32>
    %81 = arith.truncf %80 : vector<8x8xf32> to vector<8x8xbf16>
    %cst_23 = arith.constant dense<0.000000e+00> : vector<8x8xf32>
    %82 = tpu.matmul %77, %79, %cst_23 {dimension_numbers = #tpu.dot_dimension_numbers<[1], [1], [0], [0], [0, 0, 1, 0], [], []>} : vector<8x8xbf16>, vector<8x8xbf16>, vector<8x8xf32> -> vector<8x8xf32>
    %83 = arith.addf %82, %12 : vector<8x8xf32>
    %cst_24 = arith.constant dense<0xFF800000> : vector<8xf32>
    %84 = vector.multi_reduction <maximumf>, %83, %cst_24 [1] : vector<8x8xf32> to vector<8xf32>
    %85 = vector.shape_cast %84 : vector<8xf32> to vector<8x1xf32>
    %86 = vector.broadcast %85 : vector<8x1xf32> to vector<8x8xf32>
    %87 = arith.subf %83, %86 : vector<8x8xf32>
    %88 = math.exp %87 : vector<8x8xf32>
    %cst_25 = arith.constant dense<0.000000e+00> : vector<8xf32>
    %89 = vector.multi_reduction <add>, %88, %cst_25 [1] : vector<8x8xf32> to vector<8xf32>
    %90 = vector.shape_cast %89 : vector<8xf32> to vector<8x1xf32>
    %91 = tpu.reciprocal %90 {approx = true} : vector<8x1xf32> -> vector<8x1xf32>
    %92 = vector.broadcast %91 : vector<8x1xf32> to vector<8x8xf32>
    %93 = arith.mulf %88, %92 : vector<8x8xf32>
    %94 = arith.truncf %93 : vector<8x8xf32> to vector<8x8xbf16>
    %cst_26 = arith.constant dense<0.000000e+00> : vector<8x8xf32>
    %95 = tpu.matmul %94, %81, %cst_26 {dimension_numbers = #tpu.dot_dimension_numbers<[1], [0], [0], [1], [0, 0, 1, 1], [], []>} : vector<8x8xbf16>, vector<8x8xbf16>, vector<8x8xf32> -> vector<8x8xf32>
    %96 = tpu.concatenate %35, %55, %75, %95 in 1 : vector<8x8xf32>, vector<8x8xf32>, vector<8x8xf32>, vector<8x8xf32> -> vector<8x32xf32>
    %97 = arith.truncf %96 : vector<8x32xf32> to vector<8x32xbf16>
    %c0_27 = arith.constant 0 : index
    %c0_28 = arith.constant 0 : index
    %98 = vector.load %arg4[%c0_27, %c0_28] : memref<32x32xbf16, #tpu.memory_space<vmem>>, vector<32x32xbf16>
    %cst_29 = arith.constant dense<0.000000e+00> : vector<8x32xf32>
    %99 = tpu.matmul %97, %98, %cst_29 {dimension_numbers = #tpu.dot_dimension_numbers<[1], [0], [0], [1], [0, 0, 1, 1], [], []>} : vector<8x32xbf16>, vector<32x32xbf16>, vector<8x32xf32> -> vector<8x32xf32>
    %c0_30 = arith.constant 0 : index
    %c0_31 = arith.constant 0 : index
    %100 = vector.load %arg5[%c0_30, %c0_31] : memref<1x32xf32, #tpu.memory_space<vmem>>, vector<1x32xf32>
    %101 = vector.broadcast %100 : vector<1x32xf32> to vector<8x32xf32>
    %102 = arith.addf %99, %101 : vector<8x32xf32>
    %103 = arith.addf %1, %102 : vector<8x32xf32>
    %c0_32 = arith.constant 0 : index
    %c0_33 = arith.constant 0 : index
    %104 = vector.load %arg6[%c0_32, %c0_33] : memref<1x32xf32, #tpu.memory_space<vmem>>, vector<1x32xf32>
    %c0_34 = arith.constant 0 : index
    %c0_35 = arith.constant 0 : index
    %105 = vector.load %arg7[%c0_34, %c0_35] : memref<1x32xf32, #tpu.memory_space<vmem>>, vector<1x32xf32>
    %cst_36 = arith.constant dense<0.000000e+00> : vector<8xf32>
    %106 = vector.multi_reduction <add>, %103, %cst_36 [1] : vector<8x32xf32> to vector<8xf32>
    %107 = vector.shape_cast %106 : vector<8xf32> to vector<8x1xf32>
    %cst_37 = arith.constant 3.200000e+01 : f32
    %108 = vector.broadcast %cst_37 : f32 to vector<8x1xf32>
    %109 = arith.divf %107, %108 : vector<8x1xf32>
    %110 = vector.broadcast %109 : vector<8x1xf32> to vector<8x32xf32>
    %111 = arith.subf %103, %110 : vector<8x32xf32>
    %112 = arith.mulf %111, %111 : vector<8x32xf32>
    %cst_38 = arith.constant dense<0.000000e+00> : vector<8xf32>
    %113 = vector.multi_reduction <add>, %112, %cst_38 [1] : vector<8x32xf32> to vector<8xf32>
    %114 = vector.shape_cast %113 : vector<8xf32> to vector<8x1xf32>
    %cst_39 = arith.constant 3.200000e+01 : f32
    %115 = vector.broadcast %cst_39 : f32 to vector<8x1xf32>
    %116 = arith.divf %114, %115 : vector<8x1xf32>
    %cst_40 = arith.constant 9.99999974E-6 : f32
    %117 = vector.broadcast %cst_40 : f32 to vector<8x1xf32>
    %118 = arith.addf %116, %117 : vector<8x1xf32>
    %119 = math.rsqrt %118 : vector<8x1xf32>
    %120 = vector.broadcast %109 : vector<8x1xf32> to vector<8x32xf32>
    %121 = arith.subf %103, %120 : vector<8x32xf32>
    %122 = vector.broadcast %119 : vector<8x1xf32> to vector<8x32xf32>
    %123 = arith.mulf %121, %122 : vector<8x32xf32>
    %124 = vector.broadcast %104 : vector<1x32xf32> to vector<8x32xf32>
    %125 = arith.mulf %123, %124 : vector<8x32xf32>
    %126 = vector.broadcast %105 : vector<1x32xf32> to vector<8x32xf32>
    %127 = arith.addf %125, %126 : vector<8x32xf32>
    %128 = arith.truncf %127 : vector<8x32xf32> to vector<8x32xbf16>
    %c0_41 = arith.constant 0 : index
    %c0_42 = arith.constant 0 : index
    %129 = vector.load %arg8[%c0_41, %c0_42] : memref<32x64xbf16, #tpu.memory_space<vmem>>, vector<32x64xbf16>
    %cst_43 = arith.constant dense<0.000000e+00> : vector<8x64xf32>
    %130 = tpu.matmul %128, %129, %cst_43 {dimension_numbers = #tpu.dot_dimension_numbers<[1], [0], [0], [1], [0, 0, 1, 1], [], []>} : vector<8x32xbf16>, vector<32x64xbf16>, vector<8x64xf32> -> vector<8x64xf32>
    %c0_44 = arith.constant 0 : index
    %c0_45 = arith.constant 0 : index
    %131 = vector.load %arg9[%c0_44, %c0_45] : memref<1x64xf32, #tpu.memory_space<vmem>>, vector<1x64xf32>
    %132 = vector.broadcast %131 : vector<1x64xf32> to vector<8x64xf32>
    %133 = arith.addf %130, %132 : vector<8x64xf32>
    %cst_46 = arith.constant 0.000000e+00 : f32
    %134 = vector.broadcast %cst_46 : f32 to vector<8x64xf32>
    %135 = arith.maximumf %133, %134 : vector<8x64xf32>
    %136 = arith.truncf %135 : vector<8x64xf32> to vector<8x64xbf16>
    %c0_47 = arith.constant 0 : index
    %c0_48 = arith.constant 0 : index
    %137 = vector.load %arg10[%c0_47, %c0_48] : memref<64x32xbf16, #tpu.memory_space<vmem>>, vector<64x32xbf16>
    %cst_49 = arith.constant dense<0.000000e+00> : vector<8x32xf32>
    %138 = tpu.matmul %136, %137, %cst_49 {dimension_numbers = #tpu.dot_dimension_numbers<[1], [0], [0], [1], [0, 0, 1, 1], [], []>} : vector<8x64xbf16>, vector<64x32xbf16>, vector<8x32xf32> -> vector<8x32xf32>
    %c0_50 = arith.constant 0 : index
    %c0_51 = arith.constant 0 : index
    %139 = vector.load %arg11[%c0_50, %c0_51] : memref<1x32xf32, #tpu.memory_space<vmem>>, vector<1x32xf32>
    %140 = vector.broadcast %139 : vector<1x32xf32> to vector<8x32xf32>
    %141 = arith.addf %138, %140 : vector<8x32xf32>
    %142 = arith.addf %127, %141 : vector<8x32xf32>
    %c0_52 = arith.constant 0 : index
    %c0_53 = arith.constant 0 : index
    %143 = vector.load %arg12[%c0_52, %c0_53] : memref<1x32xf32, #tpu.memory_space<vmem>>, vector<1x32xf32>
    %c0_54 = arith.constant 0 : index
    %c0_55 = arith.constant 0 : index
    %144 = vector.load %arg13[%c0_54, %c0_55] : memref<1x32xf32, #tpu.memory_space<vmem>>, vector<1x32xf32>
    %cst_56 = arith.constant dense<0.000000e+00> : vector<8xf32>
    %145 = vector.multi_reduction <add>, %142, %cst_56 [1] : vector<8x32xf32> to vector<8xf32>
    %146 = vector.shape_cast %145 : vector<8xf32> to vector<8x1xf32>
    %cst_57 = arith.constant 3.200000e+01 : f32
    %147 = vector.broadcast %cst_57 : f32 to vector<8x1xf32>
    %148 = arith.divf %146, %147 : vector<8x1xf32>
    %149 = vector.broadcast %148 : vector<8x1xf32> to vector<8x32xf32>
    %150 = arith.subf %142, %149 : vector<8x32xf32>
    %151 = arith.mulf %150, %150 : vector<8x32xf32>
    %cst_58 = arith.constant dense<0.000000e+00> : vector<8xf32>
    %152 = vector.multi_reduction <add>, %151, %cst_58 [1] : vector<8x32xf32> to vector<8xf32>
    %153 = vector.shape_cast %152 : vector<8xf32> to vector<8x1xf32>
    %cst_59 = arith.constant 3.200000e+01 : f32
    %154 = vector.broadcast %cst_59 : f32 to vector<8x1xf32>
    %155 = arith.divf %153, %154 : vector<8x1xf32>
    %cst_60 = arith.constant 9.99999974E-6 : f32
    %156 = vector.broadcast %cst_60 : f32 to vector<8x1xf32>
    %157 = arith.addf %155, %156 : vector<8x1xf32>
    %158 = math.rsqrt %157 : vector<8x1xf32>
    %159 = vector.broadcast %148 : vector<8x1xf32> to vector<8x32xf32>
    %160 = arith.subf %142, %159 : vector<8x32xf32>
    %161 = vector.broadcast %158 : vector<8x1xf32> to vector<8x32xf32>
    %162 = arith.mulf %160, %161 : vector<8x32xf32>
    %163 = vector.broadcast %143 : vector<1x32xf32> to vector<8x32xf32>
    %164 = arith.mulf %162, %163 : vector<8x32xf32>
    %165 = vector.broadcast %144 : vector<1x32xf32> to vector<8x32xf32>
    %166 = arith.addf %164, %165 : vector<8x32xf32>
    %c0_61 = arith.constant 0 : index
    %c0_62 = arith.constant 0 : index
    %c0_63 = arith.constant 0 : index
    %167 = vector.load %arg16[%c0_61, %c0_62, %c0_63] : memref<1x8x32xf32, #tpu.memory_space<vmem>>, vector<1x8x32xf32>
    %168 = vector.shape_cast %167 : vector<1x8x32xf32> to vector<8x32xf32>
    %169 = vector.shape_cast %166 : vector<8x32xf32> to vector<1x8x32xf32>
    tpu.vector_store %arg16[%c0_61, %c0_62, %c0_63], %169 {strides = array<i32>} : memref<1x8x32xf32, #tpu.memory_space<vmem>>, vector<1x8x32xf32>,
    return
  }
  func.func @transform_0(%arg0: i32) -> (i32, i32, i32) {
    %c0_i32 = arith.constant 0 : i32
    %c0_i32_0 = arith.constant 0 : i32
    %c0_i32_1 = arith.constant 0 : i32
    return %arg0, %c0_i32, %c0_i32_0 : i32, i32, i32
  }
  func.func @transform_1(%arg0: i32) -> (i32, i32) {
    %c0_i32 = arith.constant 0 : i32
    %c0_i32_0 = arith.constant 0 : i32
    %c0_i32_1 = arith.constant 0 : i32
    return %c0_i32, %c0_i32_0 : i32, i32
  }
  func.func @transform_2(%arg0: i32) -> (i32, i32) {
    %c0_i32 = arith.constant 0 : i32
    %c0_i32_0 = arith.constant 0 : i32
    %c0_i32_1 = arith.constant 0 : i32
    return %c0_i32, %c0_i32_0 : i32, i32
  }
  func.func @transform_3(%arg0: i32) -> (i32, i32) {
    %c0_i32 = arith.constant 0 : i32
    %c0_i32_0 = arith.constant 0 : i32
    %c0_i32_1 = arith.constant 0 : i32
    return %c0_i32, %c0_i32_0 : i32, i32
  }
  func.func @transform_4(%arg0: i32) -> (i32, i32) {
    %c0_i32 = arith.constant 0 : i32
    %c0_i32_0 = arith.constant 0 : i32
    %c0_i32_1 = arith.constant 0 : i32
    return %c0_i32, %c0_i32_0 : i32, i32
  }
  func.func @transform_5(%arg0: i32) -> (i32, i32) {
    %c0_i32 = arith.constant 0 : i32
    %c0_i32_0 = arith.constant 0 : i32
    %c0_i32_1 = arith.constant 0 : i32
    return %c0_i32, %c0_i32_0 : i32, i32
  }
  func.func @transform_6(%arg0: i32) -> (i32, i32) {
    %c0_i32 = arith.constant 0 : i32
    %c0_i32_0 = arith.constant 0 : i32
    %c0_i32_1 = arith.constant 0 : i32
    return %c0_i32, %c0_i32_0 : i32, i32
  }
  func.func @transform_7(%arg0: i32) -> (i32, i32) {
    %c0_i32 = arith.constant 0 : i32
    %c0_i32_0 = arith.constant 0 : i32
    %c0_i32_1 = arith.constant 0 : i32
    return %c0_i32, %c0_i32_0 : i32, i32
  }
  func.func @transform_8(%arg0: i32) -> (i32, i32) {
    %c0_i32 = arith.constant 0 : i32
    %c0_i32_0 = arith.constant 0 : i32
    %c0_i32_1 = arith.constant 0 : i32
    return %c0_i32, %c0_i32_0 : i32, i32
  }
  func.func @transform_9(%arg0: i32) -> (i32, i32) {
    %c0_i32 = arith.constant 0 : i32
    %c0_i32_0 = arith.constant 0 : i32
    %c0_i32_1 = arith.constant 0 : i32
    return %c0_i32, %c0_i32_0 : i32, i32
  }
  func.func @transform_10(%arg0: i32) -> (i32, i32) {
    %c0_i32 = arith.constant 0 : i32
    %c0_i32_0 = arith.constant 0 : i32
    %c0_i32_1 = arith.constant 0 : i32
    return %c0_i32, %c0_i32_0 : i32, i32
  }
  func.func @transform_11(%arg0: i32) -> (i32, i32) {
    %c0_i32 = arith.constant 0 : i32
    %c0_i32_0 = arith.constant 0 : i32
    %c0_i32_1 = arith.constant 0 : i32
    return %c0_i32, %c0_i32_0 : i32, i32
  }
  func.func @transform_12(%arg0: i32) -> (i32, i32) {
    %c0_i32 = arith.constant 0 : i32
    %c0_i32_0 = arith.constant 0 : i32
    %c0_i32_1 = arith.constant 0 : i32
    return %c0_i32, %c0_i32_0 : i32, i32
  }
  func.func @transform_13(%arg0: i32) -> (i32, i32) {
    %c0_i32 = arith.constant 0 : i32
    %c0_i32_0 = arith.constant 0 : i32
    %c0_i32_1 = arith.constant 0 : i32
    return %c0_i32, %c0_i32_0 : i32, i32
  }
  func.func @transform_14(%arg0: i32) -> (i32, i32, i32) {
    %c0_i32 = arith.constant 0 : i32
    %c0_i32_0 = arith.constant 0 : i32
    %c0_i32_1 = arith.constant 0 : i32
    return %arg0, %c0_i32, %c0_i32_0 : i32, i32, i32
  }
  func.func @transform_15(%arg0: i32) -> (i32, i32, i32) {
    %c0_i32 = arith.constant 0 : i32
    %c0_i32_0 = arith.constant 0 : i32
    %c0_i32_1 = arith.constant 0 : i32
    return %arg0, %c0_i32, %c0_i32_0 : i32, i32, i32
  }
}

module attributes {stable_mosaic.version = 11 : i64} {
  func.func @_decoder_layer_kernel(%arg0: i32, %arg1: memref<1x8x32xf32, #tpu.memory_space<vmem>>, %arg2: memref<1x8x32xf32, #tpu.memory_space<vmem>>, %arg3: memref<32x96xbf16, #tpu.memory_space<vmem>>, %arg4: memref<1x96xf32, #tpu.memory_space<vmem>>, %arg5: memref<32x32xbf16, #tpu.memory_space<vmem>>, %arg6: memref<1x32xf32, #tpu.memory_space<vmem>>, %arg7: memref<1x32xf32, #tpu.memory_space<vmem>>, %arg8: memref<1x32xf32, #tpu.memory_space<vmem>>, %arg9: memref<32x32xbf16, #tpu.memory_space<vmem>>, %arg10: memref<1x32xf32, #tpu.memory_space<vmem>>, %arg11: memref<32x64xbf16, #tpu.memory_space<vmem>>, %arg12: memref<1x64xf32, #tpu.memory_space<vmem>>, %arg13: memref<32x32xbf16, #tpu.memory_space<vmem>>, %arg14: memref<1x32xf32, #tpu.memory_space<vmem>>, %arg15: memref<1x32xf32, #tpu.memory_space<vmem>>, %arg16: memref<1x32xf32, #tpu.memory_space<vmem>>, %arg17: memref<32x64xbf16, #tpu.memory_space<vmem>>, %arg18: memref<1x64xf32, #tpu.memory_space<vmem>>, %arg19: memref<64x32xbf16, #tpu.memory_space<vmem>>, %arg20: memref<1x32xf32, #tpu.memory_space<vmem>>, %arg21: memref<1x32xf32, #tpu.memory_space<vmem>>, %arg22: memref<1x32xf32, #tpu.memory_space<vmem>>, %arg23: memref<8x8xf32, #tpu.memory_space<vmem>>, %arg24: memref<1x1x8xf32, #tpu.memory_space<vmem>>, %arg25: memref<1x1x8xf32, #tpu.memory_space<vmem>>, %arg26: memref<1x8x32xf32, #tpu.memory_space<vmem>>) attributes {dimension_semantics = [#tpu.dimension_semantics<parallel>], iteration_bounds = array<i64: 2>, scalar_prefetch = 0 : i64, scratch_operands = 0 : i64, tpu.core_type = #tpu.core_type<tc>, window_params = [{transform_indices = @transform_0, window_bounds = array<i64: 1, 8, 32>}, {transform_indices = @transform_1, window_bounds = array<i64: 1, 8, 32>}, {pipeline_mode = #tpu.pipeline_mode<synchronous>, transform_indices = @transform_2, window_bounds = array<i64: 32, 96>}, {pipeline_mode = #tpu.pipeline_mode<synchronous>, transform_indices = @transform_3, window_bounds = array<i64: 1, 96>}, {pipeline_mode = #tpu.pipeline_mode<synchronous>, transform_indices = @transform_4, window_bounds = array<i64: 32, 32>}, {pipeline_mode = #tpu.pipeline_mode<synchronous>, transform_indices = @transform_5, window_bounds = array<i64: 1, 32>}, {pipeline_mode = #tpu.pipeline_mode<synchronous>, transform_indices = @transform_6, window_bounds = array<i64: 1, 32>}, {pipeline_mode = #tpu.pipeline_mode<synchronous>, transform_indices = @transform_7, window_bounds = array<i64: 1, 32>}, {pipeline_mode = #tpu.pipeline_mode<synchronous>, transform_indices = @transform_8, window_bounds = array<i64: 32, 32>}, {pipeline_mode = #tpu.pipeline_mode<synchronous>, transform_indices = @transform_9, window_bounds = array<i64: 1, 32>}, {pipeline_mode = #tpu.pipeline_mode<synchronous>, transform_indices = @transform_10, window_bounds = array<i64: 32, 64>}, {pipeline_mode = #tpu.pipeline_mode<synchronous>, transform_indices = @transform_11, window_bounds = array<i64: 1, 64>}, {pipeline_mode = #tpu.pipeline_mode<synchronous>, transform_indices = @transform_12, window_bounds = array<i64: 32, 32>}, {pipeline_mode = #tpu.pipeline_mode<synchronous>, transform_indices = @transform_13, window_bounds = array<i64: 1, 32>}, {pipeline_mode = #tpu.pipeline_mode<synchronous>, transform_indices = @transform_14, window_bounds = array<i64: 1, 32>}, {pipeline_mode = #tpu.pipeline_mode<synchronous>, transform_indices = @transform_15, window_bounds = array<i64: 1, 32>}, {pipeline_mode = #tpu.pipeline_mode<synchronous>, transform_indices = @transform_16, window_bounds = array<i64: 32, 64>}, {pipeline_mode = #tpu.pipeline_mode<synchronous>, transform_indices = @transform_17, window_bounds = array<i64: 1, 64>}, {pipeline_mode = #tpu.pipeline_mode<synchronous>, transform_indices = @transform_18, window_bounds = array<i64: 64, 32>}, {pipeline_mode = #tpu.pipeline_mode<synchronous>, transform_indices = @transform_19, window_bounds = array<i64: 1, 32>}, {pipeline_mode = #tpu.pipeline_mode<synchronous>, transform_indices = @transform_20, window_bounds = array<i64: 1, 32>}, {pipeline_mode = #tpu.pipeline_mode<synchronous>, transform_indices = @transform_21, window_bounds = array<i64: 1, 32>}, {pipeline_mode = #tpu.pipeline_mode<synchronous>, transform_indices = @transform_22, window_bounds = array<i64: 8, 8>}, {transform_indices = @transform_23, window_bounds = array<i64: 1, 1, 8>}, {transform_indices = @transform_24, window_bounds = array<i64: 1, 1, 8>}, {transform_indices = @transform_25, window_bounds = array<i64: 1, 8, 32>}]} {
    %c0 = arith.constant 0 : index
    %c0_0 = arith.constant 0 : index
    %c0_1 = arith.constant 0 : index
    %0 = vector.load %arg1[%c0, %c0_0, %c0_1] : memref<1x8x32xf32, #tpu.memory_space<vmem>>, vector<1x8x32xf32>
    %1 = vector.shape_cast %0 : vector<1x8x32xf32> to vector<8x32xf32>
    %c0_2 = arith.constant 0 : index
    %c0_3 = arith.constant 0 : index
    %c0_4 = arith.constant 0 : index
    %2 = vector.load %arg2[%c0_2, %c0_3, %c0_4] : memref<1x8x32xf32, #tpu.memory_space<vmem>>, vector<1x8x32xf32>
    %3 = vector.shape_cast %2 : vector<1x8x32xf32> to vector<8x32xf32>
    %4 = arith.truncf %1 : vector<8x32xf32> to vector<8x32xbf16>
    %c0_5 = arith.constant 0 : index
    %c0_6 = arith.constant 0 : index
    %5 = vector.load %arg3[%c0_5, %c0_6] : memref<32x96xbf16, #tpu.memory_space<vmem>>, vector<32x96xbf16>
    %cst = arith.constant dense<0.000000e+00> : vector<8x96xf32>
    %6 = tpu.matmul %4, %5, %cst {dimension_numbers = #tpu.dot_dimension_numbers<[1], [0], [0], [1], [0, 0, 1, 1], [], []>} : vector<8x32xbf16>, vector<32x96xbf16>, vector<8x96xf32> -> vector<8x96xf32>
    %c0_7 = arith.constant 0 : index
    %c0_8 = arith.constant 0 : index
    %7 = vector.load %arg4[%c0_7, %c0_8] : memref<1x96xf32, #tpu.memory_space<vmem>>, vector<1x96xf32>
    %8 = vector.broadcast %7 : vector<1x96xf32> to vector<8x96xf32>
    %9 = arith.addf %6, %8 : vector<8x96xf32>
    %c0_9 = arith.constant 0 : index
    %c0_10 = arith.constant 0 : index
    %10 = vector.load %arg23[%c0_9, %c0_10] : memref<8x8xf32, #tpu.memory_space<vmem>>, vector<8x8xf32>
    %c0_11 = arith.constant 0 : index
    %c0_12 = arith.constant 0 : index
    %c0_13 = arith.constant 0 : index
    %11 = vector.load %arg24[%c0_11, %c0_12, %c0_13] : memref<1x1x8xf32, #tpu.memory_space<vmem>>, vector<1x1x8xf32>
    %12 = vector.shape_cast %11 : vector<1x1x8xf32> to vector<1x8xf32>
    %13 = vector.broadcast %12 : vector<1x8xf32> to vector<8x8xf32>
    %14 = arith.addf %10, %13 : vector<8x8xf32>
    %15 = vector.extract_strided_slice %9 {offsets = [0, 0], sizes = [8, 32], strides = [1, 1]} : vector<8x96xf32> to vector<8x32xf32>
    %16 = vector.extract_strided_slice %9 {offsets = [0, 32], sizes = [8, 32], strides = [1, 1]} : vector<8x96xf32> to vector<8x32xf32>
    %17 = vector.extract_strided_slice %9 {offsets = [0, 64], sizes = [8, 32], strides = [1, 1]} : vector<8x96xf32> to vector<8x32xf32>
    %18 = vector.extract_strided_slice %15 {offsets = [0, 0], sizes = [8, 8], strides = [1, 1]} : vector<8x32xf32> to vector<8x8xf32>
    %19 = arith.truncf %18 : vector<8x8xf32> to vector<8x8xbf16>
    %20 = vector.extract_strided_slice %16 {offsets = [0, 0], sizes = [8, 8], strides = [1, 1]} : vector<8x32xf32> to vector<8x8xf32>
    %21 = arith.truncf %20 : vector<8x8xf32> to vector<8x8xbf16>
    %22 = vector.extract_strided_slice %17 {offsets = [0, 0], sizes = [8, 8], strides = [1, 1]} : vector<8x32xf32> to vector<8x8xf32>
    %23 = arith.truncf %22 : vector<8x8xf32> to vector<8x8xbf16>
    %cst_14 = arith.constant dense<0.000000e+00> : vector<8x8xf32>
    %24 = tpu.matmul %19, %21, %cst_14 {dimension_numbers = #tpu.dot_dimension_numbers<[1], [1], [0], [0], [0, 0, 1, 0], [], []>} : vector<8x8xbf16>, vector<8x8xbf16>, vector<8x8xf32> -> vector<8x8xf32>
    %25 = arith.addf %24, %14 : vector<8x8xf32>
    %cst_15 = arith.constant dense<0xFF800000> : vector<8xf32>
    %26 = vector.multi_reduction <maximumf>, %25, %cst_15 [1] : vector<8x8xf32> to vector<8xf32>
    %27 = vector.shape_cast %26 : vector<8xf32> to vector<8x1xf32>
    %28 = vector.broadcast %27 : vector<8x1xf32> to vector<8x8xf32>
    %29 = arith.subf %25, %28 : vector<8x8xf32>
    %30 = math.exp %29 : vector<8x8xf32>
    %cst_16 = arith.constant dense<0.000000e+00> : vector<8xf32>
    %31 = vector.multi_reduction <add>, %30, %cst_16 [1] : vector<8x8xf32> to vector<8xf32>
    %32 = vector.shape_cast %31 : vector<8xf32> to vector<8x1xf32>
    %33 = tpu.reciprocal %32 {approx = true} : vector<8x1xf32> -> vector<8x1xf32>
    %34 = vector.broadcast %33 : vector<8x1xf32> to vector<8x8xf32>
    %35 = arith.mulf %30, %34 : vector<8x8xf32>
    %36 = arith.truncf %35 : vector<8x8xf32> to vector<8x8xbf16>
    %cst_17 = arith.constant dense<0.000000e+00> : vector<8x8xf32>
    %37 = tpu.matmul %36, %23, %cst_17 {dimension_numbers = #tpu.dot_dimension_numbers<[1], [0], [0], [1], [0, 0, 1, 1], [], []>} : vector<8x8xbf16>, vector<8x8xbf16>, vector<8x8xf32> -> vector<8x8xf32>
    %38 = vector.extract_strided_slice %15 {offsets = [0, 8], sizes = [8, 8], strides = [1, 1]} : vector<8x32xf32> to vector<8x8xf32>
    %39 = arith.truncf %38 : vector<8x8xf32> to vector<8x8xbf16>
    %40 = vector.extract_strided_slice %16 {offsets = [0, 8], sizes = [8, 8], strides = [1, 1]} : vector<8x32xf32> to vector<8x8xf32>
    %41 = arith.truncf %40 : vector<8x8xf32> to vector<8x8xbf16>
    %42 = vector.extract_strided_slice %17 {offsets = [0, 8], sizes = [8, 8], strides = [1, 1]} : vector<8x32xf32> to vector<8x8xf32>
    %43 = arith.truncf %42 : vector<8x8xf32> to vector<8x8xbf16>
    %cst_18 = arith.constant dense<0.000000e+00> : vector<8x8xf32>
    %44 = tpu.matmul %39, %41, %cst_18 {dimension_numbers = #tpu.dot_dimension_numbers<[1], [1], [0], [0], [0, 0, 1, 0], [], []>} : vector<8x8xbf16>, vector<8x8xbf16>, vector<8x8xf32> -> vector<8x8xf32>
    %45 = arith.addf %44, %14 : vector<8x8xf32>
    %cst_19 = arith.constant dense<0xFF800000> : vector<8xf32>
    %46 = vector.multi_reduction <maximumf>, %45, %cst_19 [1] : vector<8x8xf32> to vector<8xf32>
    %47 = vector.shape_cast %46 : vector<8xf32> to vector<8x1xf32>
    %48 = vector.broadcast %47 : vector<8x1xf32> to vector<8x8xf32>
    %49 = arith.subf %45, %48 : vector<8x8xf32>
    %50 = math.exp %49 : vector<8x8xf32>
    %cst_20 = arith.constant dense<0.000000e+00> : vector<8xf32>
    %51 = vector.multi_reduction <add>, %50, %cst_20 [1] : vector<8x8xf32> to vector<8xf32>
    %52 = vector.shape_cast %51 : vector<8xf32> to vector<8x1xf32>
    %53 = tpu.reciprocal %52 {approx = true} : vector<8x1xf32> -> vector<8x1xf32>
    %54 = vector.broadcast %53 : vector<8x1xf32> to vector<8x8xf32>
    %55 = arith.mulf %50, %54 : vector<8x8xf32>
    %56 = arith.truncf %55 : vector<8x8xf32> to vector<8x8xbf16>
    %cst_21 = arith.constant dense<0.000000e+00> : vector<8x8xf32>
    %57 = tpu.matmul %56, %43, %cst_21 {dimension_numbers = #tpu.dot_dimension_numbers<[1], [0], [0], [1], [0, 0, 1, 1], [], []>} : vector<8x8xbf16>, vector<8x8xbf16>, vector<8x8xf32> -> vector<8x8xf32>
    %58 = vector.extract_strided_slice %15 {offsets = [0, 16], sizes = [8, 8], strides = [1, 1]} : vector<8x32xf32> to vector<8x8xf32>
    %59 = arith.truncf %58 : vector<8x8xf32> to vector<8x8xbf16>
    %60 = vector.extract_strided_slice %16 {offsets = [0, 16], sizes = [8, 8], strides = [1, 1]} : vector<8x32xf32> to vector<8x8xf32>
    %61 = arith.truncf %60 : vector<8x8xf32> to vector<8x8xbf16>
    %62 = vector.extract_strided_slice %17 {offsets = [0, 16], sizes = [8, 8], strides = [1, 1]} : vector<8x32xf32> to vector<8x8xf32>
    %63 = arith.truncf %62 : vector<8x8xf32> to vector<8x8xbf16>
    %cst_22 = arith.constant dense<0.000000e+00> : vector<8x8xf32>
    %64 = tpu.matmul %59, %61, %cst_22 {dimension_numbers = #tpu.dot_dimension_numbers<[1], [1], [0], [0], [0, 0, 1, 0], [], []>} : vector<8x8xbf16>, vector<8x8xbf16>, vector<8x8xf32> -> vector<8x8xf32>
    %65 = arith.addf %64, %14 : vector<8x8xf32>
    %cst_23 = arith.constant dense<0xFF800000> : vector<8xf32>
    %66 = vector.multi_reduction <maximumf>, %65, %cst_23 [1] : vector<8x8xf32> to vector<8xf32>
    %67 = vector.shape_cast %66 : vector<8xf32> to vector<8x1xf32>
    %68 = vector.broadcast %67 : vector<8x1xf32> to vector<8x8xf32>
    %69 = arith.subf %65, %68 : vector<8x8xf32>
    %70 = math.exp %69 : vector<8x8xf32>
    %cst_24 = arith.constant dense<0.000000e+00> : vector<8xf32>
    %71 = vector.multi_reduction <add>, %70, %cst_24 [1] : vector<8x8xf32> to vector<8xf32>
    %72 = vector.shape_cast %71 : vector<8xf32> to vector<8x1xf32>
    %73 = tpu.reciprocal %72 {approx = true} : vector<8x1xf32> -> vector<8x1xf32>
    %74 = vector.broadcast %73 : vector<8x1xf32> to vector<8x8xf32>
    %75 = arith.mulf %70, %74 : vector<8x8xf32>
    %76 = arith.truncf %75 : vector<8x8xf32> to vector<8x8xbf16>
    %cst_25 = arith.constant dense<0.000000e+00> : vector<8x8xf32>
    %77 = tpu.matmul %76, %63, %cst_25 {dimension_numbers = #tpu.dot_dimension_numbers<[1], [0], [0], [1], [0, 0, 1, 1], [], []>} : vector<8x8xbf16>, vector<8x8xbf16>, vector<8x8xf32> -> vector<8x8xf32>
    %78 = vector.extract_strided_slice %15 {offsets = [0, 24], sizes = [8, 8], strides = [1, 1]} : vector<8x32xf32> to vector<8x8xf32>
    %79 = arith.truncf %78 : vector<8x8xf32> to vector<8x8xbf16>
    %80 = vector.extract_strided_slice %16 {offsets = [0, 24], sizes = [8, 8], strides = [1, 1]} : vector<8x32xf32> to vector<8x8xf32>
    %81 = arith.truncf %80 : vector<8x8xf32> to vector<8x8xbf16>
    %82 = vector.extract_strided_slice %17 {offsets = [0, 24], sizes = [8, 8], strides = [1, 1]} : vector<8x32xf32> to vector<8x8xf32>
    %83 = arith.truncf %82 : vector<8x8xf32> to vector<8x8xbf16>
    %cst_26 = arith.constant dense<0.000000e+00> : vector<8x8xf32>
    %84 = tpu.matmul %79, %81, %cst_26 {dimension_numbers = #tpu.dot_dimension_numbers<[1], [1], [0], [0], [0, 0, 1, 0], [], []>} : vector<8x8xbf16>, vector<8x8xbf16>, vector<8x8xf32> -> vector<8x8xf32>
    %85 = arith.addf %84, %14 : vector<8x8xf32>
    %cst_27 = arith.constant dense<0xFF800000> : vector<8xf32>
    %86 = vector.multi_reduction <maximumf>, %85, %cst_27 [1] : vector<8x8xf32> to vector<8xf32>
    %87 = vector.shape_cast %86 : vector<8xf32> to vector<8x1xf32>
    %88 = vector.broadcast %87 : vector<8x1xf32> to vector<8x8xf32>
    %89 = arith.subf %85, %88 : vector<8x8xf32>
    %90 = math.exp %89 : vector<8x8xf32>
    %cst_28 = arith.constant dense<0.000000e+00> : vector<8xf32>
    %91 = vector.multi_reduction <add>, %90, %cst_28 [1] : vector<8x8xf32> to vector<8xf32>
    %92 = vector.shape_cast %91 : vector<8xf32> to vector<8x1xf32>
    %93 = tpu.reciprocal %92 {approx = true} : vector<8x1xf32> -> vector<8x1xf32>
    %94 = vector.broadcast %93 : vector<8x1xf32> to vector<8x8xf32>
    %95 = arith.mulf %90, %94 : vector<8x8xf32>
    %96 = arith.truncf %95 : vector<8x8xf32> to vector<8x8xbf16>
    %cst_29 = arith.constant dense<0.000000e+00> : vector<8x8xf32>
    %97 = tpu.matmul %96, %83, %cst_29 {dimension_numbers = #tpu.dot_dimension_numbers<[1], [0], [0], [1], [0, 0, 1, 1], [], []>} : vector<8x8xbf16>, vector<8x8xbf16>, vector<8x8xf32> -> vector<8x8xf32>
    %98 = tpu.concatenate %37, %57, %77, %97 in 1 : vector<8x8xf32>, vector<8x8xf32>, vector<8x8xf32>, vector<8x8xf32> -> vector<8x32xf32>
    %99 = arith.truncf %98 : vector<8x32xf32> to vector<8x32xbf16>
    %c0_30 = arith.constant 0 : index
    %c0_31 = arith.constant 0 : index
    %100 = vector.load %arg5[%c0_30, %c0_31] : memref<32x32xbf16, #tpu.memory_space<vmem>>, vector<32x32xbf16>
    %cst_32 = arith.constant dense<0.000000e+00> : vector<8x32xf32>
    %101 = tpu.matmul %99, %100, %cst_32 {dimension_numbers = #tpu.dot_dimension_numbers<[1], [0], [0], [1], [0, 0, 1, 1], [], []>} : vector<8x32xbf16>, vector<32x32xbf16>, vector<8x32xf32> -> vector<8x32xf32>
    %c0_33 = arith.constant 0 : index
    %c0_34 = arith.constant 0 : index
    %102 = vector.load %arg6[%c0_33, %c0_34] : memref<1x32xf32, #tpu.memory_space<vmem>>, vector<1x32xf32>
    %103 = vector.broadcast %102 : vector<1x32xf32> to vector<8x32xf32>
    %104 = arith.addf %101, %103 : vector<8x32xf32>
    %105 = arith.addf %1, %104 : vector<8x32xf32>
    %c0_35 = arith.constant 0 : index
    %c0_36 = arith.constant 0 : index
    %106 = vector.load %arg7[%c0_35, %c0_36] : memref<1x32xf32, #tpu.memory_space<vmem>>, vector<1x32xf32>
    %c0_37 = arith.constant 0 : index
    %c0_38 = arith.constant 0 : index
    %107 = vector.load %arg8[%c0_37, %c0_38] : memref<1x32xf32, #tpu.memory_space<vmem>>, vector<1x32xf32>
    %cst_39 = arith.constant dense<0.000000e+00> : vector<8xf32>
    %108 = vector.multi_reduction <add>, %105, %cst_39 [1] : vector<8x32xf32> to vector<8xf32>
    %109 = vector.shape_cast %108 : vector<8xf32> to vector<8x1xf32>
    %cst_40 = arith.constant 3.200000e+01 : f32
    %110 = vector.broadcast %cst_40 : f32 to vector<8x1xf32>
    %111 = arith.divf %109, %110 : vector<8x1xf32>
    %112 = vector.broadcast %111 : vector<8x1xf32> to vector<8x32xf32>
    %113 = arith.subf %105, %112 : vector<8x32xf32>
    %114 = arith.mulf %113, %113 : vector<8x32xf32>
    %cst_41 = arith.constant dense<0.000000e+00> : vector<8xf32>
    %115 = vector.multi_reduction <add>, %114, %cst_41 [1] : vector<8x32xf32> to vector<8xf32>
    %116 = vector.shape_cast %115 : vector<8xf32> to vector<8x1xf32>
    %cst_42 = arith.constant 3.200000e+01 : f32
    %117 = vector.broadcast %cst_42 : f32 to vector<8x1xf32>
    %118 = arith.divf %116, %117 : vector<8x1xf32>
    %cst_43 = arith.constant 9.99999974E-6 : f32
    %119 = vector.broadcast %cst_43 : f32 to vector<8x1xf32>
    %120 = arith.addf %118, %119 : vector<8x1xf32>
    %121 = math.rsqrt %120 : vector<8x1xf32>
    %122 = vector.broadcast %111 : vector<8x1xf32> to vector<8x32xf32>
    %123 = arith.subf %105, %122 : vector<8x32xf32>
    %124 = vector.broadcast %121 : vector<8x1xf32> to vector<8x32xf32>
    %125 = arith.mulf %123, %124 : vector<8x32xf32>
    %126 = vector.broadcast %106 : vector<1x32xf32> to vector<8x32xf32>
    %127 = arith.mulf %125, %126 : vector<8x32xf32>
    %128 = vector.broadcast %107 : vector<1x32xf32> to vector<8x32xf32>
    %129 = arith.addf %127, %128 : vector<8x32xf32>
    %130 = arith.truncf %129 : vector<8x32xf32> to vector<8x32xbf16>
    %c0_44 = arith.constant 0 : index
    %c0_45 = arith.constant 0 : index
    %131 = vector.load %arg9[%c0_44, %c0_45] : memref<32x32xbf16, #tpu.memory_space<vmem>>, vector<32x32xbf16>
    %cst_46 = arith.constant dense<0.000000e+00> : vector<8x32xf32>
    %132 = tpu.matmul %130, %131, %cst_46 {dimension_numbers = #tpu.dot_dimension_numbers<[1], [0], [0], [1], [0, 0, 1, 1], [], []>} : vector<8x32xbf16>, vector<32x32xbf16>, vector<8x32xf32> -> vector<8x32xf32>
    %c0_47 = arith.constant 0 : index
    %c0_48 = arith.constant 0 : index
    %133 = vector.load %arg10[%c0_47, %c0_48] : memref<1x32xf32, #tpu.memory_space<vmem>>, vector<1x32xf32>
    %134 = vector.broadcast %133 : vector<1x32xf32> to vector<8x32xf32>
    %135 = arith.addf %132, %134 : vector<8x32xf32>
    %136 = arith.truncf %3 : vector<8x32xf32> to vector<8x32xbf16>
    %c0_49 = arith.constant 0 : index
    %c0_50 = arith.constant 0 : index
    %137 = vector.load %arg11[%c0_49, %c0_50] : memref<32x64xbf16, #tpu.memory_space<vmem>>, vector<32x64xbf16>
    %cst_51 = arith.constant dense<0.000000e+00> : vector<8x64xf32>
    %138 = tpu.matmul %136, %137, %cst_51 {dimension_numbers = #tpu.dot_dimension_numbers<[1], [0], [0], [1], [0, 0, 1, 1], [], []>} : vector<8x32xbf16>, vector<32x64xbf16>, vector<8x64xf32> -> vector<8x64xf32>
    %c0_52 = arith.constant 0 : index
    %c0_53 = arith.constant 0 : index
    %139 = vector.load %arg12[%c0_52, %c0_53] : memref<1x64xf32, #tpu.memory_space<vmem>>, vector<1x64xf32>
    %140 = vector.broadcast %139 : vector<1x64xf32> to vector<8x64xf32>
    %141 = arith.addf %138, %140 : vector<8x64xf32>
    %142 = vector.extract_strided_slice %141 {offsets = [0, 0], sizes = [8, 32], strides = [1, 1]} : vector<8x64xf32> to vector<8x32xf32>
    %143 = vector.extract_strided_slice %141 {offsets = [0, 32], sizes = [8, 32], strides = [1, 1]} : vector<8x64xf32> to vector<8x32xf32>
    %c0_54 = arith.constant 0 : index
    %c0_55 = arith.constant 0 : index
    %c0_56 = arith.constant 0 : index
    %144 = vector.load %arg25[%c0_54, %c0_55, %c0_56] : memref<1x1x8xf32, #tpu.memory_space<vmem>>, vector<1x1x8xf32>
    %145 = vector.shape_cast %144 : vector<1x1x8xf32> to vector<1x8xf32>
    %146 = vector.extract_strided_slice %135 {offsets = [0, 0], sizes = [8, 8], strides = [1, 1]} : vector<8x32xf32> to vector<8x8xf32>
    %147 = arith.truncf %146 : vector<8x8xf32> to vector<8x8xbf16>
    %148 = vector.extract_strided_slice %142 {offsets = [0, 0], sizes = [8, 8], strides = [1, 1]} : vector<8x32xf32> to vector<8x8xf32>
    %149 = arith.truncf %148 : vector<8x8xf32> to vector<8x8xbf16>
    %150 = vector.extract_strided_slice %143 {offsets = [0, 0], sizes = [8, 8], strides = [1, 1]} : vector<8x32xf32> to vector<8x8xf32>
    %151 = arith.truncf %150 : vector<8x8xf32> to vector<8x8xbf16>
    %cst_57 = arith.constant dense<0.000000e+00> : vector<8x8xf32>
    %152 = tpu.matmul %147, %149, %cst_57 {dimension_numbers = #tpu.dot_dimension_numbers<[1], [1], [0], [0], [0, 0, 1, 0], [], []>} : vector<8x8xbf16>, vector<8x8xbf16>, vector<8x8xf32> -> vector<8x8xf32>
    %153 = vector.broadcast %145 : vector<1x8xf32> to vector<8x8xf32>
    %154 = arith.addf %152, %153 : vector<8x8xf32>
    %cst_58 = arith.constant dense<0xFF800000> : vector<8xf32>
    %155 = vector.multi_reduction <maximumf>, %154, %cst_58 [1] : vector<8x8xf32> to vector<8xf32>
    %156 = vector.shape_cast %155 : vector<8xf32> to vector<8x1xf32>
    %157 = vector.broadcast %156 : vector<8x1xf32> to vector<8x8xf32>
    %158 = arith.subf %154, %157 : vector<8x8xf32>
    %159 = math.exp %158 : vector<8x8xf32>
    %cst_59 = arith.constant dense<0.000000e+00> : vector<8xf32>
    %160 = vector.multi_reduction <add>, %159, %cst_59 [1] : vector<8x8xf32> to vector<8xf32>
    %161 = vector.shape_cast %160 : vector<8xf32> to vector<8x1xf32>
    %162 = tpu.reciprocal %161 {approx = true} : vector<8x1xf32> -> vector<8x1xf32>
    %163 = vector.broadcast %162 : vector<8x1xf32> to vector<8x8xf32>
    %164 = arith.mulf %159, %163 : vector<8x8xf32>
    %165 = arith.truncf %164 : vector<8x8xf32> to vector<8x8xbf16>
    %cst_60 = arith.constant dense<0.000000e+00> : vector<8x8xf32>
    %166 = tpu.matmul %165, %151, %cst_60 {dimension_numbers = #tpu.dot_dimension_numbers<[1], [0], [0], [1], [0, 0, 1, 1], [], []>} : vector<8x8xbf16>, vector<8x8xbf16>, vector<8x8xf32> -> vector<8x8xf32>
    %167 = vector.extract_strided_slice %135 {offsets = [0, 8], sizes = [8, 8], strides = [1, 1]} : vector<8x32xf32> to vector<8x8xf32>
    %168 = arith.truncf %167 : vector<8x8xf32> to vector<8x8xbf16>
    %169 = vector.extract_strided_slice %142 {offsets = [0, 8], sizes = [8, 8], strides = [1, 1]} : vector<8x32xf32> to vector<8x8xf32>
    %170 = arith.truncf %169 : vector<8x8xf32> to vector<8x8xbf16>
    %171 = vector.extract_strided_slice %143 {offsets = [0, 8], sizes = [8, 8], strides = [1, 1]} : vector<8x32xf32> to vector<8x8xf32>
    %172 = arith.truncf %171 : vector<8x8xf32> to vector<8x8xbf16>
    %cst_61 = arith.constant dense<0.000000e+00> : vector<8x8xf32>
    %173 = tpu.matmul %168, %170, %cst_61 {dimension_numbers = #tpu.dot_dimension_numbers<[1], [1], [0], [0], [0, 0, 1, 0], [], []>} : vector<8x8xbf16>, vector<8x8xbf16>, vector<8x8xf32> -> vector<8x8xf32>
    %174 = vector.broadcast %145 : vector<1x8xf32> to vector<8x8xf32>
    %175 = arith.addf %173, %174 : vector<8x8xf32>
    %cst_62 = arith.constant dense<0xFF800000> : vector<8xf32>
    %176 = vector.multi_reduction <maximumf>, %175, %cst_62 [1] : vector<8x8xf32> to vector<8xf32>
    %177 = vector.shape_cast %176 : vector<8xf32> to vector<8x1xf32>
    %178 = vector.broadcast %177 : vector<8x1xf32> to vector<8x8xf32>
    %179 = arith.subf %175, %178 : vector<8x8xf32>
    %180 = math.exp %179 : vector<8x8xf32>
    %cst_63 = arith.constant dense<0.000000e+00> : vector<8xf32>
    %181 = vector.multi_reduction <add>, %180, %cst_63 [1] : vector<8x8xf32> to vector<8xf32>
    %182 = vector.shape_cast %181 : vector<8xf32> to vector<8x1xf32>
    %183 = tpu.reciprocal %182 {approx = true} : vector<8x1xf32> -> vector<8x1xf32>
    %184 = vector.broadcast %183 : vector<8x1xf32> to vector<8x8xf32>
    %185 = arith.mulf %180, %184 : vector<8x8xf32>
    %186 = arith.truncf %185 : vector<8x8xf32> to vector<8x8xbf16>
    %cst_64 = arith.constant dense<0.000000e+00> : vector<8x8xf32>
    %187 = tpu.matmul %186, %172, %cst_64 {dimension_numbers = #tpu.dot_dimension_numbers<[1], [0], [0], [1], [0, 0, 1, 1], [], []>} : vector<8x8xbf16>, vector<8x8xbf16>, vector<8x8xf32> -> vector<8x8xf32>
    %188 = vector.extract_strided_slice %135 {offsets = [0, 16], sizes = [8, 8], strides = [1, 1]} : vector<8x32xf32> to vector<8x8xf32>
    %189 = arith.truncf %188 : vector<8x8xf32> to vector<8x8xbf16>
    %190 = vector.extract_strided_slice %142 {offsets = [0, 16], sizes = [8, 8], strides = [1, 1]} : vector<8x32xf32> to vector<8x8xf32>
    %191 = arith.truncf %190 : vector<8x8xf32> to vector<8x8xbf16>
    %192 = vector.extract_strided_slice %143 {offsets = [0, 16], sizes = [8, 8], strides = [1, 1]} : vector<8x32xf32> to vector<8x8xf32>
    %193 = arith.truncf %192 : vector<8x8xf32> to vector<8x8xbf16>
    %cst_65 = arith.constant dense<0.000000e+00> : vector<8x8xf32>
    %194 = tpu.matmul %189, %191, %cst_65 {dimension_numbers = #tpu.dot_dimension_numbers<[1], [1], [0], [0], [0, 0, 1, 0], [], []>} : vector<8x8xbf16>, vector<8x8xbf16>, vector<8x8xf32> -> vector<8x8xf32>
    %195 = vector.broadcast %145 : vector<1x8xf32> to vector<8x8xf32>
    %196 = arith.addf %194, %195 : vector<8x8xf32>
    %cst_66 = arith.constant dense<0xFF800000> : vector<8xf32>
    %197 = vector.multi_reduction <maximumf>, %196, %cst_66 [1] : vector<8x8xf32> to vector<8xf32>
    %198 = vector.shape_cast %197 : vector<8xf32> to vector<8x1xf32>
    %199 = vector.broadcast %198 : vector<8x1xf32> to vector<8x8xf32>
    %200 = arith.subf %196, %199 : vector<8x8xf32>
    %201 = math.exp %200 : vector<8x8xf32>
    %cst_67 = arith.constant dense<0.000000e+00> : vector<8xf32>
    %202 = vector.multi_reduction <add>, %201, %cst_67 [1] : vector<8x8xf32> to vector<8xf32>
    %203 = vector.shape_cast %202 : vector<8xf32> to vector<8x1xf32>
    %204 = tpu.reciprocal %203 {approx = true} : vector<8x1xf32> -> vector<8x1xf32>
    %205 = vector.broadcast %204 : vector<8x1xf32> to vector<8x8xf32>
    %206 = arith.mulf %201, %205 : vector<8x8xf32>
    %207 = arith.truncf %206 : vector<8x8xf32> to vector<8x8xbf16>
    %cst_68 = arith.constant dense<0.000000e+00> : vector<8x8xf32>
    %208 = tpu.matmul %207, %193, %cst_68 {dimension_numbers = #tpu.dot_dimension_numbers<[1], [0], [0], [1], [0, 0, 1, 1], [], []>} : vector<8x8xbf16>, vector<8x8xbf16>, vector<8x8xf32> -> vector<8x8xf32>
    %209 = vector.extract_strided_slice %135 {offsets = [0, 24], sizes = [8, 8], strides = [1, 1]} : vector<8x32xf32> to vector<8x8xf32>
    %210 = arith.truncf %209 : vector<8x8xf32> to vector<8x8xbf16>
    %211 = vector.extract_strided_slice %142 {offsets = [0, 24], sizes = [8, 8], strides = [1, 1]} : vector<8x32xf32> to vector<8x8xf32>
    %212 = arith.truncf %211 : vector<8x8xf32> to vector<8x8xbf16>
    %213 = vector.extract_strided_slice %143 {offsets = [0, 24], sizes = [8, 8], strides = [1, 1]} : vector<8x32xf32> to vector<8x8xf32>
    %214 = arith.truncf %213 : vector<8x8xf32> to vector<8x8xbf16>
    %cst_69 = arith.constant dense<0.000000e+00> : vector<8x8xf32>
    %215 = tpu.matmul %210, %212, %cst_69 {dimension_numbers = #tpu.dot_dimension_numbers<[1], [1], [0], [0], [0, 0, 1, 0], [], []>} : vector<8x8xbf16>, vector<8x8xbf16>, vector<8x8xf32> -> vector<8x8xf32>
    %216 = vector.broadcast %145 : vector<1x8xf32> to vector<8x8xf32>
    %217 = arith.addf %215, %216 : vector<8x8xf32>
    %cst_70 = arith.constant dense<0xFF800000> : vector<8xf32>
    %218 = vector.multi_reduction <maximumf>, %217, %cst_70 [1] : vector<8x8xf32> to vector<8xf32>
    %219 = vector.shape_cast %218 : vector<8xf32> to vector<8x1xf32>
    %220 = vector.broadcast %219 : vector<8x1xf32> to vector<8x8xf32>
    %221 = arith.subf %217, %220 : vector<8x8xf32>
    %222 = math.exp %221 : vector<8x8xf32>
    %cst_71 = arith.constant dense<0.000000e+00> : vector<8xf32>
    %223 = vector.multi_reduction <add>, %222, %cst_71 [1] : vector<8x8xf32> to vector<8xf32>
    %224 = vector.shape_cast %223 : vector<8xf32> to vector<8x1xf32>
    %225 = tpu.reciprocal %224 {approx = true} : vector<8x1xf32> -> vector<8x1xf32>
    %226 = vector.broadcast %225 : vector<8x1xf32> to vector<8x8xf32>
    %227 = arith.mulf %222, %226 : vector<8x8xf32>
    %228 = arith.truncf %227 : vector<8x8xf32> to vector<8x8xbf16>
    %cst_72 = arith.constant dense<0.000000e+00> : vector<8x8xf32>
    %229 = tpu.matmul %228, %214, %cst_72 {dimension_numbers = #tpu.dot_dimension_numbers<[1], [0], [0], [1], [0, 0, 1, 1], [], []>} : vector<8x8xbf16>, vector<8x8xbf16>, vector<8x8xf32> -> vector<8x8xf32>
    %230 = tpu.concatenate %166, %187, %208, %229 in 1 : vector<8x8xf32>, vector<8x8xf32>, vector<8x8xf32>, vector<8x8xf32> -> vector<8x32xf32>
    %231 = arith.truncf %230 : vector<8x32xf32> to vector<8x32xbf16>
    %c0_73 = arith.constant 0 : index
    %c0_74 = arith.constant 0 : index
    %232 = vector.load %arg13[%c0_73, %c0_74] : memref<32x32xbf16, #tpu.memory_space<vmem>>, vector<32x32xbf16>
    %cst_75 = arith.constant dense<0.000000e+00> : vector<8x32xf32>
    %233 = tpu.matmul %231, %232, %cst_75 {dimension_numbers = #tpu.dot_dimension_numbers<[1], [0], [0], [1], [0, 0, 1, 1], [], []>} : vector<8x32xbf16>, vector<32x32xbf16>, vector<8x32xf32> -> vector<8x32xf32>
    %c0_76 = arith.constant 0 : index
    %c0_77 = arith.constant 0 : index
    %234 = vector.load %arg14[%c0_76, %c0_77] : memref<1x32xf32, #tpu.memory_space<vmem>>, vector<1x32xf32>
    %235 = vector.broadcast %234 : vector<1x32xf32> to vector<8x32xf32>
    %236 = arith.addf %233, %235 : vector<8x32xf32>
    %237 = arith.addf %129, %236 : vector<8x32xf32>
    %c0_78 = arith.constant 0 : index
    %c0_79 = arith.constant 0 : index
    %238 = vector.load %arg15[%c0_78, %c0_79] : memref<1x32xf32, #tpu.memory_space<vmem>>, vector<1x32xf32>
    %c0_80 = arith.constant 0 : index
    %c0_81 = arith.constant 0 : index
    %239 = vector.load %arg16[%c0_80, %c0_81] : memref<1x32xf32, #tpu.memory_space<vmem>>, vector<1x32xf32>
    %cst_82 = arith.constant dense<0.000000e+00> : vector<8xf32>
    %240 = vector.multi_reduction <add>, %237, %cst_82 [1] : vector<8x32xf32> to vector<8xf32>
    %241 = vector.shape_cast %240 : vector<8xf32> to vector<8x1xf32>
    %cst_83 = arith.constant 3.200000e+01 : f32
    %242 = vector.broadcast %cst_83 : f32 to vector<8x1xf32>
    %243 = arith.divf %241, %242 : vector<8x1xf32>
    %244 = vector.broadcast %243 : vector<8x1xf32> to vector<8x32xf32>
    %245 = arith.subf %237, %244 : vector<8x32xf32>
    %246 = arith.mulf %245, %245 : vector<8x32xf32>
    %cst_84 = arith.constant dense<0.000000e+00> : vector<8xf32>
    %247 = vector.multi_reduction <add>, %246, %cst_84 [1] : vector<8x32xf32> to vector<8xf32>
    %248 = vector.shape_cast %247 : vector<8xf32> to vector<8x1xf32>
    %cst_85 = arith.constant 3.200000e+01 : f32
    %249 = vector.broadcast %cst_85 : f32 to vector<8x1xf32>
    %250 = arith.divf %248, %249 : vector<8x1xf32>
    %cst_86 = arith.constant 9.99999974E-6 : f32
    %251 = vector.broadcast %cst_86 : f32 to vector<8x1xf32>
    %252 = arith.addf %250, %251 : vector<8x1xf32>
    %253 = math.rsqrt %252 : vector<8x1xf32>
    %254 = vector.broadcast %243 : vector<8x1xf32> to vector<8x32xf32>
    %255 = arith.subf %237, %254 : vector<8x32xf32>
    %256 = vector.broadcast %253 : vector<8x1xf32> to vector<8x32xf32>
    %257 = arith.mulf %255, %256 : vector<8x32xf32>
    %258 = vector.broadcast %238 : vector<1x32xf32> to vector<8x32xf32>
    %259 = arith.mulf %257, %258 : vector<8x32xf32>
    %260 = vector.broadcast %239 : vector<1x32xf32> to vector<8x32xf32>
    %261 = arith.addf %259, %260 : vector<8x32xf32>
    %262 = arith.truncf %261 : vector<8x32xf32> to vector<8x32xbf16>
    %c0_87 = arith.constant 0 : index
    %c0_88 = arith.constant 0 : index
    %263 = vector.load %arg17[%c0_87, %c0_88] : memref<32x64xbf16, #tpu.memory_space<vmem>>, vector<32x64xbf16>
    %cst_89 = arith.constant dense<0.000000e+00> : vector<8x64xf32>
    %264 = tpu.matmul %262, %263, %cst_89 {dimension_numbers = #tpu.dot_dimension_numbers<[1], [0], [0], [1], [0, 0, 1, 1], [], []>} : vector<8x32xbf16>, vector<32x64xbf16>, vector<8x64xf32> -> vector<8x64xf32>
    %c0_90 = arith.constant 0 : index
    %c0_91 = arith.constant 0 : index
    %265 = vector.load %arg18[%c0_90, %c0_91] : memref<1x64xf32, #tpu.memory_space<vmem>>, vector<1x64xf32>
    %266 = vector.broadcast %265 : vector<1x64xf32> to vector<8x64xf32>
    %267 = arith.addf %264, %266 : vector<8x64xf32>
    %cst_92 = arith.constant 0.000000e+00 : f32
    %268 = vector.broadcast %cst_92 : f32 to vector<8x64xf32>
    %269 = arith.maximumf %267, %268 : vector<8x64xf32>
    %270 = arith.truncf %269 : vector<8x64xf32> to vector<8x64xbf16>
    %c0_93 = arith.constant 0 : index
    %c0_94 = arith.constant 0 : index
    %271 = vector.load %arg19[%c0_93, %c0_94] : memref<64x32xbf16, #tpu.memory_space<vmem>>, vector<64x32xbf16>
    %cst_95 = arith.constant dense<0.000000e+00> : vector<8x32xf32>
    %272 = tpu.matmul %270, %271, %cst_95 {dimension_numbers = #tpu.dot_dimension_numbers<[1], [0], [0], [1], [0, 0, 1, 1], [], []>} : vector<8x64xbf16>, vector<64x32xbf16>, vector<8x32xf32> -> vector<8x32xf32>
    %c0_96 = arith.constant 0 : index
    %c0_97 = arith.constant 0 : index
    %273 = vector.load %arg20[%c0_96, %c0_97] : memref<1x32xf32, #tpu.memory_space<vmem>>, vector<1x32xf32>
    %274 = vector.broadcast %273 : vector<1x32xf32> to vector<8x32xf32>
    %275 = arith.addf %272, %274 : vector<8x32xf32>
    %276 = arith.addf %261, %275 : vector<8x32xf32>
    %c0_98 = arith.constant 0 : index
    %c0_99 = arith.constant 0 : index
    %277 = vector.load %arg21[%c0_98, %c0_99] : memref<1x32xf32, #tpu.memory_space<vmem>>, vector<1x32xf32>
    %c0_100 = arith.constant 0 : index
    %c0_101 = arith.constant 0 : index
    %278 = vector.load %arg22[%c0_100, %c0_101] : memref<1x32xf32, #tpu.memory_space<vmem>>, vector<1x32xf32>
    %cst_102 = arith.constant dense<0.000000e+00> : vector<8xf32>
    %279 = vector.multi_reduction <add>, %276, %cst_102 [1] : vector<8x32xf32> to vector<8xf32>
    %280 = vector.shape_cast %279 : vector<8xf32> to vector<8x1xf32>
    %cst_103 = arith.constant 3.200000e+01 : f32
    %281 = vector.broadcast %cst_103 : f32 to vector<8x1xf32>
    %282 = arith.divf %280, %281 : vector<8x1xf32>
    %283 = vector.broadcast %282 : vector<8x1xf32> to vector<8x32xf32>
    %284 = arith.subf %276, %283 : vector<8x32xf32>
    %285 = arith.mulf %284, %284 : vector<8x32xf32>
    %cst_104 = arith.constant dense<0.000000e+00> : vector<8xf32>
    %286 = vector.multi_reduction <add>, %285, %cst_104 [1] : vector<8x32xf32> to vector<8xf32>
    %287 = vector.shape_cast %286 : vector<8xf32> to vector<8x1xf32>
    %cst_105 = arith.constant 3.200000e+01 : f32
    %288 = vector.broadcast %cst_105 : f32 to vector<8x1xf32>
    %289 = arith.divf %287, %288 : vector<8x1xf32>
    %cst_106 = arith.constant 9.99999974E-6 : f32
    %290 = vector.broadcast %cst_106 : f32 to vector<8x1xf32>
    %291 = arith.addf %289, %290 : vector<8x1xf32>
    %292 = math.rsqrt %291 : vector<8x1xf32>
    %293 = vector.broadcast %282 : vector<8x1xf32> to vector<8x32xf32>
    %294 = arith.subf %276, %293 : vector<8x32xf32>
    %295 = vector.broadcast %292 : vector<8x1xf32> to vector<8x32xf32>
    %296 = arith.mulf %294, %295 : vector<8x32xf32>
    %297 = vector.broadcast %277 : vector<1x32xf32> to vector<8x32xf32>
    %298 = arith.mulf %296, %297 : vector<8x32xf32>
    %299 = vector.broadcast %278 : vector<1x32xf32> to vector<8x32xf32>
    %300 = arith.addf %298, %299 : vector<8x32xf32>
    %c0_107 = arith.constant 0 : index
    %c0_108 = arith.constant 0 : index
    %c0_109 = arith.constant 0 : index
    %301 = vector.load %arg26[%c0_107, %c0_108, %c0_109] : memref<1x8x32xf32, #tpu.memory_space<vmem>>, vector<1x8x32xf32>
    %302 = vector.shape_cast %301 : vector<1x8x32xf32> to vector<8x32xf32>
    %303 = vector.shape_cast %300 : vector<8x32xf32> to vector<1x8x32xf32>
    tpu.vector_store %arg26[%c0_107, %c0_108, %c0_109], %303 {strides = array<i32>} : memref<1x8x32xf32, #tpu.memory_space<vmem>>, vector<1x8x32xf32>,
    return
  }
  func.func @transform_0(%arg0: i32) -> (i32, i32, i32) {
    %c0_i32 = arith.constant 0 : i32
    %c0_i32_0 = arith.constant 0 : i32
    %c0_i32_1 = arith.constant 0 : i32
    return %arg0, %c0_i32, %c0_i32_0 : i32, i32, i32
  }
  func.func @transform_1(%arg0: i32) -> (i32, i32, i32) {
    %c0_i32 = arith.constant 0 : i32
    %c0_i32_0 = arith.constant 0 : i32
    %c0_i32_1 = arith.constant 0 : i32
    return %arg0, %c0_i32, %c0_i32_0 : i32, i32, i32
  }
  func.func @transform_2(%arg0: i32) -> (i32, i32) {
    %c0_i32 = arith.constant 0 : i32
    %c0_i32_0 = arith.constant 0 : i32
    %c0_i32_1 = arith.constant 0 : i32
    return %c0_i32, %c0_i32_0 : i32, i32
  }
  func.func @transform_3(%arg0: i32) -> (i32, i32) {
    %c0_i32 = arith.constant 0 : i32
    %c0_i32_0 = arith.constant 0 : i32
    %c0_i32_1 = arith.constant 0 : i32
    return %c0_i32, %c0_i32_0 : i32, i32
  }
  func.func @transform_4(%arg0: i32) -> (i32, i32) {
    %c0_i32 = arith.constant 0 : i32
    %c0_i32_0 = arith.constant 0 : i32
    %c0_i32_1 = arith.constant 0 : i32
    return %c0_i32, %c0_i32_0 : i32, i32
  }
  func.func @transform_5(%arg0: i32) -> (i32, i32) {
    %c0_i32 = arith.constant 0 : i32
    %c0_i32_0 = arith.constant 0 : i32
    %c0_i32_1 = arith.constant 0 : i32
    return %c0_i32, %c0_i32_0 : i32, i32
  }
  func.func @transform_6(%arg0: i32) -> (i32, i32) {
    %c0_i32 = arith.constant 0 : i32
    %c0_i32_0 = arith.constant 0 : i32
    %c0_i32_1 = arith.constant 0 : i32
    return %c0_i32, %c0_i32_0 : i32, i32
  }
  func.func @transform_7(%arg0: i32) -> (i32, i32) {
    %c0_i32 = arith.constant 0 : i32
    %c0_i32_0 = arith.constant 0 : i32
    %c0_i32_1 = arith.constant 0 : i32
    return %c0_i32, %c0_i32_0 : i32, i32
  }
  func.func @transform_8(%arg0: i32) -> (i32, i32) {
    %c0_i32 = arith.constant 0 : i32
    %c0_i32_0 = arith.constant 0 : i32
    %c0_i32_1 = arith.constant 0 : i32
    return %c0_i32, %c0_i32_0 : i32, i32
  }
  func.func @transform_9(%arg0: i32) -> (i32, i32) {
    %c0_i32 = arith.constant 0 : i32
    %c0_i32_0 = arith.constant 0 : i32
    %c0_i32_1 = arith.constant 0 : i32
    return %c0_i32, %c0_i32_0 : i32, i32
  }
  func.func @transform_10(%arg0: i32) -> (i32, i32) {
    %c0_i32 = arith.constant 0 : i32
    %c0_i32_0 = arith.constant 0 : i32
    %c0_i32_1 = arith.constant 0 : i32
    return %c0_i32, %c0_i32_0 : i32, i32
  }
  func.func @transform_11(%arg0: i32) -> (i32, i32) {
    %c0_i32 = arith.constant 0 : i32
    %c0_i32_0 = arith.constant 0 : i32
    %c0_i32_1 = arith.constant 0 : i32
    return %c0_i32, %c0_i32_0 : i32, i32
  }
  func.func @transform_12(%arg0: i32) -> (i32, i32) {
    %c0_i32 = arith.constant 0 : i32
    %c0_i32_0 = arith.constant 0 : i32
    %c0_i32_1 = arith.constant 0 : i32
    return %c0_i32, %c0_i32_0 : i32, i32
  }
  func.func @transform_13(%arg0: i32) -> (i32, i32) {
    %c0_i32 = arith.constant 0 : i32
    %c0_i32_0 = arith.constant 0 : i32
    %c0_i32_1 = arith.constant 0 : i32
    return %c0_i32, %c0_i32_0 : i32, i32
  }
  func.func @transform_14(%arg0: i32) -> (i32, i32) {
    %c0_i32 = arith.constant 0 : i32
    %c0_i32_0 = arith.constant 0 : i32
    %c0_i32_1 = arith.constant 0 : i32
    return %c0_i32, %c0_i32_0 : i32, i32
  }
  func.func @transform_15(%arg0: i32) -> (i32, i32) {
    %c0_i32 = arith.constant 0 : i32
    %c0_i32_0 = arith.constant 0 : i32
    %c0_i32_1 = arith.constant 0 : i32
    return %c0_i32, %c0_i32_0 : i32, i32
  }
  func.func @transform_16(%arg0: i32) -> (i32, i32) {
    %c0_i32 = arith.constant 0 : i32
    %c0_i32_0 = arith.constant 0 : i32
    %c0_i32_1 = arith.constant 0 : i32
    return %c0_i32, %c0_i32_0 : i32, i32
  }
  func.func @transform_17(%arg0: i32) -> (i32, i32) {
    %c0_i32 = arith.constant 0 : i32
    %c0_i32_0 = arith.constant 0 : i32
    %c0_i32_1 = arith.constant 0 : i32
    return %c0_i32, %c0_i32_0 : i32, i32
  }
  func.func @transform_18(%arg0: i32) -> (i32, i32) {
    %c0_i32 = arith.constant 0 : i32
    %c0_i32_0 = arith.constant 0 : i32
    %c0_i32_1 = arith.constant 0 : i32
    return %c0_i32, %c0_i32_0 : i32, i32
  }
  func.func @transform_19(%arg0: i32) -> (i32, i32) {
    %c0_i32 = arith.constant 0 : i32
    %c0_i32_0 = arith.constant 0 : i32
    %c0_i32_1 = arith.constant 0 : i32
    return %c0_i32, %c0_i32_0 : i32, i32
  }
  func.func @transform_20(%arg0: i32) -> (i32, i32) {
    %c0_i32 = arith.constant 0 : i32
    %c0_i32_0 = arith.constant 0 : i32
    %c0_i32_1 = arith.constant 0 : i32
    return %c0_i32, %c0_i32_0 : i32, i32
  }
  func.func @transform_21(%arg0: i32) -> (i32, i32) {
    %c0_i32 = arith.constant 0 : i32
    %c0_i32_0 = arith.constant 0 : i32
    %c0_i32_1 = arith.constant 0 : i32
    return %c0_i32, %c0_i32_0 : i32, i32
  }
  func.func @transform_22(%arg0: i32) -> (i32, i32) {
    %c0_i32 = arith.constant 0 : i32
    %c0_i32_0 = arith.constant 0 : i32
    %c0_i32_1 = arith.constant 0 : i32
    return %c0_i32, %c0_i32_0 : i32, i32
  }
  func.func @transform_23(%arg0: i32) -> (i32, i32, i32) {
    %c0_i32 = arith.constant 0 : i32
    %c0_i32_0 = arith.constant 0 : i32
    %c0_i32_1 = arith.constant 0 : i32
    return %arg0, %c0_i32, %c0_i32_0 : i32, i32, i32
  }
  func.func @transform_24(%arg0: i32) -> (i32, i32, i32) {
    %c0_i32 = arith.constant 0 : i32
    %c0_i32_0 = arith.constant 0 : i32
    %c0_i32_1 = arith.constant 0 : i32
    return %arg0, %c0_i32, %c0_i32_0 : i32, i32, i32
  }
  func.func @transform_25(%arg0: i32) -> (i32, i32, i32) {
    %c0_i32 = arith.constant 0 : i32
    %c0_i32_0 = arith.constant 0 : i32
    %c0_i32_1 = arith.constant 0 : i32
    return %arg0, %c0_i32, %c0_i32_0 : i32, i32, i32
  }
}

module attributes {stable_mosaic.version = 11 : i64} {
  func.func @_decoder_layer_kernel(%arg0: i32, %arg1: memref<1x8x32xf32, #tpu.memory_space<vmem>>, %arg2: memref<1x8x32xf32, #tpu.memory_space<vmem>>, %arg3: memref<32x96xbf16, #tpu.memory_space<vmem>>, %arg4: memref<1x96xf32, #tpu.memory_space<vmem>>, %arg5: memref<32x32xbf16, #tpu.memory_space<vmem>>, %arg6: memref<1x32xf32, #tpu.memory_space<vmem>>, %arg7: memref<1x32xf32, #tpu.memory_space<vmem>>, %arg8: memref<1x32xf32, #tpu.memory_space<vmem>>, %arg9: memref<32x32xbf16, #tpu.memory_space<vmem>>, %arg10: memref<1x32xf32, #tpu.memory_space<vmem>>, %arg11: memref<32x64xbf16, #tpu.memory_space<vmem>>, %arg12: memref<1x64xf32, #tpu.memory_space<vmem>>, %arg13: memref<32x32xbf16, #tpu.memory_space<vmem>>, %arg14: memref<1x32xf32, #tpu.memory_space<vmem>>, %arg15: memref<1x32xf32, #tpu.memory_space<vmem>>, %arg16: memref<1x32xf32, #tpu.memory_space<vmem>>, %arg17: memref<32x64xbf16, #tpu.memory_space<vmem>>, %arg18: memref<1x64xf32, #tpu.memory_space<vmem>>, %arg19: memref<64x32xbf16, #tpu.memory_space<vmem>>, %arg20: memref<1x32xf32, #tpu.memory_space<vmem>>, %arg21: memref<1x32xf32, #tpu.memory_space<vmem>>, %arg22: memref<1x32xf32, #tpu.memory_space<vmem>>, %arg23: memref<8x8xf32, #tpu.memory_space<vmem>>, %arg24: memref<1x1x8xf32, #tpu.memory_space<vmem>>, %arg25: memref<1x1x8xf32, #tpu.memory_space<vmem>>, %arg26: memref<1x8x32xf32, #tpu.memory_space<vmem>>) attributes {dimension_semantics = [#tpu.dimension_semantics<parallel>], iteration_bounds = array<i64: 2>, scalar_prefetch = 0 : i64, scratch_operands = 0 : i64, tpu.core_type = #tpu.core_type<tc>, window_params = [{transform_indices = @transform_0, window_bounds = array<i64: 1, 8, 32>}, {transform_indices = @transform_1, window_bounds = array<i64: 1, 8, 32>}, {pipeline_mode = #tpu.pipeline_mode<synchronous>, transform_indices = @transform_2, window_bounds = array<i64: 32, 96>}, {pipeline_mode = #tpu.pipeline_mode<synchronous>, transform_indices = @transform_3, window_bounds = array<i64: 1, 96>}, {pipeline_mode = #tpu.pipeline_mode<synchronous>, transform_indices = @transform_4, window_bounds = array<i64: 32, 32>}, {pipeline_mode = #tpu.pipeline_mode<synchronous>, transform_indices = @transform_5, window_bounds = array<i64: 1, 32>}, {pipeline_mode = #tpu.pipeline_mode<synchronous>, transform_indices = @transform_6, window_bounds = array<i64: 1, 32>}, {pipeline_mode = #tpu.pipeline_mode<synchronous>, transform_indices = @transform_7, window_bounds = array<i64: 1, 32>}, {pipeline_mode = #tpu.pipeline_mode<synchronous>, transform_indices = @transform_8, window_bounds = array<i64: 32, 32>}, {pipeline_mode = #tpu.pipeline_mode<synchronous>, transform_indices = @transform_9, window_bounds = array<i64: 1, 32>}, {pipeline_mode = #tpu.pipeline_mode<synchronous>, transform_indices = @transform_10, window_bounds = array<i64: 32, 64>}, {pipeline_mode = #tpu.pipeline_mode<synchronous>, transform_indices = @transform_11, window_bounds = array<i64: 1, 64>}, {pipeline_mode = #tpu.pipeline_mode<synchronous>, transform_indices = @transform_12, window_bounds = array<i64: 32, 32>}, {pipeline_mode = #tpu.pipeline_mode<synchronous>, transform_indices = @transform_13, window_bounds = array<i64: 1, 32>}, {pipeline_mode = #tpu.pipeline_mode<synchronous>, transform_indices = @transform_14, window_bounds = array<i64: 1, 32>}, {pipeline_mode = #tpu.pipeline_mode<synchronous>, transform_indices = @transform_15, window_bounds = array<i64: 1, 32>}, {pipeline_mode = #tpu.pipeline_mode<synchronous>, transform_indices = @transform_16, window_bounds = array<i64: 32, 64>}, {pipeline_mode = #tpu.pipeline_mode<synchronous>, transform_indices = @transform_17, window_bounds = array<i64: 1, 64>}, {pipeline_mode = #tpu.pipeline_mode<synchronous>, transform_indices = @transform_18, window_bounds = array<i64: 64, 32>}, {pipeline_mode = #tpu.pipeline_mode<synchronous>, transform_indices = @transform_19, window_bounds = array<i64: 1, 32>}, {pipeline_mode = #tpu.pipeline_mode<synchronous>, transform_indices = @transform_20, window_bounds = array<i64: 1, 32>}, {pipeline_mode = #tpu.pipeline_mode<synchronous>, transform_indices = @transform_21, window_bounds = array<i64: 1, 32>}, {pipeline_mode = #tpu.pipeline_mode<synchronous>, transform_indices = @transform_22, window_bounds = array<i64: 8, 8>}, {transform_indices = @transform_23, window_bounds = array<i64: 1, 1, 8>}, {transform_indices = @transform_24, window_bounds = array<i64: 1, 1, 8>}, {transform_indices = @transform_25, window_bounds = array<i64: 1, 8, 32>}]} {
    %c0 = arith.constant 0 : index
    %c0_0 = arith.constant 0 : index
    %c0_1 = arith.constant 0 : index
    %0 = vector.load %arg1[%c0, %c0_0, %c0_1] : memref<1x8x32xf32, #tpu.memory_space<vmem>>, vector<1x8x32xf32>
    %1 = vector.shape_cast %0 : vector<1x8x32xf32> to vector<8x32xf32>
    %c0_2 = arith.constant 0 : index
    %c0_3 = arith.constant 0 : index
    %c0_4 = arith.constant 0 : index
    %2 = vector.load %arg2[%c0_2, %c0_3, %c0_4] : memref<1x8x32xf32, #tpu.memory_space<vmem>>, vector<1x8x32xf32>
    %3 = vector.shape_cast %2 : vector<1x8x32xf32> to vector<8x32xf32>
    %4 = arith.truncf %1 : vector<8x32xf32> to vector<8x32xbf16>
    %c0_5 = arith.constant 0 : index
    %c0_6 = arith.constant 0 : index
    %5 = vector.load %arg3[%c0_5, %c0_6] : memref<32x96xbf16, #tpu.memory_space<vmem>>, vector<32x96xbf16>
    %cst = arith.constant dense<0.000000e+00> : vector<8x96xf32>
    %6 = tpu.matmul %4, %5, %cst {dimension_numbers = #tpu.dot_dimension_numbers<[1], [0], [0], [1], [0, 0, 1, 1], [], []>} : vector<8x32xbf16>, vector<32x96xbf16>, vector<8x96xf32> -> vector<8x96xf32>
    %c0_7 = arith.constant 0 : index
    %c0_8 = arith.constant 0 : index
    %7 = vector.load %arg4[%c0_7, %c0_8] : memref<1x96xf32, #tpu.memory_space<vmem>>, vector<1x96xf32>
    %8 = vector.broadcast %7 : vector<1x96xf32> to vector<8x96xf32>
    %9 = arith.addf %6, %8 : vector<8x96xf32>
    %c0_9 = arith.constant 0 : index
    %c0_10 = arith.constant 0 : index
    %10 = vector.load %arg23[%c0_9, %c0_10] : memref<8x8xf32, #tpu.memory_space<vmem>>, vector<8x8xf32>
    %c0_11 = arith.constant 0 : index
    %c0_12 = arith.constant 0 : index
    %c0_13 = arith.constant 0 : index
    %11 = vector.load %arg24[%c0_11, %c0_12, %c0_13] : memref<1x1x8xf32, #tpu.memory_space<vmem>>, vector<1x1x8xf32>
    %12 = vector.shape_cast %11 : vector<1x1x8xf32> to vector<1x8xf32>
    %13 = vector.broadcast %12 : vector<1x8xf32> to vector<8x8xf32>
    %14 = arith.addf %10, %13 : vector<8x8xf32>
    %15 = vector.extract_strided_slice %9 {offsets = [0, 0], sizes = [8, 32], strides = [1, 1]} : vector<8x96xf32> to vector<8x32xf32>
    %16 = vector.extract_strided_slice %9 {offsets = [0, 32], sizes = [8, 32], strides = [1, 1]} : vector<8x96xf32> to vector<8x32xf32>
    %17 = vector.extract_strided_slice %9 {offsets = [0, 64], sizes = [8, 32], strides = [1, 1]} : vector<8x96xf32> to vector<8x32xf32>
    %18 = vector.extract_strided_slice %15 {offsets = [0, 0], sizes = [8, 8], strides = [1, 1]} : vector<8x32xf32> to vector<8x8xf32>
    %19 = arith.truncf %18 : vector<8x8xf32> to vector<8x8xbf16>
    %20 = vector.extract_strided_slice %16 {offsets = [0, 0], sizes = [8, 8], strides = [1, 1]} : vector<8x32xf32> to vector<8x8xf32>
    %21 = arith.truncf %20 : vector<8x8xf32> to vector<8x8xbf16>
    %22 = vector.extract_strided_slice %17 {offsets = [0, 0], sizes = [8, 8], strides = [1, 1]} : vector<8x32xf32> to vector<8x8xf32>
    %23 = arith.truncf %22 : vector<8x8xf32> to vector<8x8xbf16>
    %cst_14 = arith.constant dense<0.000000e+00> : vector<8x8xf32>
    %24 = tpu.matmul %19, %21, %cst_14 {dimension_numbers = #tpu.dot_dimension_numbers<[1], [1], [0], [0], [0, 0, 1, 0], [], []>} : vector<8x8xbf16>, vector<8x8xbf16>, vector<8x8xf32> -> vector<8x8xf32>
    %25 = arith.addf %24, %14 : vector<8x8xf32>
    %cst_15 = arith.constant dense<0xFF800000> : vector<8xf32>
    %26 = vector.multi_reduction <maximumf>, %25, %cst_15 [1] : vector<8x8xf32> to vector<8xf32>
    %27 = vector.shape_cast %26 : vector<8xf32> to vector<8x1xf32>
    %28 = vector.broadcast %27 : vector<8x1xf32> to vector<8x8xf32>
    %29 = arith.subf %25, %28 : vector<8x8xf32>
    %30 = math.exp %29 : vector<8x8xf32>
    %cst_16 = arith.constant dense<0.000000e+00> : vector<8xf32>
    %31 = vector.multi_reduction <add>, %30, %cst_16 [1] : vector<8x8xf32> to vector<8xf32>
    %32 = vector.shape_cast %31 : vector<8xf32> to vector<8x1xf32>
    %33 = tpu.reciprocal %32 {approx = true} : vector<8x1xf32> -> vector<8x1xf32>
    %34 = vector.broadcast %33 : vector<8x1xf32> to vector<8x8xf32>
    %35 = arith.mulf %30, %34 : vector<8x8xf32>
    %36 = arith.truncf %35 : vector<8x8xf32> to vector<8x8xbf16>
    %cst_17 = arith.constant dense<0.000000e+00> : vector<8x8xf32>
    %37 = tpu.matmul %36, %23, %cst_17 {dimension_numbers = #tpu.dot_dimension_numbers<[1], [0], [0], [1], [0, 0, 1, 1], [], []>} : vector<8x8xbf16>, vector<8x8xbf16>, vector<8x8xf32> -> vector<8x8xf32>
    %38 = vector.extract_strided_slice %15 {offsets = [0, 8], sizes = [8, 8], strides = [1, 1]} : vector<8x32xf32> to vector<8x8xf32>
    %39 = arith.truncf %38 : vector<8x8xf32> to vector<8x8xbf16>
    %40 = vector.extract_strided_slice %16 {offsets = [0, 8], sizes = [8, 8], strides = [1, 1]} : vector<8x32xf32> to vector<8x8xf32>
    %41 = arith.truncf %40 : vector<8x8xf32> to vector<8x8xbf16>
    %42 = vector.extract_strided_slice %17 {offsets = [0, 8], sizes = [8, 8], strides = [1, 1]} : vector<8x32xf32> to vector<8x8xf32>
    %43 = arith.truncf %42 : vector<8x8xf32> to vector<8x8xbf16>
    %cst_18 = arith.constant dense<0.000000e+00> : vector<8x8xf32>
    %44 = tpu.matmul %39, %41, %cst_18 {dimension_numbers = #tpu.dot_dimension_numbers<[1], [1], [0], [0], [0, 0, 1, 0], [], []>} : vector<8x8xbf16>, vector<8x8xbf16>, vector<8x8xf32> -> vector<8x8xf32>
    %45 = arith.addf %44, %14 : vector<8x8xf32>
    %cst_19 = arith.constant dense<0xFF800000> : vector<8xf32>
    %46 = vector.multi_reduction <maximumf>, %45, %cst_19 [1] : vector<8x8xf32> to vector<8xf32>
    %47 = vector.shape_cast %46 : vector<8xf32> to vector<8x1xf32>
    %48 = vector.broadcast %47 : vector<8x1xf32> to vector<8x8xf32>
    %49 = arith.subf %45, %48 : vector<8x8xf32>
    %50 = math.exp %49 : vector<8x8xf32>
    %cst_20 = arith.constant dense<0.000000e+00> : vector<8xf32>
    %51 = vector.multi_reduction <add>, %50, %cst_20 [1] : vector<8x8xf32> to vector<8xf32>
    %52 = vector.shape_cast %51 : vector<8xf32> to vector<8x1xf32>
    %53 = tpu.reciprocal %52 {approx = true} : vector<8x1xf32> -> vector<8x1xf32>
    %54 = vector.broadcast %53 : vector<8x1xf32> to vector<8x8xf32>
    %55 = arith.mulf %50, %54 : vector<8x8xf32>
    %56 = arith.truncf %55 : vector<8x8xf32> to vector<8x8xbf16>
    %cst_21 = arith.constant dense<0.000000e+00> : vector<8x8xf32>
    %57 = tpu.matmul %56, %43, %cst_21 {dimension_numbers = #tpu.dot_dimension_numbers<[1], [0], [0], [1], [0, 0, 1, 1], [], []>} : vector<8x8xbf16>, vector<8x8xbf16>, vector<8x8xf32> -> vector<8x8xf32>
    %58 = vector.extract_strided_slice %15 {offsets = [0, 16], sizes = [8, 8], strides = [1, 1]} : vector<8x32xf32> to vector<8x8xf32>
    %59 = arith.truncf %58 : vector<8x8xf32> to vector<8x8xbf16>
    %60 = vector.extract_strided_slice %16 {offsets = [0, 16], sizes = [8, 8], strides = [1, 1]} : vector<8x32xf32> to vector<8x8xf32>
    %61 = arith.truncf %60 : vector<8x8xf32> to vector<8x8xbf16>
    %62 = vector.extract_strided_slice %17 {offsets = [0, 16], sizes = [8, 8], strides = [1, 1]} : vector<8x32xf32> to vector<8x8xf32>
    %63 = arith.truncf %62 : vector<8x8xf32> to vector<8x8xbf16>
    %cst_22 = arith.constant dense<0.000000e+00> : vector<8x8xf32>
    %64 = tpu.matmul %59, %61, %cst_22 {dimension_numbers = #tpu.dot_dimension_numbers<[1], [1], [0], [0], [0, 0, 1, 0], [], []>} : vector<8x8xbf16>, vector<8x8xbf16>, vector<8x8xf32> -> vector<8x8xf32>
    %65 = arith.addf %64, %14 : vector<8x8xf32>
    %cst_23 = arith.constant dense<0xFF800000> : vector<8xf32>
    %66 = vector.multi_reduction <maximumf>, %65, %cst_23 [1] : vector<8x8xf32> to vector<8xf32>
    %67 = vector.shape_cast %66 : vector<8xf32> to vector<8x1xf32>
    %68 = vector.broadcast %67 : vector<8x1xf32> to vector<8x8xf32>
    %69 = arith.subf %65, %68 : vector<8x8xf32>
    %70 = math.exp %69 : vector<8x8xf32>
    %cst_24 = arith.constant dense<0.000000e+00> : vector<8xf32>
    %71 = vector.multi_reduction <add>, %70, %cst_24 [1] : vector<8x8xf32> to vector<8xf32>
    %72 = vector.shape_cast %71 : vector<8xf32> to vector<8x1xf32>
    %73 = tpu.reciprocal %72 {approx = true} : vector<8x1xf32> -> vector<8x1xf32>
    %74 = vector.broadcast %73 : vector<8x1xf32> to vector<8x8xf32>
    %75 = arith.mulf %70, %74 : vector<8x8xf32>
    %76 = arith.truncf %75 : vector<8x8xf32> to vector<8x8xbf16>
    %cst_25 = arith.constant dense<0.000000e+00> : vector<8x8xf32>
    %77 = tpu.matmul %76, %63, %cst_25 {dimension_numbers = #tpu.dot_dimension_numbers<[1], [0], [0], [1], [0, 0, 1, 1], [], []>} : vector<8x8xbf16>, vector<8x8xbf16>, vector<8x8xf32> -> vector<8x8xf32>
    %78 = vector.extract_strided_slice %15 {offsets = [0, 24], sizes = [8, 8], strides = [1, 1]} : vector<8x32xf32> to vector<8x8xf32>
    %79 = arith.truncf %78 : vector<8x8xf32> to vector<8x8xbf16>
    %80 = vector.extract_strided_slice %16 {offsets = [0, 24], sizes = [8, 8], strides = [1, 1]} : vector<8x32xf32> to vector<8x8xf32>
    %81 = arith.truncf %80 : vector<8x8xf32> to vector<8x8xbf16>
    %82 = vector.extract_strided_slice %17 {offsets = [0, 24], sizes = [8, 8], strides = [1, 1]} : vector<8x32xf32> to vector<8x8xf32>
    %83 = arith.truncf %82 : vector<8x8xf32> to vector<8x8xbf16>
    %cst_26 = arith.constant dense<0.000000e+00> : vector<8x8xf32>
    %84 = tpu.matmul %79, %81, %cst_26 {dimension_numbers = #tpu.dot_dimension_numbers<[1], [1], [0], [0], [0, 0, 1, 0], [], []>} : vector<8x8xbf16>, vector<8x8xbf16>, vector<8x8xf32> -> vector<8x8xf32>
    %85 = arith.addf %84, %14 : vector<8x8xf32>
    %cst_27 = arith.constant dense<0xFF800000> : vector<8xf32>
    %86 = vector.multi_reduction <maximumf>, %85, %cst_27 [1] : vector<8x8xf32> to vector<8xf32>
    %87 = vector.shape_cast %86 : vector<8xf32> to vector<8x1xf32>
    %88 = vector.broadcast %87 : vector<8x1xf32> to vector<8x8xf32>
    %89 = arith.subf %85, %88 : vector<8x8xf32>
    %90 = math.exp %89 : vector<8x8xf32>
    %cst_28 = arith.constant dense<0.000000e+00> : vector<8xf32>
    %91 = vector.multi_reduction <add>, %90, %cst_28 [1] : vector<8x8xf32> to vector<8xf32>
    %92 = vector.shape_cast %91 : vector<8xf32> to vector<8x1xf32>
    %93 = tpu.reciprocal %92 {approx = true} : vector<8x1xf32> -> vector<8x1xf32>
    %94 = vector.broadcast %93 : vector<8x1xf32> to vector<8x8xf32>
    %95 = arith.mulf %90, %94 : vector<8x8xf32>
    %96 = arith.truncf %95 : vector<8x8xf32> to vector<8x8xbf16>
    %cst_29 = arith.constant dense<0.000000e+00> : vector<8x8xf32>
    %97 = tpu.matmul %96, %83, %cst_29 {dimension_numbers = #tpu.dot_dimension_numbers<[1], [0], [0], [1], [0, 0, 1, 1], [], []>} : vector<8x8xbf16>, vector<8x8xbf16>, vector<8x8xf32> -> vector<8x8xf32>
    %98 = tpu.concatenate %37, %57, %77, %97 in 1 : vector<8x8xf32>, vector<8x8xf32>, vector<8x8xf32>, vector<8x8xf32> -> vector<8x32xf32>
    %99 = arith.truncf %98 : vector<8x32xf32> to vector<8x32xbf16>
    %c0_30 = arith.constant 0 : index
    %c0_31 = arith.constant 0 : index
    %100 = vector.load %arg5[%c0_30, %c0_31] : memref<32x32xbf16, #tpu.memory_space<vmem>>, vector<32x32xbf16>
    %cst_32 = arith.constant dense<0.000000e+00> : vector<8x32xf32>
    %101 = tpu.matmul %99, %100, %cst_32 {dimension_numbers = #tpu.dot_dimension_numbers<[1], [0], [0], [1], [0, 0, 1, 1], [], []>} : vector<8x32xbf16>, vector<32x32xbf16>, vector<8x32xf32> -> vector<8x32xf32>
    %c0_33 = arith.constant 0 : index
    %c0_34 = arith.constant 0 : index
    %102 = vector.load %arg6[%c0_33, %c0_34] : memref<1x32xf32, #tpu.memory_space<vmem>>, vector<1x32xf32>
    %103 = vector.broadcast %102 : vector<1x32xf32> to vector<8x32xf32>
    %104 = arith.addf %101, %103 : vector<8x32xf32>
    %105 = arith.addf %1, %104 : vector<8x32xf32>
    %c0_35 = arith.constant 0 : index
    %c0_36 = arith.constant 0 : index
    %106 = vector.load %arg7[%c0_35, %c0_36] : memref<1x32xf32, #tpu.memory_space<vmem>>, vector<1x32xf32>
    %c0_37 = arith.constant 0 : index
    %c0_38 = arith.constant 0 : index
    %107 = vector.load %arg8[%c0_37, %c0_38] : memref<1x32xf32, #tpu.memory_space<vmem>>, vector<1x32xf32>
    %cst_39 = arith.constant dense<0.000000e+00> : vector<8xf32>
    %108 = vector.multi_reduction <add>, %105, %cst_39 [1] : vector<8x32xf32> to vector<8xf32>
    %109 = vector.shape_cast %108 : vector<8xf32> to vector<8x1xf32>
    %cst_40 = arith.constant 3.200000e+01 : f32
    %110 = vector.broadcast %cst_40 : f32 to vector<8x1xf32>
    %111 = arith.divf %109, %110 : vector<8x1xf32>
    %112 = vector.broadcast %111 : vector<8x1xf32> to vector<8x32xf32>
    %113 = arith.subf %105, %112 : vector<8x32xf32>
    %114 = arith.mulf %113, %113 : vector<8x32xf32>
    %cst_41 = arith.constant dense<0.000000e+00> : vector<8xf32>
    %115 = vector.multi_reduction <add>, %114, %cst_41 [1] : vector<8x32xf32> to vector<8xf32>
    %116 = vector.shape_cast %115 : vector<8xf32> to vector<8x1xf32>
    %cst_42 = arith.constant 3.200000e+01 : f32
    %117 = vector.broadcast %cst_42 : f32 to vector<8x1xf32>
    %118 = arith.divf %116, %117 : vector<8x1xf32>
    %cst_43 = arith.constant 9.99999974E-6 : f32
    %119 = vector.broadcast %cst_43 : f32 to vector<8x1xf32>
    %120 = arith.addf %118, %119 : vector<8x1xf32>
    %121 = math.rsqrt %120 : vector<8x1xf32>
    %122 = vector.broadcast %111 : vector<8x1xf32> to vector<8x32xf32>
    %123 = arith.subf %105, %122 : vector<8x32xf32>
    %124 = vector.broadcast %121 : vector<8x1xf32> to vector<8x32xf32>
    %125 = arith.mulf %123, %124 : vector<8x32xf32>
    %126 = vector.broadcast %106 : vector<1x32xf32> to vector<8x32xf32>
    %127 = arith.mulf %125, %126 : vector<8x32xf32>
    %128 = vector.broadcast %107 : vector<1x32xf32> to vector<8x32xf32>
    %129 = arith.addf %127, %128 : vector<8x32xf32>
    %130 = arith.truncf %129 : vector<8x32xf32> to vector<8x32xbf16>
    %c0_44 = arith.constant 0 : index
    %c0_45 = arith.constant 0 : index
    %131 = vector.load %arg9[%c0_44, %c0_45] : memref<32x32xbf16, #tpu.memory_space<vmem>>, vector<32x32xbf16>
    %cst_46 = arith.constant dense<0.000000e+00> : vector<8x32xf32>
    %132 = tpu.matmul %130, %131, %cst_46 {dimension_numbers = #tpu.dot_dimension_numbers<[1], [0], [0], [1], [0, 0, 1, 1], [], []>} : vector<8x32xbf16>, vector<32x32xbf16>, vector<8x32xf32> -> vector<8x32xf32>
    %c0_47 = arith.constant 0 : index
    %c0_48 = arith.constant 0 : index
    %133 = vector.load %arg10[%c0_47, %c0_48] : memref<1x32xf32, #tpu.memory_space<vmem>>, vector<1x32xf32>
    %134 = vector.broadcast %133 : vector<1x32xf32> to vector<8x32xf32>
    %135 = arith.addf %132, %134 : vector<8x32xf32>
    %136 = arith.truncf %3 : vector<8x32xf32> to vector<8x32xbf16>
    %c0_49 = arith.constant 0 : index
    %c0_50 = arith.constant 0 : index
    %137 = vector.load %arg11[%c0_49, %c0_50] : memref<32x64xbf16, #tpu.memory_space<vmem>>, vector<32x64xbf16>
    %cst_51 = arith.constant dense<0.000000e+00> : vector<8x64xf32>
    %138 = tpu.matmul %136, %137, %cst_51 {dimension_numbers = #tpu.dot_dimension_numbers<[1], [0], [0], [1], [0, 0, 1, 1], [], []>} : vector<8x32xbf16>, vector<32x64xbf16>, vector<8x64xf32> -> vector<8x64xf32>
    %c0_52 = arith.constant 0 : index
    %c0_53 = arith.constant 0 : index
    %139 = vector.load %arg12[%c0_52, %c0_53] : memref<1x64xf32, #tpu.memory_space<vmem>>, vector<1x64xf32>
    %140 = vector.broadcast %139 : vector<1x64xf32> to vector<8x64xf32>
    %141 = arith.addf %138, %140 : vector<8x64xf32>
    %142 = vector.extract_strided_slice %141 {offsets = [0, 0], sizes = [8, 32], strides = [1, 1]} : vector<8x64xf32> to vector<8x32xf32>
    %143 = vector.extract_strided_slice %141 {offsets = [0, 32], sizes = [8, 32], strides = [1, 1]} : vector<8x64xf32> to vector<8x32xf32>
    %c0_54 = arith.constant 0 : index
    %c0_55 = arith.constant 0 : index
    %c0_56 = arith.constant 0 : index
    %144 = vector.load %arg25[%c0_54, %c0_55, %c0_56] : memref<1x1x8xf32, #tpu.memory_space<vmem>>, vector<1x1x8xf32>
    %145 = vector.shape_cast %144 : vector<1x1x8xf32> to vector<1x8xf32>
    %146 = vector.extract_strided_slice %135 {offsets = [0, 0], sizes = [8, 8], strides = [1, 1]} : vector<8x32xf32> to vector<8x8xf32>
    %147 = arith.truncf %146 : vector<8x8xf32> to vector<8x8xbf16>
    %148 = vector.extract_strided_slice %142 {offsets = [0, 0], sizes = [8, 8], strides = [1, 1]} : vector<8x32xf32> to vector<8x8xf32>
    %149 = arith.truncf %148 : vector<8x8xf32> to vector<8x8xbf16>
    %150 = vector.extract_strided_slice %143 {offsets = [0, 0], sizes = [8, 8], strides = [1, 1]} : vector<8x32xf32> to vector<8x8xf32>
    %151 = arith.truncf %150 : vector<8x8xf32> to vector<8x8xbf16>
    %cst_57 = arith.constant dense<0.000000e+00> : vector<8x8xf32>
    %152 = tpu.matmul %147, %149, %cst_57 {dimension_numbers = #tpu.dot_dimension_numbers<[1], [1], [0], [0], [0, 0, 1, 0], [], []>} : vector<8x8xbf16>, vector<8x8xbf16>, vector<8x8xf32> -> vector<8x8xf32>
    %153 = vector.broadcast %145 : vector<1x8xf32> to vector<8x8xf32>
    %154 = arith.addf %152, %153 : vector<8x8xf32>
    %cst_58 = arith.constant dense<0xFF800000> : vector<8xf32>
    %155 = vector.multi_reduction <maximumf>, %154, %cst_58 [1] : vector<8x8xf32> to vector<8xf32>
    %156 = vector.shape_cast %155 : vector<8xf32> to vector<8x1xf32>
    %157 = vector.broadcast %156 : vector<8x1xf32> to vector<8x8xf32>
    %158 = arith.subf %154, %157 : vector<8x8xf32>
    %159 = math.exp %158 : vector<8x8xf32>
    %cst_59 = arith.constant dense<0.000000e+00> : vector<8xf32>
    %160 = vector.multi_reduction <add>, %159, %cst_59 [1] : vector<8x8xf32> to vector<8xf32>
    %161 = vector.shape_cast %160 : vector<8xf32> to vector<8x1xf32>
    %162 = tpu.reciprocal %161 {approx = true} : vector<8x1xf32> -> vector<8x1xf32>
    %163 = vector.broadcast %162 : vector<8x1xf32> to vector<8x8xf32>
    %164 = arith.mulf %159, %163 : vector<8x8xf32>
    %165 = arith.truncf %164 : vector<8x8xf32> to vector<8x8xbf16>
    %cst_60 = arith.constant dense<0.000000e+00> : vector<8x8xf32>
    %166 = tpu.matmul %165, %151, %cst_60 {dimension_numbers = #tpu.dot_dimension_numbers<[1], [0], [0], [1], [0, 0, 1, 1], [], []>} : vector<8x8xbf16>, vector<8x8xbf16>, vector<8x8xf32> -> vector<8x8xf32>
    %167 = vector.extract_strided_slice %135 {offsets = [0, 8], sizes = [8, 8], strides = [1, 1]} : vector<8x32xf32> to vector<8x8xf32>
    %168 = arith.truncf %167 : vector<8x8xf32> to vector<8x8xbf16>
    %169 = vector.extract_strided_slice %142 {offsets = [0, 8], sizes = [8, 8], strides = [1, 1]} : vector<8x32xf32> to vector<8x8xf32>
    %170 = arith.truncf %169 : vector<8x8xf32> to vector<8x8xbf16>
    %171 = vector.extract_strided_slice %143 {offsets = [0, 8], sizes = [8, 8], strides = [1, 1]} : vector<8x32xf32> to vector<8x8xf32>
    %172 = arith.truncf %171 : vector<8x8xf32> to vector<8x8xbf16>
    %cst_61 = arith.constant dense<0.000000e+00> : vector<8x8xf32>
    %173 = tpu.matmul %168, %170, %cst_61 {dimension_numbers = #tpu.dot_dimension_numbers<[1], [1], [0], [0], [0, 0, 1, 0], [], []>} : vector<8x8xbf16>, vector<8x8xbf16>, vector<8x8xf32> -> vector<8x8xf32>
    %174 = vector.broadcast %145 : vector<1x8xf32> to vector<8x8xf32>
    %175 = arith.addf %173, %174 : vector<8x8xf32>
    %cst_62 = arith.constant dense<0xFF800000> : vector<8xf32>
    %176 = vector.multi_reduction <maximumf>, %175, %cst_62 [1] : vector<8x8xf32> to vector<8xf32>
    %177 = vector.shape_cast %176 : vector<8xf32> to vector<8x1xf32>
    %178 = vector.broadcast %177 : vector<8x1xf32> to vector<8x8xf32>
    %179 = arith.subf %175, %178 : vector<8x8xf32>
    %180 = math.exp %179 : vector<8x8xf32>
    %cst_63 = arith.constant dense<0.000000e+00> : vector<8xf32>
    %181 = vector.multi_reduction <add>, %180, %cst_63 [1] : vector<8x8xf32> to vector<8xf32>
    %182 = vector.shape_cast %181 : vector<8xf32> to vector<8x1xf32>
    %183 = tpu.reciprocal %182 {approx = true} : vector<8x1xf32> -> vector<8x1xf32>
    %184 = vector.broadcast %183 : vector<8x1xf32> to vector<8x8xf32>
    %185 = arith.mulf %180, %184 : vector<8x8xf32>
    %186 = arith.truncf %185 : vector<8x8xf32> to vector<8x8xbf16>
    %cst_64 = arith.constant dense<0.000000e+00> : vector<8x8xf32>
    %187 = tpu.matmul %186, %172, %cst_64 {dimension_numbers = #tpu.dot_dimension_numbers<[1], [0], [0], [1], [0, 0, 1, 1], [], []>} : vector<8x8xbf16>, vector<8x8xbf16>, vector<8x8xf32> -> vector<8x8xf32>
    %188 = vector.extract_strided_slice %135 {offsets = [0, 16], sizes = [8, 8], strides = [1, 1]} : vector<8x32xf32> to vector<8x8xf32>
    %189 = arith.truncf %188 : vector<8x8xf32> to vector<8x8xbf16>
    %190 = vector.extract_strided_slice %142 {offsets = [0, 16], sizes = [8, 8], strides = [1, 1]} : vector<8x32xf32> to vector<8x8xf32>
    %191 = arith.truncf %190 : vector<8x8xf32> to vector<8x8xbf16>
    %192 = vector.extract_strided_slice %143 {offsets = [0, 16], sizes = [8, 8], strides = [1, 1]} : vector<8x32xf32> to vector<8x8xf32>
    %193 = arith.truncf %192 : vector<8x8xf32> to vector<8x8xbf16>
    %cst_65 = arith.constant dense<0.000000e+00> : vector<8x8xf32>
    %194 = tpu.matmul %189, %191, %cst_65 {dimension_numbers = #tpu.dot_dimension_numbers<[1], [1], [0], [0], [0, 0, 1, 0], [], []>} : vector<8x8xbf16>, vector<8x8xbf16>, vector<8x8xf32> -> vector<8x8xf32>
    %195 = vector.broadcast %145 : vector<1x8xf32> to vector<8x8xf32>
    %196 = arith.addf %194, %195 : vector<8x8xf32>
    %cst_66 = arith.constant dense<0xFF800000> : vector<8xf32>
    %197 = vector.multi_reduction <maximumf>, %196, %cst_66 [1] : vector<8x8xf32> to vector<8xf32>
    %198 = vector.shape_cast %197 : vector<8xf32> to vector<8x1xf32>
    %199 = vector.broadcast %198 : vector<8x1xf32> to vector<8x8xf32>
    %200 = arith.subf %196, %199 : vector<8x8xf32>
    %201 = math.exp %200 : vector<8x8xf32>
    %cst_67 = arith.constant dense<0.000000e+00> : vector<8xf32>
    %202 = vector.multi_reduction <add>, %201, %cst_67 [1] : vector<8x8xf32> to vector<8xf32>
    %203 = vector.shape_cast %202 : vector<8xf32> to vector<8x1xf32>
    %204 = tpu.reciprocal %203 {approx = true} : vector<8x1xf32> -> vector<8x1xf32>
    %205 = vector.broadcast %204 : vector<8x1xf32> to vector<8x8xf32>
    %206 = arith.mulf %201, %205 : vector<8x8xf32>
    %207 = arith.truncf %206 : vector<8x8xf32> to vector<8x8xbf16>
    %cst_68 = arith.constant dense<0.000000e+00> : vector<8x8xf32>
    %208 = tpu.matmul %207, %193, %cst_68 {dimension_numbers = #tpu.dot_dimension_numbers<[1], [0], [0], [1], [0, 0, 1, 1], [], []>} : vector<8x8xbf16>, vector<8x8xbf16>, vector<8x8xf32> -> vector<8x8xf32>
    %209 = vector.extract_strided_slice %135 {offsets = [0, 24], sizes = [8, 8], strides = [1, 1]} : vector<8x32xf32> to vector<8x8xf32>
    %210 = arith.truncf %209 : vector<8x8xf32> to vector<8x8xbf16>
    %211 = vector.extract_strided_slice %142 {offsets = [0, 24], sizes = [8, 8], strides = [1, 1]} : vector<8x32xf32> to vector<8x8xf32>
    %212 = arith.truncf %211 : vector<8x8xf32> to vector<8x8xbf16>
    %213 = vector.extract_strided_slice %143 {offsets = [0, 24], sizes = [8, 8], strides = [1, 1]} : vector<8x32xf32> to vector<8x8xf32>
    %214 = arith.truncf %213 : vector<8x8xf32> to vector<8x8xbf16>
    %cst_69 = arith.constant dense<0.000000e+00> : vector<8x8xf32>
    %215 = tpu.matmul %210, %212, %cst_69 {dimension_numbers = #tpu.dot_dimension_numbers<[1], [1], [0], [0], [0, 0, 1, 0], [], []>} : vector<8x8xbf16>, vector<8x8xbf16>, vector<8x8xf32> -> vector<8x8xf32>
    %216 = vector.broadcast %145 : vector<1x8xf32> to vector<8x8xf32>
    %217 = arith.addf %215, %216 : vector<8x8xf32>
    %cst_70 = arith.constant dense<0xFF800000> : vector<8xf32>
    %218 = vector.multi_reduction <maximumf>, %217, %cst_70 [1] : vector<8x8xf32> to vector<8xf32>
    %219 = vector.shape_cast %218 : vector<8xf32> to vector<8x1xf32>
    %220 = vector.broadcast %219 : vector<8x1xf32> to vector<8x8xf32>
    %221 = arith.subf %217, %220 : vector<8x8xf32>
    %222 = math.exp %221 : vector<8x8xf32>
    %cst_71 = arith.constant dense<0.000000e+00> : vector<8xf32>
    %223 = vector.multi_reduction <add>, %222, %cst_71 [1] : vector<8x8xf32> to vector<8xf32>
    %224 = vector.shape_cast %223 : vector<8xf32> to vector<8x1xf32>
    %225 = tpu.reciprocal %224 {approx = true} : vector<8x1xf32> -> vector<8x1xf32>
    %226 = vector.broadcast %225 : vector<8x1xf32> to vector<8x8xf32>
    %227 = arith.mulf %222, %226 : vector<8x8xf32>
    %228 = arith.truncf %227 : vector<8x8xf32> to vector<8x8xbf16>
    %cst_72 = arith.constant dense<0.000000e+00> : vector<8x8xf32>
    %229 = tpu.matmul %228, %214, %cst_72 {dimension_numbers = #tpu.dot_dimension_numbers<[1], [0], [0], [1], [0, 0, 1, 1], [], []>} : vector<8x8xbf16>, vector<8x8xbf16>, vector<8x8xf32> -> vector<8x8xf32>
    %230 = tpu.concatenate %166, %187, %208, %229 in 1 : vector<8x8xf32>, vector<8x8xf32>, vector<8x8xf32>, vector<8x8xf32> -> vector<8x32xf32>
    %231 = arith.truncf %230 : vector<8x32xf32> to vector<8x32xbf16>
    %c0_73 = arith.constant 0 : index
    %c0_74 = arith.constant 0 : index
    %232 = vector.load %arg13[%c0_73, %c0_74] : memref<32x32xbf16, #tpu.memory_space<vmem>>, vector<32x32xbf16>
    %cst_75 = arith.constant dense<0.000000e+00> : vector<8x32xf32>
    %233 = tpu.matmul %231, %232, %cst_75 {dimension_numbers = #tpu.dot_dimension_numbers<[1], [0], [0], [1], [0, 0, 1, 1], [], []>} : vector<8x32xbf16>, vector<32x32xbf16>, vector<8x32xf32> -> vector<8x32xf32>
    %c0_76 = arith.constant 0 : index
    %c0_77 = arith.constant 0 : index
    %234 = vector.load %arg14[%c0_76, %c0_77] : memref<1x32xf32, #tpu.memory_space<vmem>>, vector<1x32xf32>
    %235 = vector.broadcast %234 : vector<1x32xf32> to vector<8x32xf32>
    %236 = arith.addf %233, %235 : vector<8x32xf32>
    %237 = arith.addf %129, %236 : vector<8x32xf32>
    %c0_78 = arith.constant 0 : index
    %c0_79 = arith.constant 0 : index
    %238 = vector.load %arg15[%c0_78, %c0_79] : memref<1x32xf32, #tpu.memory_space<vmem>>, vector<1x32xf32>
    %c0_80 = arith.constant 0 : index
    %c0_81 = arith.constant 0 : index
    %239 = vector.load %arg16[%c0_80, %c0_81] : memref<1x32xf32, #tpu.memory_space<vmem>>, vector<1x32xf32>
    %cst_82 = arith.constant dense<0.000000e+00> : vector<8xf32>
    %240 = vector.multi_reduction <add>, %237, %cst_82 [1] : vector<8x32xf32> to vector<8xf32>
    %241 = vector.shape_cast %240 : vector<8xf32> to vector<8x1xf32>
    %cst_83 = arith.constant 3.200000e+01 : f32
    %242 = vector.broadcast %cst_83 : f32 to vector<8x1xf32>
    %243 = arith.divf %241, %242 : vector<8x1xf32>
    %244 = vector.broadcast %243 : vector<8x1xf32> to vector<8x32xf32>
    %245 = arith.subf %237, %244 : vector<8x32xf32>
    %246 = arith.mulf %245, %245 : vector<8x32xf32>
    %cst_84 = arith.constant dense<0.000000e+00> : vector<8xf32>
    %247 = vector.multi_reduction <add>, %246, %cst_84 [1] : vector<8x32xf32> to vector<8xf32>
    %248 = vector.shape_cast %247 : vector<8xf32> to vector<8x1xf32>
    %cst_85 = arith.constant 3.200000e+01 : f32
    %249 = vector.broadcast %cst_85 : f32 to vector<8x1xf32>
    %250 = arith.divf %248, %249 : vector<8x1xf32>
    %cst_86 = arith.constant 9.99999974E-6 : f32
    %251 = vector.broadcast %cst_86 : f32 to vector<8x1xf32>
    %252 = arith.addf %250, %251 : vector<8x1xf32>
    %253 = math.rsqrt %252 : vector<8x1xf32>
    %254 = vector.broadcast %243 : vector<8x1xf32> to vector<8x32xf32>
    %255 = arith.subf %237, %254 : vector<8x32xf32>
    %256 = vector.broadcast %253 : vector<8x1xf32> to vector<8x32xf32>
    %257 = arith.mulf %255, %256 : vector<8x32xf32>
    %258 = vector.broadcast %238 : vector<1x32xf32> to vector<8x32xf32>
    %259 = arith.mulf %257, %258 : vector<8x32xf32>
    %260 = vector.broadcast %239 : vector<1x32xf32> to vector<8x32xf32>
    %261 = arith.addf %259, %260 : vector<8x32xf32>
    %262 = arith.truncf %261 : vector<8x32xf32> to vector<8x32xbf16>
    %c0_87 = arith.constant 0 : index
    %c0_88 = arith.constant 0 : index
    %263 = vector.load %arg17[%c0_87, %c0_88] : memref<32x64xbf16, #tpu.memory_space<vmem>>, vector<32x64xbf16>
    %cst_89 = arith.constant dense<0.000000e+00> : vector<8x64xf32>
    %264 = tpu.matmul %262, %263, %cst_89 {dimension_numbers = #tpu.dot_dimension_numbers<[1], [0], [0], [1], [0, 0, 1, 1], [], []>} : vector<8x32xbf16>, vector<32x64xbf16>, vector<8x64xf32> -> vector<8x64xf32>
    %c0_90 = arith.constant 0 : index
    %c0_91 = arith.constant 0 : index
    %265 = vector.load %arg18[%c0_90, %c0_91] : memref<1x64xf32, #tpu.memory_space<vmem>>, vector<1x64xf32>
    %266 = vector.broadcast %265 : vector<1x64xf32> to vector<8x64xf32>
    %267 = arith.addf %264, %266 : vector<8x64xf32>
    %cst_92 = arith.constant 0.000000e+00 : f32
    %268 = vector.broadcast %cst_92 : f32 to vector<8x64xf32>
    %269 = arith.maximumf %267, %268 : vector<8x64xf32>
    %270 = arith.truncf %269 : vector<8x64xf32> to vector<8x64xbf16>
    %c0_93 = arith.constant 0 : index
    %c0_94 = arith.constant 0 : index
    %271 = vector.load %arg19[%c0_93, %c0_94] : memref<64x32xbf16, #tpu.memory_space<vmem>>, vector<64x32xbf16>
    %cst_95 = arith.constant dense<0.000000e+00> : vector<8x32xf32>
    %272 = tpu.matmul %270, %271, %cst_95 {dimension_numbers = #tpu.dot_dimension_numbers<[1], [0], [0], [1], [0, 0, 1, 1], [], []>} : vector<8x64xbf16>, vector<64x32xbf16>, vector<8x32xf32> -> vector<8x32xf32>
    %c0_96 = arith.constant 0 : index
    %c0_97 = arith.constant 0 : index
    %273 = vector.load %arg20[%c0_96, %c0_97] : memref<1x32xf32, #tpu.memory_space<vmem>>, vector<1x32xf32>
    %274 = vector.broadcast %273 : vector<1x32xf32> to vector<8x32xf32>
    %275 = arith.addf %272, %274 : vector<8x32xf32>
    %276 = arith.addf %261, %275 : vector<8x32xf32>
    %c0_98 = arith.constant 0 : index
    %c0_99 = arith.constant 0 : index
    %277 = vector.load %arg21[%c0_98, %c0_99] : memref<1x32xf32, #tpu.memory_space<vmem>>, vector<1x32xf32>
    %c0_100 = arith.constant 0 : index
    %c0_101 = arith.constant 0 : index
    %278 = vector.load %arg22[%c0_100, %c0_101] : memref<1x32xf32, #tpu.memory_space<vmem>>, vector<1x32xf32>
    %cst_102 = arith.constant dense<0.000000e+00> : vector<8xf32>
    %279 = vector.multi_reduction <add>, %276, %cst_102 [1] : vector<8x32xf32> to vector<8xf32>
    %280 = vector.shape_cast %279 : vector<8xf32> to vector<8x1xf32>
    %cst_103 = arith.constant 3.200000e+01 : f32
    %281 = vector.broadcast %cst_103 : f32 to vector<8x1xf32>
    %282 = arith.divf %280, %281 : vector<8x1xf32>
    %283 = vector.broadcast %282 : vector<8x1xf32> to vector<8x32xf32>
    %284 = arith.subf %276, %283 : vector<8x32xf32>
    %285 = arith.mulf %284, %284 : vector<8x32xf32>
    %cst_104 = arith.constant dense<0.000000e+00> : vector<8xf32>
    %286 = vector.multi_reduction <add>, %285, %cst_104 [1] : vector<8x32xf32> to vector<8xf32>
    %287 = vector.shape_cast %286 : vector<8xf32> to vector<8x1xf32>
    %cst_105 = arith.constant 3.200000e+01 : f32
    %288 = vector.broadcast %cst_105 : f32 to vector<8x1xf32>
    %289 = arith.divf %287, %288 : vector<8x1xf32>
    %cst_106 = arith.constant 9.99999974E-6 : f32
    %290 = vector.broadcast %cst_106 : f32 to vector<8x1xf32>
    %291 = arith.addf %289, %290 : vector<8x1xf32>
    %292 = math.rsqrt %291 : vector<8x1xf32>
    %293 = vector.broadcast %282 : vector<8x1xf32> to vector<8x32xf32>
    %294 = arith.subf %276, %293 : vector<8x32xf32>
    %295 = vector.broadcast %292 : vector<8x1xf32> to vector<8x32xf32>
    %296 = arith.mulf %294, %295 : vector<8x32xf32>
    %297 = vector.broadcast %277 : vector<1x32xf32> to vector<8x32xf32>
    %298 = arith.mulf %296, %297 : vector<8x32xf32>
    %299 = vector.broadcast %278 : vector<1x32xf32> to vector<8x32xf32>
    %300 = arith.addf %298, %299 : vector<8x32xf32>
    %c0_107 = arith.constant 0 : index
    %c0_108 = arith.constant 0 : index
    %c0_109 = arith.constant 0 : index
    %301 = vector.load %arg26[%c0_107, %c0_108, %c0_109] : memref<1x8x32xf32, #tpu.memory_space<vmem>>, vector<1x8x32xf32>
    %302 = vector.shape_cast %301 : vector<1x8x32xf32> to vector<8x32xf32>
    %303 = vector.shape_cast %300 : vector<8x32xf32> to vector<1x8x32xf32>
    tpu.vector_store %arg26[%c0_107, %c0_108, %c0_109], %303 {strides = array<i32>} : memref<1x8x32xf32, #tpu.memory_space<vmem>>, vector<1x8x32xf32>,
    return
  }
  func.func @transform_0(%arg0: i32) -> (i32, i32, i32) {
    %c0_i32 = arith.constant 0 : i32
    %c0_i32_0 = arith.constant 0 : i32
    %c0_i32_1 = arith.constant 0 : i32
    return %arg0, %c0_i32, %c0_i32_0 : i32, i32, i32
  }
  func.func @transform_1(%arg0: i32) -> (i32, i32, i32) {
    %c0_i32 = arith.constant 0 : i32
    %c0_i32_0 = arith.constant 0 : i32
    %c0_i32_1 = arith.constant 0 : i32
    return %arg0, %c0_i32, %c0_i32_0 : i32, i32, i32
  }
  func.func @transform_2(%arg0: i32) -> (i32, i32) {
    %c0_i32 = arith.constant 0 : i32
    %c0_i32_0 = arith.constant 0 : i32
    %c0_i32_1 = arith.constant 0 : i32
    return %c0_i32, %c0_i32_0 : i32, i32
  }
  func.func @transform_3(%arg0: i32) -> (i32, i32) {
    %c0_i32 = arith.constant 0 : i32
    %c0_i32_0 = arith.constant 0 : i32
    %c0_i32_1 = arith.constant 0 : i32
    return %c0_i32, %c0_i32_0 : i32, i32
  }
  func.func @transform_4(%arg0: i32) -> (i32, i32) {
    %c0_i32 = arith.constant 0 : i32
    %c0_i32_0 = arith.constant 0 : i32
    %c0_i32_1 = arith.constant 0 : i32
    return %c0_i32, %c0_i32_0 : i32, i32
  }
  func.func @transform_5(%arg0: i32) -> (i32, i32) {
    %c0_i32 = arith.constant 0 : i32
    %c0_i32_0 = arith.constant 0 : i32
    %c0_i32_1 = arith.constant 0 : i32
    return %c0_i32, %c0_i32_0 : i32, i32
  }
  func.func @transform_6(%arg0: i32) -> (i32, i32) {
    %c0_i32 = arith.constant 0 : i32
    %c0_i32_0 = arith.constant 0 : i32
    %c0_i32_1 = arith.constant 0 : i32
    return %c0_i32, %c0_i32_0 : i32, i32
  }
  func.func @transform_7(%arg0: i32) -> (i32, i32) {
    %c0_i32 = arith.constant 0 : i32
    %c0_i32_0 = arith.constant 0 : i32
    %c0_i32_1 = arith.constant 0 : i32
    return %c0_i32, %c0_i32_0 : i32, i32
  }
  func.func @transform_8(%arg0: i32) -> (i32, i32) {
    %c0_i32 = arith.constant 0 : i32
    %c0_i32_0 = arith.constant 0 : i32
    %c0_i32_1 = arith.constant 0 : i32
    return %c0_i32, %c0_i32_0 : i32, i32
  }
  func.func @transform_9(%arg0: i32) -> (i32, i32) {
    %c0_i32 = arith.constant 0 : i32
    %c0_i32_0 = arith.constant 0 : i32
    %c0_i32_1 = arith.constant 0 : i32
    return %c0_i32, %c0_i32_0 : i32, i32
  }
  func.func @transform_10(%arg0: i32) -> (i32, i32) {
    %c0_i32 = arith.constant 0 : i32
    %c0_i32_0 = arith.constant 0 : i32
    %c0_i32_1 = arith.constant 0 : i32
    return %c0_i32, %c0_i32_0 : i32, i32
  }
  func.func @transform_11(%arg0: i32) -> (i32, i32) {
    %c0_i32 = arith.constant 0 : i32
    %c0_i32_0 = arith.constant 0 : i32
    %c0_i32_1 = arith.constant 0 : i32
    return %c0_i32, %c0_i32_0 : i32, i32
  }
  func.func @transform_12(%arg0: i32) -> (i32, i32) {
    %c0_i32 = arith.constant 0 : i32
    %c0_i32_0 = arith.constant 0 : i32
    %c0_i32_1 = arith.constant 0 : i32
    return %c0_i32, %c0_i32_0 : i32, i32
  }
  func.func @transform_13(%arg0: i32) -> (i32, i32) {
    %c0_i32 = arith.constant 0 : i32
    %c0_i32_0 = arith.constant 0 : i32
    %c0_i32_1 = arith.constant 0 : i32
    return %c0_i32, %c0_i32_0 : i32, i32
  }
  func.func @transform_14(%arg0: i32) -> (i32, i32) {
    %c0_i32 = arith.constant 0 : i32
    %c0_i32_0 = arith.constant 0 : i32
    %c0_i32_1 = arith.constant 0 : i32
    return %c0_i32, %c0_i32_0 : i32, i32
  }
  func.func @transform_15(%arg0: i32) -> (i32, i32) {
    %c0_i32 = arith.constant 0 : i32
    %c0_i32_0 = arith.constant 0 : i32
    %c0_i32_1 = arith.constant 0 : i32
    return %c0_i32, %c0_i32_0 : i32, i32
  }
  func.func @transform_16(%arg0: i32) -> (i32, i32) {
    %c0_i32 = arith.constant 0 : i32
    %c0_i32_0 = arith.constant 0 : i32
    %c0_i32_1 = arith.constant 0 : i32
    return %c0_i32, %c0_i32_0 : i32, i32
  }
  func.func @transform_17(%arg0: i32) -> (i32, i32) {
    %c0_i32 = arith.constant 0 : i32
    %c0_i32_0 = arith.constant 0 : i32
    %c0_i32_1 = arith.constant 0 : i32
    return %c0_i32, %c0_i32_0 : i32, i32
  }
  func.func @transform_18(%arg0: i32) -> (i32, i32) {
    %c0_i32 = arith.constant 0 : i32
    %c0_i32_0 = arith.constant 0 : i32
    %c0_i32_1 = arith.constant 0 : i32
    return %c0_i32, %c0_i32_0 : i32, i32
  }
  func.func @transform_19(%arg0: i32) -> (i32, i32) {
    %c0_i32 = arith.constant 0 : i32
    %c0_i32_0 = arith.constant 0 : i32
    %c0_i32_1 = arith.constant 0 : i32
    return %c0_i32, %c0_i32_0 : i32, i32
  }
  func.func @transform_20(%arg0: i32) -> (i32, i32) {
    %c0_i32 = arith.constant 0 : i32
    %c0_i32_0 = arith.constant 0 : i32
    %c0_i32_1 = arith.constant 0 : i32
    return %c0_i32, %c0_i32_0 : i32, i32
  }
  func.func @transform_21(%arg0: i32) -> (i32, i32) {
    %c0_i32 = arith.constant 0 : i32
    %c0_i32_0 = arith.constant 0 : i32
    %c0_i32_1 = arith.constant 0 : i32
    return %c0_i32, %c0_i32_0 : i32, i32
  }
  func.func @transform_22(%arg0: i32) -> (i32, i32) {
    %c0_i32 = arith.constant 0 : i32
    %c0_i32_0 = arith.constant 0 : i32
    %c0_i32_1 = arith.constant 0 : i32
    return %c0_i32, %c0_i32_0 : i32, i32
  }
  func.func @transform_23(%arg0: i32) -> (i32, i32, i32) {
    %c0_i32 = arith.constant 0 : i32
    %c0_i32_0 = arith.constant 0 : i32
    %c0_i32_1 = arith.constant 0 : i32
    return %arg0, %c0_i32, %c0_i32_0 : i32, i32, i32
  }
  func.func @transform_24(%arg0: i32) -> (i32, i32, i32) {
    %c0_i32 = arith.constant 0 : i32
    %c0_i32_0 = arith.constant 0 : i32
    %c0_i32_1 = arith.constant 0 : i32
    return %arg0, %c0_i32, %c0_i32_0 : i32, i32, i32
  }
  func.func @transform_25(%arg0: i32) -> (i32, i32, i32) {
    %c0_i32 = arith.constant 0 : i32
    %c0_i32_0 = arith.constant 0 : i32
    %c0_i32_1 = arith.constant 0 : i32
    return %arg0, %c0_i32, %c0_i32_0 : i32, i32, i32
  }
}

module attributes {stable_mosaic.version = 11 : i64} {
  func.func @_ln_linear_kernel(%arg0: i32, %arg1: memref<16x32xf32, #tpu.memory_space<vmem>>, %arg2: memref<1x32xf32, #tpu.memory_space<vmem>>, %arg3: memref<1x32xf32, #tpu.memory_space<vmem>>, %arg4: memref<32x128xbf16, #tpu.memory_space<vmem>>, %arg5: memref<1x128xf32, #tpu.memory_space<vmem>>, %arg6: memref<16x128xf32, #tpu.memory_space<vmem>>) attributes {dimension_semantics = [#tpu.dimension_semantics<parallel>], iteration_bounds = array<i64: 1>, scalar_prefetch = 0 : i64, scratch_operands = 0 : i64, tpu.core_type = #tpu.core_type<tc>, window_params = [{transform_indices = @transform_0, window_bounds = array<i64: 16, 32>}, {pipeline_mode = #tpu.pipeline_mode<synchronous>, transform_indices = @transform_1, window_bounds = array<i64: 1, 32>}, {pipeline_mode = #tpu.pipeline_mode<synchronous>, transform_indices = @transform_2, window_bounds = array<i64: 1, 32>}, {pipeline_mode = #tpu.pipeline_mode<synchronous>, transform_indices = @transform_3, window_bounds = array<i64: 32, 128>}, {pipeline_mode = #tpu.pipeline_mode<synchronous>, transform_indices = @transform_4, window_bounds = array<i64: 1, 128>}, {transform_indices = @transform_5, window_bounds = array<i64: 16, 128>}]} {
    %c0 = arith.constant 0 : index
    %c0_0 = arith.constant 0 : index
    %0 = vector.load %arg1[%c0, %c0_0] : memref<16x32xf32, #tpu.memory_space<vmem>>, vector<16x32xf32>
    %c0_1 = arith.constant 0 : index
    %c0_2 = arith.constant 0 : index
    %1 = vector.load %arg2[%c0_1, %c0_2] : memref<1x32xf32, #tpu.memory_space<vmem>>, vector<1x32xf32>
    %c0_3 = arith.constant 0 : index
    %c0_4 = arith.constant 0 : index
    %2 = vector.load %arg3[%c0_3, %c0_4] : memref<1x32xf32, #tpu.memory_space<vmem>>, vector<1x32xf32>
    %cst = arith.constant dense<0.000000e+00> : vector<16xf32>
    %3 = vector.multi_reduction <add>, %0, %cst [1] : vector<16x32xf32> to vector<16xf32>
    %4 = vector.shape_cast %3 : vector<16xf32> to vector<16x1xf32>
    %cst_5 = arith.constant 3.200000e+01 : f32
    %5 = vector.broadcast %cst_5 : f32 to vector<16x1xf32>
    %6 = arith.divf %4, %5 : vector<16x1xf32>
    %7 = vector.broadcast %6 : vector<16x1xf32> to vector<16x32xf32>
    %8 = arith.subf %0, %7 : vector<16x32xf32>
    %9 = arith.mulf %8, %8 : vector<16x32xf32>
    %cst_6 = arith.constant dense<0.000000e+00> : vector<16xf32>
    %10 = vector.multi_reduction <add>, %9, %cst_6 [1] : vector<16x32xf32> to vector<16xf32>
    %11 = vector.shape_cast %10 : vector<16xf32> to vector<16x1xf32>
    %cst_7 = arith.constant 3.200000e+01 : f32
    %12 = vector.broadcast %cst_7 : f32 to vector<16x1xf32>
    %13 = arith.divf %11, %12 : vector<16x1xf32>
    %cst_8 = arith.constant 9.99999974E-6 : f32
    %14 = vector.broadcast %cst_8 : f32 to vector<16x1xf32>
    %15 = arith.addf %13, %14 : vector<16x1xf32>
    %16 = math.rsqrt %15 : vector<16x1xf32>
    %17 = vector.broadcast %6 : vector<16x1xf32> to vector<16x32xf32>
    %18 = arith.subf %0, %17 : vector<16x32xf32>
    %19 = vector.broadcast %16 : vector<16x1xf32> to vector<16x32xf32>
    %20 = arith.mulf %18, %19 : vector<16x32xf32>
    %21 = vector.broadcast %1 : vector<1x32xf32> to vector<16x32xf32>
    %22 = arith.mulf %20, %21 : vector<16x32xf32>
    %23 = vector.broadcast %2 : vector<1x32xf32> to vector<16x32xf32>
    %24 = arith.addf %22, %23 : vector<16x32xf32>
    %25 = arith.truncf %24 : vector<16x32xf32> to vector<16x32xbf16>
    %c0_9 = arith.constant 0 : index
    %c0_10 = arith.constant 0 : index
    %26 = vector.load %arg4[%c0_9, %c0_10] : memref<32x128xbf16, #tpu.memory_space<vmem>>, vector<32x128xbf16>
    %cst_11 = arith.constant dense<0.000000e+00> : vector<16x128xf32>
    %27 = tpu.matmul %25, %26, %cst_11 {dimension_numbers = #tpu.dot_dimension_numbers<[1], [0], [0], [1], [0, 0, 1, 1], [], []>} : vector<16x32xbf16>, vector<32x128xbf16>, vector<16x128xf32> -> vector<16x128xf32>
    %c0_12 = arith.constant 0 : index
    %c0_13 = arith.constant 0 : index
    %28 = vector.load %arg5[%c0_12, %c0_13] : memref<1x128xf32, #tpu.memory_space<vmem>>, vector<1x128xf32>
    %29 = vector.broadcast %28 : vector<1x128xf32> to vector<16x128xf32>
    %30 = arith.addf %27, %29 : vector<16x128xf32>
    %c0_14 = arith.constant 0 : index
    %c0_15 = arith.constant 0 : index
    %31 = vector.load %arg6[%c0_14, %c0_15] : memref<16x128xf32, #tpu.memory_space<vmem>>, vector<16x128xf32>
    tpu.vector_store %arg6[%c0_14, %c0_15], %30 {strides = array<i32>} : memref<16x128xf32, #tpu.memory_space<vmem>>, vector<16x128xf32>,
    return
  }
  func.func @transform_0(%arg0: i32) -> (i32, i32) {
    %c0_i32 = arith.constant 0 : i32
    %c0_i32_0 = arith.constant 0 : i32
    return %arg0, %c0_i32 : i32, i32
  }
  func.func @transform_1(%arg0: i32) -> (i32, i32) {
    %c0_i32 = arith.constant 0 : i32
    %c0_i32_0 = arith.constant 0 : i32
    %c0_i32_1 = arith.constant 0 : i32
    return %c0_i32, %c0_i32_0 : i32, i32
  }
  func.func @transform_2(%arg0: i32) -> (i32, i32) {
    %c0_i32 = arith.constant 0 : i32
    %c0_i32_0 = arith.constant 0 : i32
    %c0_i32_1 = arith.constant 0 : i32
    return %c0_i32, %c0_i32_0 : i32, i32
  }
  func.func @transform_3(%arg0: i32) -> (i32, i32) {
    %c0_i32 = arith.constant 0 : i32
    %c0_i32_0 = arith.constant 0 : i32
    %c0_i32_1 = arith.constant 0 : i32
    return %c0_i32, %c0_i32_0 : i32, i32
  }
  func.func @transform_4(%arg0: i32) -> (i32, i32) {
    %c0_i32 = arith.constant 0 : i32
    %c0_i32_0 = arith.constant 0 : i32
    %c0_i32_1 = arith.constant 0 : i32
    return %c0_i32, %c0_i32_0 : i32, i32
  }
  func.func @transform_5(%arg0: i32) -> (i32, i32) {
    %c0_i32 = arith.constant 0 : i32
    %c0_i32_0 = arith.constant 0 : i32
    return %arg0, %c0_i32 : i32, i32
  }
}

</mosaic_0001>

<bundles_post_ra>
// kernel: seq2seq_forward.8
= control target key start
LH: loop header
LB: loop body
LE: loop exit
PB: predicated region body
PF: predicated region fallthrough
CT: control target
= control target key end

     0   :  { %vm18_vm0 = vcmask 261120   ;;  %s118_s0 = inlined_call_operand.vmem [shape: f32[16,32], index: 0, kind: input, shape index: {}]   ;;  %s119_s1 = inlined_call_operand.vmem [shape: f32[1,32], index: 1, kind: input, shape index: {}]   ;;  %s120_s2 = inlined_call_operand.vmem [shape: f32[1,32], index: 2, kind: input, shape index: {}]   ;;  %s121_s3 = inlined_call_operand.vmem [shape: f32[16,32], index: 3, kind: output, shape index: {}]  }
   0x1   :  { %v14_v0 = vld [vmem:[%s118_s0] sm:$0xff]  ;;  %v15_v1 = vld [vmem:[%s118_s0 + $0x8] sm:$0xff] }
   0x2   :  { %v19_v2 = vsel %vm18_vm0, %v14_v0, 0.0  ;;  %v22_v3 = vsel %vm18_vm0, %v15_v1, 0.0  ;;  %v68_v21 = vld [vmem:[%s119_s1] ss:$0 sm:$0xff] }
   0x3   :  { %20 = vadd.xlane.f32.xlu0 %v19_v2  ;;  %v69_v23 = vld [vmem:[%s120_s2] ss:$0 sm:$0xff] }
   0x7   :  { %23 = vadd.xlane.f32.xlu0 %v22_v3 }
  0x90   :  { %v21_v4 = vpop.xlane.xlu0 %20 }
  0x91   :  { %v26_v5 = vmul.f32 0.03125, %v21_v4 }
  0x93   :  { %v28_v6 = vsub.f32 %v14_v0, %v26_v5 }
  0x94   :  { %v24_v7 = vpop.xlane.xlu0 %23 }
  0x95   :  { %v27_v8 = vmul.f32 0.03125, %v24_v7  ;;  %v30_v9 = vmul.f32 %v28_v6, %v28_v6 }
  0x97   :  { %v29_v10 = vsub.f32 %v15_v1, %v27_v8  ;;  %v32_v11 = vsel %vm18_vm0, %v30_v9, 0.0 }
  0x98   :  { %33 = vadd.xlane.f32.xlu1 %v32_v11 }
  0x99   :  { %v31_v12 = vmul.f32 %v29_v10, %v29_v10 }
  0x9b   :  { %v35_v13 = vsel %vm18_vm0, %v31_v12, 0.0 }
  0x9c   :  { %36 = vadd.xlane.f32.xlu1 %v35_v13 }
 0x125   :  { %v34_v14 = vpop.xlane.xlu1 %33 }
 0x126   :  { %v38_v15 = vmul.f32 0.03125, %v34_v14 }
 0x128   :  { %v40_v16 = vadd.f32 1e-05, %v38_v15 }
 0x129   :  { %v37_v17 = vpop.xlane.xlu1 %36 }
 0x12a   :  { %70 = vrsqrt.f32 %v40_v16  ;;  %v39_v18 = vmul.f32 0.03125, %v37_v17 }
 0x12c   :  { %v41_v19 = vadd.f32 1e-05, %v39_v18 }
 0x12e   :  { %72 = vrsqrt.f32 %v41_v19 }
 0x134   :  { %v71_v20 = vpop.eup %70 }
 0x135   :  { %v44_v22 = vmul.f32 %v71_v20, %v28_v6 }
 0x137   :  { %v52_v24 = vmul.f32 %v68_v21, %v44_v22 }
 0x138   :  { %v73_v25 = vpop.eup %72 }
 0x139   :  { %v60_v26 = vadd.f32 %v69_v23, %v52_v24  ;;  %v45_v27 = vmul.f32 %v73_v25, %v29_v10 }
 0x13b   :  { %62 = vst.msk [vmem:[%s121_s3] sm:$0xff] %vm18_vm0, %v60_v26  ;;  %v53_v28 = vmul.f32 %v68_v21, %v45_v27 }
 0x13d   :  { %v61_v29 = vadd.f32 %v69_v23, %v53_v28 }
 0x13f   :  { %63 = vst.msk [vmem:[%s121_s3 + $0x8] sm:$0xff] %vm18_vm0, %v61_v29 }

// kernel: seq2seq_forward.6
= control target key start
LH: loop header
LB: loop body
LE: loop exit
PB: predicated region body
PF: predicated region fallthrough
CT: control target
= control target key end

     0   :  { %s1697_s18 = smov 0   ;;  %s1876_s0 = inlined_call_operand.vmem [shape: f32[2,8,32], index: 0, kind: input, shape index: {}]   ;;  %s1877_s1 = inlined_call_operand.vmem [shape: bf16[32,96], index: 1, kind: input, shape index: {}]   ;;  %s1878_s2 = inlined_call_operand.vmem [shape: f32[1,96], index: 2, kind: input, shape index: {}]   ;;  %s1879_s3 = inlined_call_operand.vmem [shape: bf16[32,32], index: 3, kind: input, shape index: {}]   ;;  %s1880_s4 = inlined_call_operand.vmem [shape: f32[1,32], index: 4, kind: input, shape index: {}]   ;;  %s1881_s5 = inlined_call_operand.vmem [shape: f32[1,32], index: 5, kind: input, shape index: {}]   ;;  %s1882_s6 = inlined_call_operand.vmem [shape: f32[1,32], index: 6, kind: input, shape index: {}]   ;;  %s1883_s7 = inlined_call_operand.vmem [shape: bf16[32,64], index: 7, kind: input, shape index: {}]   ;;  %s1884_s8 = inlined_call_operand.vmem [shape: f32[1,64], index: 8, kind: input, shape index: {}]   ;;  %s1885_s9 = inlined_call_operand.vmem [shape: bf16[64,32], index: 9, kind: input, shape index: {}]   ;;  %s1886_s10 = inlined_call_operand.vmem [shape: f32[1,32], index: 10, kind: input, shape index: {}]   ;;  %s1887_s11 = inlined_call_operand.vmem [shape: f32[1,32], index: 11, kind: input, shape index: {}]   ;;  %s1888_s12 = inlined_call_operand.vmem [shape: f32[1,32], index: 12, kind: input, shape index: {}]   ;;  %s1889_s13 = inlined_call_operand.vmem [shape: f32[8,8], index: 13, kind: input, shape index: {}]   ;;  %s1890_s14 = inlined_call_operand.vmem [shape: f32[2,1,8], index: 14, kind: input, shape index: {}]   ;;  %s1891_s15 = inlined_call_operand.vmem [shape: f32[2,8,32], index: 15, kind: output, shape index: {}]  }
   0x1 LB: > { %s1385_s19 = sadd.s32 4294967295, %s1599_s18   ;;  %p1389_p0 = scmp.ge.s32.totalorder %s1599_s18, 1  ;;  %s1599_s18 = sphi %s1697_s18, %s25_s18  }
   0x2   : > { %p444_p1 = scmp.lt.s32.totalorder %s1599_s18, 3 }
   0x4   : > { %p445_p2 = pnand %p1389_p0, %p444_p1 }
   0x5   : > { %v1563_v0 = vld [vmem:[%s1877_s1] sm:$0xff] (!%p445_p2)   ;;  %v1601_v1 = vmov (!%p445_p2), 0.0   ;;  %v1564_v2 = vld [vmem:[%s1877_s1 + $0x8] sm:$0xff] (!%p445_p2)   ;;  %vm1602_vm0 = vmmov (!%p445_p2), 0   ;;  %p493_p3 = scmp.lt.s32.totalorder (!%p445_p2), %s1385_s19, 1  ;;  %vm530_vm1 = vcmask (!%p445_p2), 261120  }
   0x6   : > { %448 = sbr.rel (%p445_p2) target bundleno = 2559 (0x9ff), region = 80  ;;  %1455 = vmatprep.subr.bf16.mxu0 (!%p445_p2), %v1601_v1  ;;  %1463 = vmatprep.subr.bf16.mxu1 (!%p445_p2), %v1601_v1  ;;  %v1392_v5 = vld [vmem:[%s1878_s2] ss:$0 sm:$0xff] (!%p445_p2)  ;;  %s1603_s30 = smov (!%p445_p2), 120   ;;  %vm587_vm2 = vcmask (!%p445_p2), 64512   ;;  %vm651_vm3 = vcmask (!%p445_p2), 1043456  }
   0x7   : > { %1456 = vmatpush3.bf16.msra.mxu0 (!%p445_p2), %v1563_v0  ;;  %1459 = vmatprep.mubr.msk.bf16.mxu0 (!%p445_p2), %vm1602_vm0, %v1601_v1  ;;  %s1604_s16 = smov (!%p445_p2), 96   ;;  %s1605_s17 = smov (!%p445_p2), 80   ;;  %v574_v23 = vld [vmem:[%s1889_s13] sm:$0xff] (!%p445_p2)  ;;  %vm1038_vm4 = vcmask (!%p445_p2), 130048   ;;  %vm1040_vm5 = vcmask (!%p445_p2), 195584   ;;  %vm1248_vm6 = vcmask (!%p445_p2), 523264  }
   0x8   : > { %1457 = vmatprep.subr.bf16.mxu0 (!%p445_p2), %v1601_v1  ;;  %1465 = vmatprep.mubr.msk.bf16.mxu1 (!%p445_p2), %vm1602_vm0, %v1601_v1  ;;  %s1606_s20 = smov (!%p445_p2), 88   ;;  %s1607_s21 = smov (!%p445_p2), 72  }
   0x9   : > { %s1608_s22 = smov (!%p445_p2), 112   ;;  %s1609_s23 = smov (!%p445_p2), 104  }
   0xa   : > { %s1616_s28 = smov (!%p445_p2), 24  }
   0xb   : > { %1458 = vmatpush3.bf16.msra.mxu0 (!%p445_p2), %v1564_v2 }
   0xc   : > { %1469 = vmatprep.subr.bf16.mxu0 (!%p445_p2), %v1601_v1 }
   0xd   : > { %s1893_s19 = smov (!%p493_p3, %s1385_s19), 1 }
   0xe   : > { %s1390_s24 = sshll.u32 %s1893_s19, 3 }
   0xf   : > { %s496_s27 = scalar_lea.vmem %s1876_s0, %s1390_s24 }
  0x10   : > { %v1727_v3 = vld [vmem:[%s496_s27] sm:$0xff]  ;;  %s499_s27 = scalar_lea.vmem %s1890_s14, %s1893_s19 }
  0x11   : > { %v506_v4 = vpack.c.bf16 %v1727_v3, %v1727_v3  ;;  %v1396_v24 = vld [vmem:[%s499_s27] ss:$0 sm:$0xff]  ;;  %s1615_s27 = smov 16  }
  0x12   : > { %v582_v25 = vadd.f32 %v1396_v24, %v574_v23 }
  0x13   : > { %1460 = vmatmul.mubr.msk.bf16.vlgmr.msra.gmra.mrb[0].mxu0 %vm530_vm1, %v506_v4 }
  0x14   : > { %1471 = vmatprep.mubr.msk.bf16.mxu0 %vm1602_vm0, %v1601_v1 }
  0xe6   : > { %v568_v6 = vpop.f32.mrb[0].mxu0 }
  0xe7   : > { %v569_v7 = vadd.f32 %v1392_v5, %v568_v6  ;;  %v1461_v8 = vpop.f32.mrb[1].mxu0 }
  0xe8   : > { %v571_v9 = vpop.f32.mrb[2].mxu0 }
  0xe9   : > { %v1737_v10 = vpack.c.bf16 %v569_v7, %v569_v7  ;;  %v1462_v11 = vpop.f32.mrb[3].mxu0 }
  0xeb   : > { %695 = vrot.lane.b32.xlu1 %v1737_v10, %s1603_s30  ;;  %585 = vrot.lane.b32.xlu0 %v1737_v10, %s1604_s16  ;;  %s1610_s30 = smov 56   ;;  %s1611_s16 = smov 64  }
  0xef   : > { %807 = vrot.lane.b32.xlu1 %v1737_v10, %s1605_s17  ;;  %697 = vrot.lane.b32.xlu0 %v1737_v10, %s1606_s20  ;;  %s1612_s17 = smov 40   ;;  %s1613_s20 = smov 48  }
  0xf3   : > { %917 = vrot.lane.b32.xlu1 %v1737_v10, %s1607_s21  ;;  %805 = vrot.lane.b32.xlu0 %v1737_v10, %s1608_s22  ;;  %s1614_s21 = smov 8  }
  0xf7   : > { %915 = vrot.lane.b32.xlu0 %v1737_v10, %s1609_s23 }
 0x15d   : > { %v586_v12 = vpop.permute.xlu0 %585  ;;  %v696_v15 = vpop.permute.xlu1 %695 }
 0x15e   : > { %v592_v13 = vsel %vm587_vm2, %v586_v12, 0 }
 0x15f   : > { %1464 = vmatpush3.bf16.xpose.msra.mxu1 %v592_v13 }
 0x160   : > { %1475 = vmatprep.subr.bf16.mxu1 %v1601_v1 }
 0x161   : > { %v698_v14 = vpop.permute.xlu0 %697  ;;  %v808_v17 = vpop.permute.xlu1 %807 }
 0x162   : > { %v703_v16 = vsel %vm587_vm2, %v698_v14, 0  ;;  %v813_v18 = vsel %vm587_vm2, %v808_v17, 0 }
 0x165   : > { %v918_v19 = vpop.permute.xlu1 %917  ;;  %v806_v20 = vpop.permute.xlu0 %805 }
 0x166   : > { %1466 = vmatmul.mubr.msk.bf16.vlgmr.msra.gmra.mrb[0].mxu1 %vm587_vm2, %v1737_v10  ;;  %v923_v21 = vsel %vm587_vm2, %v918_v19, 0 }
 0x167   : > { %1476 = vmatpush3.bf16.xpose.msra.mxu1 %v703_v16  ;;  %1477 = vmatprep.mubr.msk.bf16.mxu1 %vm1602_vm0, %v1601_v1 }
 0x168   : > { %1487 = vmatprep.subr.bf16.mxu1 %v1601_v1 }
 0x169   : > { %v916_v22 = vpop.permute.xlu0 %915 }
 0x16e   : > { %1478 = vmatmul.mubr.msk.bf16.vlgmr.msra.gmra.mrb[4].mxu1 %vm587_vm2, %v696_v15 }
 0x16f   : > { %1488 = vmatpush3.bf16.xpose.msra.mxu1 %v813_v18  ;;  %1489 = vmatprep.mubr.msk.bf16.mxu1 %vm1602_vm0, %v1601_v1 }
 0x170   : > { %1499 = vmatprep.subr.bf16.mxu1 %v1601_v1 }
 0x176   : > { %1490 = vmatmul.mubr.msk.bf16.vlgmr.msra.gmra.mrb[8].mxu1 %vm587_vm2, %v806_v20 }
 0x177   : > { %1500 = vmatpush3.bf16.xpose.msra.mxu1 %v923_v21  ;;  %1501 = vmatprep.mubr.msk.bf16.mxu1 %vm1602_vm0, %v1601_v1 }
 0x178   : > { %1511 = vmatprep.subr.bf16.mxu1 %v1601_v1 }
 0x17e   : > { %1502 = vmatmul.mubr.msk.bf16.vlgmr.msra.gmra.mrb[12].mxu1 %vm587_vm2, %v916_v22 }
 0x17f   : > { %1515 = vmatprep.mubr.msk.bf16.mxu1 %vm1602_vm0, %v1601_v1 }
 0x239   : > { %v628_v26 = vpop.f32.mrb[0].mxu1 }
 0x23a   : > { %v629_v27 = vadd.f32 %v628_v26, %v582_v25  ;;  %v1467_v28 = vpop.f32.mrb[1].mxu1 }
 0x23b   : > { %v631_v29 = vpop.f32.mrb[2].mxu1 }
 0x23c   : > { %v1468_v30 = vpop.f32.mrb[3].mxu1  ;;  %v634_v31 = vsel %vm587_vm2, %v629_v27, -inf }
 0x23d   : > { %635 = vmax.xlane.f32.xlu1 %v634_v31 }
 0x241   : > { %v739_v32 = vpop.f32.mrb[4].mxu1 }
 0x242   : > { %v740_v33 = vadd.f32 %v739_v32, %v582_v25  ;;  %v1479_v34 = vpop.f32.mrb[5].mxu1 }
 0x243   : > { %v742_v35 = vpop.f32.mrb[6].mxu1 }
 0x244   : > { %v1480_v36 = vpop.f32.mrb[7].mxu1  ;;  %v745_v37 = vsel %vm587_vm2, %v740_v33, -inf }
 0x245   : > { %746 = vmax.xlane.f32.xlu0 %v745_v37 }
 0x249   : > { %v849_v38 = vpop.f32.mrb[8].mxu1 }
 0x24a   : > { %v850_v39 = vadd.f32 %v849_v38, %v582_v25  ;;  %v1491_v40 = vpop.f32.mrb[9].mxu1 }
 0x24b   : > { %v852_v41 = vpop.f32.mrb[10].mxu1  ;;  %v1565_v40 = vld [vmem:[%s1879_s3] sm:$0xff]  }
 0x24c   : > { %v1492_v42 = vpop.f32.mrb[11].mxu1  ;;  %v855_v43 = vsel %vm587_vm2, %v850_v39, -inf  ;;  %1512 = vmatpush3.bf16.msra.mxu1 %v1565_v40  ;;  %v1566_v41 = vld [vmem:[%s1879_s3 + $0x8] sm:$0xff]  }
 0x24d   : > { %856 = vmax.xlane.f32.xlu0 %v855_v43  ;;  %1513 = vmatprep.subr.bf16.mxu1 %v1601_v1 }
 0x250   : > { %1514 = vmatpush3.bf16.msra.mxu1 %v1566_v41 }
 0x251   : > { %v959_v44 = vpop.f32.mrb[12].mxu1  ;;  %1527 = vmatprep.subr.bf16.mxu1 %v1601_v1 }
 0x252   : > { %v960_v45 = vadd.f32 %v959_v44, %v582_v25  ;;  %v1503_v46 = vpop.f32.mrb[13].mxu1 }
 0x253   : > { %v962_v47 = vpop.f32.mrb[14].mxu1 }
 0x254   : > { %v1504_v48 = vpop.f32.mrb[15].mxu1  ;;  %v965_v49 = vsel %vm587_vm2, %v960_v45, -inf }
 0x255   : > { %966 = vmax.xlane.f32.xlu1 %v965_v49 }
 0x2ca   : > { %v636_v50 = vpop.xlane.xlu1 %635 }
 0x2cb   : > { %v637_v51 = vsub.f32 %v629_v27, %v636_v50 }
 0x2cd   : > { %v638_v52 = vmul.f32 1.442695, %v637_v51 }
 0x2cf   : > { %1573 = vpow2.f32 %v638_v52 }
 0x2d2   : > { %v747_v53 = vpop.xlane.xlu0 %746 }
 0x2d3   : > { %v748_v54 = vsub.f32 %v740_v33, %v747_v53 }
 0x2d5   : > { %v749_v55 = vmul.f32 1.442695, %v748_v54 }
 0x2d7   : > { %1575 = vpow2.f32 %v749_v55 }
 0x2d9   : > { %v1574_v56 = vpop.eup %1573 }
 0x2da   : > { %v857_v57 = vpop.xlane.xlu0 %856  ;;  %v640_v58 = vsel %vm587_vm2, %v1574_v56, 0.0 }
 0x2db   : > { %v858_v59 = vsub.f32 %v850_v39, %v857_v57  ;;  %641 = vadd.xlane.f32.xlu0 %v640_v58  ;;  %v1405_v57 = vld [vmem:[%s1880_s4] ss:$0 sm:$0xff] }
 0x2dd   : > { %v859_v60 = vmul.f32 1.442695, %v858_v59 }
 0x2df   : > { %1577 = vpow2.f32 %v859_v60 }
 0x2e1   : > { %v1576_v61 = vpop.eup %1575 }
 0x2e2   : > { %v751_v62 = vsel %vm587_vm2, %v1576_v61, 0.0  ;;  %v967_v2 = vpop.xlane.xlu1 %966 }
 0x2e3   : > { %752 = vadd.xlane.f32.xlu1 %v751_v62  ;;  %v968_v4 = vsub.f32 %v960_v45, %v967_v2 }
 0x2e5   : > { %v969_v5 = vmul.f32 1.442695, %v968_v4 }
 0x2e7   : > { %1579 = vpow2.f32 %v969_v5 }
 0x2e9   : > { %v1578_v63 = vpop.eup %1577 }
 0x2ea   : > { %v861_v0 = vsel %vm587_vm2, %v1578_v63, 0.0 }
 0x2eb   : > { %862 = vadd.xlane.f32.xlu0 %v861_v0 }
 0x2f1   : > { %v1580_v6 = vpop.eup %1579 }
 0x2f2   : > { %v971_v7 = vsel %vm587_vm2, %v1580_v6, 0.0 }
 0x2f4   : > { %757 = vrot.lane.b32.xlu1 %v1737_v10, %s1610_s30 }
 0x301   : > { %646 = vrot.lane.b32.xlu0 %v1737_v10, %s1611_s16 }
 0x305   : > { %977 = vrot.lane.b32.xlu0 %v1737_v10, %s1612_s17 }
 0x318   : > { %972 = vadd.xlane.f32.xlu1 %v971_v7 }
 0x329   : > { %867 = vrot.lane.b32.xlu1 %v1737_v10, %s1613_s20  ;;  %s503_s20 = scalar_lea.vmem %s1891_s15, %s1390_s24 }
 0x368   : > { %v642_v8 = vpop.xlane.xlu0 %641 }
 0x369   : > { %1581 = vrcp.f32 %v642_v8  ;;  %v1567_v8 = vld [vmem:[%s1883_s7] sm:$0xff]  }
 0x370   : > { %v753_v9 = vpop.xlane.xlu1 %752 }
 0x371   : > { %1583 = vrcp.f32 %v753_v9  ;;  %v1569_v9 = vld [vmem:[%s1885_s9] sm:$0xff]  }
 0x373   : > { %v1582_v11 = vpop.eup %1581 }
 0x374   : > { %v644_v13 = vmul.f32 %v1582_v11, %v1574_v56  ;;  %v758_v16 = vpop.permute.xlu1 %757  ;;  %v1570_v11 = vld [vmem:[%s1885_s9 + $0x8] sm:$0xff]  }
 0x375   : > { %v763_v19 = vsel %vm651_vm3, %v758_v16, 0  ;;  %v1409_v16 = vld [vmem:[%s1881_s5] ss:$0 sm:$0xff] }
 0x376   : > { %v645_v17 = vpack.c.bf16 %v644_v13, %v644_v13 }
 0x378   : > { %v863_v12 = vpop.xlane.xlu0 %862 }
 0x379   : > { %1585 = vrcp.f32 %v863_v12 }
 0x37b   : > { %v1584_v18 = vpop.eup %1583 }
 0x37c   : > { %v647_v14 = vpop.permute.xlu0 %646  ;;  %v755_v10 = vmul.f32 %v1584_v18, %v1576_v61  ;;  %v1410_v18 = vld [vmem:[%s1882_s6] ss:$0 sm:$0xff] }
 0x37d   : > { %v653_v15 = vsel %vm651_vm3, %v647_v14, 0 }
 0x37e   : > { %1470 = vmatpush3.bf16.msra.mxu0 %v653_v15  ;;  %v756_v20 = vpack.c.bf16 %v755_v10, %v755_v10 }
 0x37f   : > { %1481 = vmatprep.subr.bf16.mxu0 %v1601_v1 }
 0x380   : > { %v978_v26 = vpop.permute.xlu0 %977 }
 0x381   : > { %1472 = vmatmul.mubr.msk.bf16.vlgmr.msra.gmra.mrb[4].mxu0 %vm587_vm2, %v645_v17  ;;  %v983_v28 = vsel %vm651_vm3, %v978_v26, 0 }
 0x382   : > { %1482 = vmatpush3.bf16.msra.mxu0 %v763_v19  ;;  %1483 = vmatprep.mubr.msk.bf16.mxu0 %vm1602_vm0, %v1601_v1 }
 0x383   : > { %1493 = vmatprep.subr.bf16.mxu0 %v1601_v1  ;;  %v1586_v21 = vpop.eup %1585 }
 0x384   : > { %v865_v23 = vmul.f32 %v1586_v21, %v1578_v63  ;;  %v1571_v21 = vld [vmem:[%s1885_s9 + $0x10] sm:$0xff]  }
 0x386   : > { %v866_v27 = vpack.c.bf16 %v865_v23, %v865_v23  ;;  %v1411_v23 = vld [vmem:[%s1884_s8] ss:$0 sm:$0xff] }
 0x389   : > { %1484 = vmatmul.mubr.msk.bf16.vlgmr.msra.gmra.mrb[8].mxu0 %vm587_vm2, %v756_v20 }
 0x38a   : > { %1495 = vmatprep.mubr.msk.bf16.mxu0 %vm1602_vm0, %v1601_v1 }
 0x3a5   : > { %v973_v22 = vpop.xlane.xlu1 %972 }
 0x3a6   : > { %1587 = vrcp.f32 %v973_v22  ;;  %v1572_v22 = vld [vmem:[%s1885_s9 + $0x18] sm:$0xff]  }
 0x3a9   : > { %v868_v24 = vpop.permute.xlu1 %867 }
 0x3aa   : > { %v873_v25 = vsel %vm651_vm3, %v868_v24, 0 }
 0x3ab   : > { %1494 = vmatpush3.bf16.msra.mxu0 %v873_v25 }
 0x3ac   : > { %1505 = vmatprep.subr.bf16.mxu0 %v1601_v1 }
 0x3ae   : > { %1496 = vmatmul.mubr.msk.bf16.vlgmr.msra.gmra.mrb[12].mxu0 %vm587_vm2, %v866_v27 }
 0x3af   : > { %1506 = vmatpush3.bf16.msra.mxu0 %v983_v28  ;;  %1507 = vmatprep.mubr.msk.bf16.mxu0 %vm1602_vm0, %v1601_v1 }
 0x3b0   : > { %v1588_v29 = vpop.eup %1587  ;;  %1519 = vmatprep.subr.bf16.mxu0 %v1601_v1 }
 0x3b1   : > { %v975_v30 = vmul.f32 %v1588_v29, %v1580_v6 }
 0x3b3   : > { %v976_v31 = vpack.c.bf16 %v975_v30, %v975_v30 }
 0x3b6   : > { %1508 = vmatmul.mubr.msk.bf16.vlgmr.msra.gmra.mrb[16].mxu0 %vm587_vm2, %v976_v31 }
 0x3b7   : > { %1523 = vmatprep.mubr.msk.bf16.mxu0 %vm1602_vm0, %v1601_v1  ;;  %1520 = vmatpush3.bf16.msra.mxu0 %v1567_v8 }
 0x3b8   : > { %1521 = vmatprep.subr.bf16.mxu0 %v1601_v1 }
 0x454   : > { %v689_v32 = vpop.f32.mrb[4].mxu0 }
 0x455   : > { %v1473_v33 = vpop.f32.mrb[5].mxu0 }
 0x456   : > { %v692_v34 = vpop.f32.mrb[6].mxu0 }
 0x457   : > { %v1474_v35 = vpop.f32.mrb[7].mxu0 }
 0x45c   : > { %v799_v36 = vpop.f32.mrb[8].mxu0 }
 0x45d   : > { %1026 = vrot.lane.b32.xlu1 %v799_v36, %s1614_s21  ;;  %v1485_v37 = vpop.f32.mrb[9].mxu0 }
 0x45e   : > { %v802_v38 = vpop.f32.mrb[10].mxu0 }
 0x45f   : > { %v1486_v39 = vpop.f32.mrb[11].mxu0 }
 0x481   : > { %v909_v42 = vpop.f32.mrb[12].mxu0 }
 0x482   : > { %1030 = vrot.lane.b32.xlu0 %v909_v42, %s1615_s27  ;;  %v1497_v43 = vpop.f32.mrb[13].mxu0 }
 0x483   : > { %v912_v44 = vpop.f32.mrb[14].mxu0 }
 0x484   : > { %v1498_v45 = vpop.f32.mrb[15].mxu0 }
 0x489   : > { %v1019_v46 = vpop.f32.mrb[16].mxu0 }
 0x48a   : > { %1034 = vrot.lane.b32.xlu1 %v1019_v46, %s1616_s28  ;;  %v1509_v47 = vpop.f32.mrb[17].mxu0 }
 0x48b   : > { %v1022_v48 = vpop.f32.mrb[18].mxu0  ;;  %v1421_v47 = vld [vmem:[%s1887_s11] ss:$0 sm:$0xff] }
 0x48c   : > { %v1510_v49 = vpop.f32.mrb[19].mxu0 }
 0x48d   : > { %v1422_v49 = vld [vmem:[%s1888_s12] ss:$0 sm:$0xff] }
 0x4cf   : > { %v1027_v50 = vpop.permute.xlu1 %1026 }
 0x4d0   : > { %v1037_v52 = vsel %vm587_vm2, %v689_v32, %v1027_v50 }
 0x4f4   : > { %v1031_v51 = vpop.permute.xlu0 %1030 }
 0x4f5   : > { %v1039_v53 = vsel %vm1038_vm4, %v1037_v52, %v1031_v51 }
 0x4fc   : > { %v1035_v54 = vpop.permute.xlu1 %1034 }
 0x4fd   : > { %v1041_v55 = vsel %vm1040_vm5, %v1039_v53, %v1035_v54 }
 0x4fe   : > { %v1042_v56 = vpack.c.bf16 %v1041_v55, %v1041_v55 }
 0x500   : > { %1516 = vmatmul.mubr.msk.bf16.vlgmr.msra.gmra.mrb[16].mxu1 %vm530_vm1, %v1042_v56 }
 0x501   : > { %1535 = vmatprep.mubr.msk.bf16.mxu1 %vm1602_vm0, %v1601_v1  ;;  %1528 = vmatpush3.bf16.msra.mxu1 %v1569_v9 }
 0x502   : > { %1529 = vmatprep.subr.bf16.mxu1 %v1601_v1 }
 0x505   : > { %1530 = vmatpush3.bf16.msra.mxu1 %v1570_v11 }
 0x506   : > { %1531 = vmatprep.subr.bf16.mxu1 %v1601_v1 }
 0x509   : > { %1532 = vmatpush3.bf16.msra.mxu1 %v1571_v21 }
 0x50a   : > { %1533 = vmatprep.subr.bf16.mxu1 %v1601_v1  ;;  %v1415_v1 = vld [vmem:[%s1886_s10] ss:$0 sm:$0xff] }
 0x50d   : > { %1534 = vmatpush3.bf16.msra.mxu1 %v1572_v22 }
 0x5d3   : > { %v1103_v58 = vpop.f32.mrb[16].mxu1 }
 0x5d4   : > { %v1104_v59 = vadd.f32 %v1405_v57, %v1103_v58  ;;  %v1517_v60 = vpop.f32.mrb[17].mxu1 }
 0x5d5   : > { %v1106_v61 = vpop.f32.mrb[18].mxu1 }
 0x5d6   : > { %v1518_v62 = vpop.f32.mrb[19].mxu1  ;;  %v1109_v63 = vadd.f32 %v1104_v59, %v1727_v3  ;;  %v1568_v3 = vld [vmem:[%s1883_s7 + $0x8] sm:$0xff]  }
 0x5d7   : > { %1522 = vmatpush3.bf16.msra.mxu0 %v1568_v3 }
 0x5d8   : > { %v1112_v0 = vsel %vm530_vm1, %v1109_v63, 0.0 }
 0x5d9   : > { %1113 = vadd.xlane.f32.xlu0 %v1112_v0 }
 0x666   : > { %v1114_v2 = vpop.xlane.xlu0 %1113 }
 0x667   : > { %v1116_v4 = vmul.f32 0.03125, %v1114_v2 }
 0x669   : > { %v1117_v5 = vsub.f32 %v1109_v63, %v1116_v4 }
 0x66b   : > { %v1118_v6 = vmul.f32 %v1117_v5, %v1117_v5 }
 0x66d   : > { %v1119_v7 = vsel %vm530_vm1, %v1118_v6, 0.0 }
 0x66e   : > { %1120 = vadd.xlane.f32.xlu1 %v1119_v7 }
 0x6fb   : > { %v1121_v12 = vpop.xlane.xlu1 %1120 }
 0x6fc   : > { %v1122_v13 = vmul.f32 0.03125, %v1121_v12 }
 0x6fe   : > { %v1123_v14 = vadd.f32 1e-05, %v1122_v13 }
 0x700   : > { %1589 = vrsqrt.f32 %v1123_v14 }
 0x70a   : > { %v1590_v15 = vpop.eup %1589 }
 0x70b   : > { %v1125_v17 = vmul.f32 %v1590_v15, %v1117_v5 }
 0x70d   : > { %v1132_v19 = vmul.f32 %v1409_v16, %v1125_v17 }
 0x70f   : > { %v1139_v10 = vadd.f32 %v1410_v18, %v1132_v19 }
 0x711   : > { %v1140_v20 = vpack.c.bf16 %v1139_v10, %v1139_v10 }
 0x713   : > { %1524 = vmatmul.mubr.msk.bf16.vlgmr.msra.gmra.mrb[20].mxu0 %vm530_vm1, %v1140_v20 }
 0x7e6   : > { %v1201_v24 = vpop.f32.mrb[20].mxu0 }
 0x7e7   : > { %v1202_v25 = vadd.f32 %v1411_v23, %v1201_v24  ;;  %v1525_v26 = vpop.f32.mrb[21].mxu0 }
 0x7e8   : > { %v1204_v27 = vpop.f32.mrb[22].mxu0 }
 0x7e9   : > { %v1207_v28 = vmax.f32 %v1202_v25, 0.0  ;;  %v1526_v29 = vpop.f32.mrb[23].mxu0 }
 0x7eb   : > { %v1208_v30 = vpack.c.bf16 %v1207_v28, %v1207_v28 }
 0x7ed   : > { %1536 = vmatmul.mubr.msk.bf16.vlgmr.msra.gmra.mrb[20].mxu1 %vm1248_vm6, %v1208_v30 }
 0x8c0   : > { %v1286_v31 = vpop.f32.mrb[20].mxu1 }
 0x8c1   : > { %v1287_v32 = vadd.f32 %v1415_v1, %v1286_v31  ;;  %v1537_v33 = vpop.f32.mrb[21].mxu1 }
 0x8c2   : > { %v1289_v34 = vpop.f32.mrb[22].mxu1 }
 0x8c3   : > { %v1538_v35 = vpop.f32.mrb[23].mxu1  ;;  %v1292_v36 = vadd.f32 %v1287_v32, %v1139_v10 }
 0x8c5   : > { %v1295_v37 = vsel %vm530_vm1, %v1292_v36, 0.0 }
 0x8c6   : > { %1296 = vadd.xlane.f32.xlu0 %v1295_v37 }
 0x953   : > { %v1297_v38 = vpop.xlane.xlu0 %1296 }
 0x954   : > { %v1298_v39 = vmul.f32 0.03125, %v1297_v38 }
 0x956   : > { %v1299_v40 = vsub.f32 %v1292_v36, %v1298_v39 }
 0x958   : > { %v1300_v41 = vmul.f32 %v1299_v40, %v1299_v40 }
 0x95a   : > { %v1301_v42 = vsel %vm530_vm1, %v1300_v41, 0.0 }
 0x95b   : > { %1302 = vadd.xlane.f32.xlu0 %v1301_v42 }
 0x9e8   : > { %v1303_v43 = vpop.xlane.xlu0 %1302 }
 0x9e9   : > { %v1304_v44 = vmul.f32 0.03125, %v1303_v43 }
 0x9eb   : > { %v1305_v45 = vadd.f32 1e-05, %v1304_v44 }
 0x9ed   : > { %1591 = vrsqrt.f32 %v1305_v45 }
 0x9f7   : > { %v1592_v46 = vpop.eup %1591 }
 0x9f8   : > { %v1307_v48 = vmul.f32 %v1592_v46, %v1299_v40 }
 0x9fa   : > { %v1314_v50 = vmul.f32 %v1421_v47, %v1307_v48 }
 0x9fc   : > { %v1321_v51 = vadd.f32 %v1422_v49, %v1314_v50 }
 0x9fe   : > { %1322 = vst.msk [vmem:[%s503_s20] sm:$0xff] %vm530_vm1, %v1321_v51 }
 0x9ff PF: > { %s25_s18 = sadd.s32 1, %s1599_s18  }
 0xa00   : > { %p22_p4 = scmp.ge.s32.totalorder %s25_s18, 4  }
 0xa02   :  { %24 = sbr.rel (!%p22_p4) target bundleno = 1 (0x1), region = 113 }

// kernel: seq2seq_forward.9
= control target key start
LH: loop header
LB: loop body
LE: loop exit
PB: predicated region body
PF: predicated region fallthrough
CT: control target
= control target key end

     0   :  { %s2908_s29 = smov 0   ;;  %s3236_s0 = inlined_call_operand.vmem [shape: f32[2,8,32], index: 0, kind: input, shape index: {}]   ;;  %s3237_s1 = inlined_call_operand.vmem [shape: f32[2,8,32], index: 1, kind: input, shape index: {}]   ;;  %s3238_s2 = inlined_call_operand.vmem [shape: bf16[32,96], index: 2, kind: input, shape index: {}]   ;;  %s3239_s3 = inlined_call_operand.vmem [shape: f32[1,96], index: 3, kind: input, shape index: {}]   ;;  %s3240_s4 = inlined_call_operand.vmem [shape: bf16[32,32], index: 4, kind: input, shape index: {}]   ;;  %s3241_s5 = inlined_call_operand.vmem [shape: f32[1,32], index: 5, kind: input, shape index: {}]   ;;  %s3242_s6 = inlined_call_operand.vmem [shape: f32[1,32], index: 6, kind: input, shape index: {}]   ;;  %s3243_s7 = inlined_call_operand.vmem [shape: f32[1,32], index: 7, kind: input, shape index: {}]   ;;  %s3244_s8 = inlined_call_operand.vmem [shape: bf16[32,32], index: 8, kind: input, shape index: {}]   ;;  %s3245_s9 = inlined_call_operand.vmem [shape: f32[1,32], index: 9, kind: input, shape index: {}]   ;;  %s3246_s10 = inlined_call_operand.vmem [shape: bf16[32,64], index: 10, kind: input, shape index: {}]   ;;  %s3247_s11 = inlined_call_operand.vmem [shape: f32[1,64], index: 11, kind: input, shape index: {}]   ;;  %s3248_s12 = inlined_call_operand.vmem [shape: bf16[32,32], index: 12, kind: input, shape index: {}]   ;;  %s3249_s13 = inlined_call_operand.vmem [shape: f32[1,32], index: 13, kind: input, shape index: {}]   ;;  %s3250_s14 = inlined_call_operand.vmem [shape: f32[1,32], index: 14, kind: input, shape index: {}]   ;;  %s3251_s15 = inlined_call_operand.vmem [shape: f32[1,32], index: 15, kind: input, shape index: {}]   ;;  %s3252_s16 = inlined_call_operand.vmem [shape: bf16[32,64], index: 16, kind: input, shape index: {}]   ;;  %s3253_s17 = inlined_call_operand.vmem [shape: f32[1,64], index: 17, kind: input, shape index: {}]   ;;  %s3254_s18 = inlined_call_operand.vmem [shape: bf16[64,32], index: 18, kind: input, shape index: {}]   ;;  %s3255_s19 = inlined_call_operand.vmem [shape: f32[1,32], index: 19, kind: input, shape index: {}]   ;;  %s3256_s20 = inlined_call_operand.vmem [shape: f32[1,32], index: 20, kind: input, shape index: {}]   ;;  %s3257_s21 = inlined_call_operand.vmem [shape: f32[1,32], index: 21, kind: input, shape index: {}]   ;;  %s3258_s22 = inlined_call_operand.vmem [shape: f32[8,8], index: 22, kind: input, shape index: {}]   ;;  %s3259_s23 = inlined_call_operand.vmem [shape: f32[2,1,8], index: 23, kind: input, shape index: {}]   ;;  %s3260_s24 = inlined_call_operand.vmem [shape: f32[2,1,8], index: 24, kind: input, shape index: {}]   ;;  %s3261_s25 = inlined_call_operand.vmem [shape: f32[2,8,32], index: 25, kind: output, shape index: {}]  }
   0x1   :  { %3276 = sst [smem:[#allocation2_spill]] %s3236_s0 }
   0x2   :  { %3277 = sst [smem:[#allocation3_spill]] %s3237_s1 }
   0x3   :  { %3278 = sst [smem:[#allocation4_spill]] %s3238_s2 }
   0x4   :  { %3279 = sst [smem:[#allocation5_spill]] %s3239_s3 }
   0x5   :  { %3280 = sst [smem:[#allocation6_spill]] %s3240_s4 }
   0x6   :  { %3281 = sst [smem:[#allocation7_spill]] %s3241_s5 }
   0x7   :  { %3282 = sst [smem:[#allocation8_spill]] %s3242_s6 }
   0x8   :  { %3283 = sst [smem:[#allocation9_spill]] %s3243_s7 }
   0x9   :  { %3284 = sst [smem:[#allocation10_spill]] %s3244_s8 }
   0xa   :  { %3285 = sst [smem:[#allocation11_spill]] %s3245_s9 }
   0xb LB: > { %s2401_s2 = sadd.s32 4294967295, %s2760_s29   ;;  %p2405_p0 = scmp.ge.s32.totalorder %s2760_s29, 1  ;;  %s2760_s29 = sphi %s2908_s29, %s35_s29  }
   0xc   : > { %p711_p1 = scmp.lt.s32.totalorder %s2760_s29, 3 }
   0xe   : > { %p712_p2 = pnand %p2405_p0, %p711_p1 }
   0xf   : > { %s3286_s7 = sld [smem:[#allocation4_spill]] (!%p712_p2)  ;;  %v2762_v1 = vmov (!%p712_p2), 0.0   ;;  %vm2763_vm0 = vmmov (!%p712_p2), 0   ;;  %p787_p3 = scmp.lt.s32.totalorder (!%p712_p2), %s2401_s2, 1  ;;  %vm832_vm1 = vcmask (!%p712_p2), 261120   ;;  %vm889_vm2 = vcmask (!%p712_p2), 64512  }
  0x10   : > { %715 = sbr.rel (%p712_p2) target bundleno = 4316 (0x10dc), region = 120  ;;  %2520 = vmatprep.subr.bf16.mxu1 (!%p712_p2), %v2762_v1  ;;  %2534 = vmatprep.subr.bf16.mxu0 (!%p712_p2), %v2762_v1  ;;  %s3287_s4 = sld [smem:[#allocation2_spill]] (!%p712_p2)  ;;  %v876_v23 = vld [vmem:[%s3258_s22] sm:$0xff] (!%p712_p2)  ;;  %vm953_vm3 = vcmask (!%p712_p2), 1043456   ;;  %vm1340_vm4 = vcmask (!%p712_p2), 130048   ;;  %vm1342_vm5 = vcmask (!%p712_p2), 195584  }
  0x11   : > { %2524 = vmatprep.mubr.msk.bf16.mxu1 (!%p712_p2), %vm2763_vm0, %v2762_v1  ;;  %2536 = vmatprep.mubr.msk.bf16.mxu0 (!%p712_p2), %vm2763_vm0, %v2762_v1  ;;  %s3288_s0 = sld [smem:[#allocation5_spill]] (!%p712_p2)  ;;  %s2764_s6 = smov (!%p712_p2), 120   ;;  %vm2243_vm6 = vcmask (!%p712_p2), 523264  }
  0x12   : > { %s3271_s30 = smov (!%p712_p2), 96   ;;  %s3267_s3 = smov (!%p712_p2), 80  }
  0x13   : > { %s3265_s26 = smov (!%p712_p2), 88   ;;  %s3266_s8 = smov (!%p712_p2), 72  }
  0x14   : > { %s3274_s27 = smov (!%p712_p2), 112   ;;  %s2773_s9 = smov (!%p712_p2), 40  }
  0x15   : > { %v2700_v0 = vld [vmem:[%s3286_s7] sm:$0xff] (!%p712_p2)   ;;  %v2701_v2 = vld [vmem:[%s3286_s7 + $0x8] sm:$0xff] (!%p712_p2)  }
  0x16   : > { %2521 = vmatpush3.bf16.msra.mxu1 (!%p712_p2), %v2700_v0 }
  0x17   : > { %2522 = vmatprep.subr.bf16.mxu1 %v2762_v1  ;;  %s3306_s2 = smov (!%p787_p3, %s2401_s2), 1  ;;  %v2409_v5 = vld [vmem:[%s3288_s0] ss:$0 sm:$0xff]  ;;  %s3270_s0 = smov 8  }
  0x18   : > { %s2932_s1 = sshll.u32 %s3306_s2, 3  ;;  %s797_s5 = scalar_lea.vmem %s3259_s23, %s3306_s2 }
  0x19   : > { %s790_s28 = scalar_lea.vmem %s3287_s4, %s2932_s1  ;;  %s3272_s4 = smov 104   ;;  %v2413_v24 = vld [vmem:[%s797_s5] ss:$0 sm:$0xff] }
  0x1a   : > { %2523 = vmatpush3.bf16.msra.mxu1 %v2701_v2  ;;  %v2939_v3 = vld [vmem:[%s790_s28] sm:$0xff]  ;;  %v884_v25 = vadd.f32 %v2413_v24, %v876_v23  ;;  %s2772_s28 = smov 64   ;;  %s2774_s5 = smov 48  }
  0x1b   : > { %2528 = vmatprep.subr.bf16.mxu1 %v2762_v1  ;;  %v808_v4 = vpack.c.bf16 %v2939_v3, %v2939_v3 }
  0x1d   : > { %2525 = vmatmul.mubr.msk.bf16.vlgmr.msra.gmra.mrb[0].mxu1 %vm832_vm1, %v808_v4 }
  0x1e   : > { %2530 = vmatprep.mubr.msk.bf16.mxu1 %vm2763_vm0, %v2762_v1 }
  0xf0   : > { %v870_v6 = vpop.f32.mrb[0].mxu1 }
  0xf1   : > { %v871_v7 = vadd.f32 %v2409_v5, %v870_v6  ;;  %v2526_v8 = vpop.f32.mrb[1].mxu1 }
  0xf2   : > { %v873_v9 = vpop.f32.mrb[2].mxu1 }
  0xf3   : > { %v2949_v10 = vpack.c.bf16 %v871_v7, %v871_v7  ;;  %v2527_v11 = vpop.f32.mrb[3].mxu1 }
  0xf5   : > { %997 = vrot.lane.b32.xlu1 %v2949_v10, %s2764_s6  ;;  %887 = vrot.lane.b32.xlu0 %v2949_v10, %s3271_s30  ;;  %s3291_s30 = sld [smem:[#allocation3_spill]] }
  0xf9   : > { %1109 = vrot.lane.b32.xlu1 %v2949_v10, %s3267_s3  ;;  %999 = vrot.lane.b32.xlu0 %v2949_v10, %s3265_s26  ;;  %s2771_s26 = smov 56   ;;  %s3269_s3 = smov 16  }
  0xfd   : > { %1219 = vrot.lane.b32.xlu1 %v2949_v10, %s3266_s8  ;;  %1107 = vrot.lane.b32.xlu0 %v2949_v10, %s3274_s27  ;;  %s3292_s27 = sld [smem:[#allocation10_spill]]  ;;  %s3297_s8 = sld [smem:[#allocation11_spill]] }
 0x101   : > { %1217 = vrot.lane.b32.xlu0 %v2949_v10, %s3272_s4  ;;  %s794_s4 = scalar_lea.vmem %s3291_s30, %s2932_s1  ;;  %s3295_s30 = smov 112  }
 0x167   : > { %v888_v12 = vpop.permute.xlu0 %887  ;;  %v998_v15 = vpop.permute.xlu1 %997 }
 0x168   : > { %v894_v13 = vsel %vm889_vm2, %v888_v12, 0 }
 0x169   : > { %2529 = vmatpush3.bf16.xpose.msra.mxu1 %v894_v13 }
 0x16a   : > { %2540 = vmatprep.subr.bf16.mxu1 %v2762_v1 }
 0x16b   : > { %v1000_v14 = vpop.permute.xlu0 %999  ;;  %v1110_v17 = vpop.permute.xlu1 %1109 }
 0x16c   : > { %v1005_v16 = vsel %vm889_vm2, %v1000_v14, 0  ;;  %v1115_v18 = vsel %vm889_vm2, %v1110_v17, 0 }
 0x16f   : > { %v1220_v19 = vpop.permute.xlu1 %1219  ;;  %v1108_v20 = vpop.permute.xlu0 %1107 }
 0x170   : > { %2531 = vmatmul.mubr.msk.bf16.vlgmr.msra.gmra.mrb[4].mxu1 %vm889_vm2, %v2949_v10  ;;  %v1225_v21 = vsel %vm889_vm2, %v1220_v19, 0 }
 0x171   : > { %2541 = vmatpush3.bf16.xpose.msra.mxu1 %v1005_v16  ;;  %2542 = vmatprep.mubr.msk.bf16.mxu1 %vm2763_vm0, %v2762_v1 }
 0x172   : > { %2552 = vmatprep.subr.bf16.mxu1 %v2762_v1 }
 0x173   : > { %v1218_v22 = vpop.permute.xlu0 %1217 }
 0x178   : > { %2543 = vmatmul.mubr.msk.bf16.vlgmr.msra.gmra.mrb[8].mxu1 %vm889_vm2, %v998_v15 }
 0x179   : > { %2553 = vmatpush3.bf16.xpose.msra.mxu1 %v1115_v18  ;;  %2554 = vmatprep.mubr.msk.bf16.mxu1 %vm2763_vm0, %v2762_v1 }
 0x17a   : > { %2564 = vmatprep.subr.bf16.mxu1 %v2762_v1 }
 0x180   : > { %2555 = vmatmul.mubr.msk.bf16.vlgmr.msra.gmra.mrb[12].mxu1 %vm889_vm2, %v1108_v20 }
 0x181   : > { %2565 = vmatpush3.bf16.xpose.msra.mxu1 %v1225_v21  ;;  %2566 = vmatprep.mubr.msk.bf16.mxu1 %vm2763_vm0, %v2762_v1 }
 0x182   : > { %2576 = vmatprep.subr.bf16.mxu1 %v2762_v1 }
 0x188   : > { %2567 = vmatmul.mubr.msk.bf16.vlgmr.msra.gmra.mrb[16].mxu1 %vm889_vm2, %v1218_v22 }
 0x189   : > { %2580 = vmatprep.mubr.msk.bf16.mxu1 %vm2763_vm0, %v2762_v1 }
 0x243   : > { %v930_v26 = vpop.f32.mrb[4].mxu1 }
 0x244   : > { %v931_v27 = vadd.f32 %v930_v26, %v884_v25  ;;  %v2532_v28 = vpop.f32.mrb[5].mxu1 }
 0x245   : > { %v933_v29 = vpop.f32.mrb[6].mxu1 }
 0x246   : > { %v2533_v30 = vpop.f32.mrb[7].mxu1  ;;  %v936_v31 = vsel %vm889_vm2, %v931_v27, -inf }
 0x247   : > { %937 = vmax.xlane.f32.xlu1 %v936_v31 }
 0x24b   : > { %v1041_v32 = vpop.f32.mrb[8].mxu1 }
 0x24c   : > { %v1042_v33 = vadd.f32 %v1041_v32, %v884_v25  ;;  %v2544_v34 = vpop.f32.mrb[9].mxu1 }
 0x24d   : > { %v1044_v35 = vpop.f32.mrb[10].mxu1 }
 0x24e   : > { %v2545_v36 = vpop.f32.mrb[11].mxu1  ;;  %v1047_v37 = vsel %vm889_vm2, %v1042_v33, -inf }
 0x24f   : > { %1048 = vmax.xlane.f32.xlu0 %v1047_v37 }
 0x253   : > { %v1151_v38 = vpop.f32.mrb[12].mxu1 }
 0x254   : > { %v1152_v39 = vadd.f32 %v1151_v38, %v884_v25  ;;  %v2556_v40 = vpop.f32.mrb[13].mxu1 }
 0x255   : > { %v1154_v41 = vpop.f32.mrb[14].mxu1 }
 0x256   : > { %v2557_v42 = vpop.f32.mrb[15].mxu1  ;;  %v1157_v43 = vsel %vm889_vm2, %v1152_v39, -inf }
 0x257   : > { %1158 = vmax.xlane.f32.xlu0 %v1157_v43 }
 0x25b   : > { %v1261_v44 = vpop.f32.mrb[16].mxu1 }
 0x25c   : > { %v1262_v45 = vadd.f32 %v1261_v44, %v884_v25  ;;  %v2568_v46 = vpop.f32.mrb[17].mxu1 }
 0x25d   : > { %v1264_v47 = vpop.f32.mrb[18].mxu1 }
 0x25e   : > { %v2569_v48 = vpop.f32.mrb[19].mxu1  ;;  %v1267_v49 = vsel %vm889_vm2, %v1262_v45, -inf }
 0x25f   : > { %1268 = vmax.xlane.f32.xlu1 %v1267_v49 }
 0x2d4   : > { %v938_v50 = vpop.xlane.xlu1 %937 }
 0x2d5   : > { %v939_v51 = vsub.f32 %v931_v27, %v938_v50 }
 0x2d7   : > { %v940_v52 = vmul.f32 1.442695, %v939_v51 }
 0x2d9   : > { %2716 = vpow2.f32 %v940_v52 }
 0x2dc   : > { %v1049_v53 = vpop.xlane.xlu0 %1048 }
 0x2dd   : > { %v1050_v54 = vsub.f32 %v1042_v33, %v1049_v53 }
 0x2df   : > { %v1051_v55 = vmul.f32 1.442695, %v1050_v54 }
 0x2e1   : > { %2718 = vpow2.f32 %v1051_v55 }
 0x2e3   : > { %v2717_v56 = vpop.eup %2716 }
 0x2e4   : > { %v1159_v57 = vpop.xlane.xlu0 %1158  ;;  %v942_v58 = vsel %vm889_vm2, %v2717_v56, 0.0 }
 0x2e5   : > { %v1160_v59 = vsub.f32 %v1152_v39, %v1159_v57  ;;  %943 = vadd.xlane.f32.xlu0 %v942_v58 }
 0x2e7   : > { %v1161_v60 = vmul.f32 1.442695, %v1160_v59 }
 0x2e9   : > { %2720 = vpow2.f32 %v1161_v60 }
 0x2eb   : > { %v2719_v61 = vpop.eup %2718 }
 0x2ec   : > { %v1053_v62 = vsel %vm889_vm2, %v2719_v61, 0.0  ;;  %v1269_v2 = vpop.xlane.xlu1 %1268 }
 0x2ed   : > { %1054 = vadd.xlane.f32.xlu1 %v1053_v62  ;;  %v1270_v4 = vsub.f32 %v1262_v45, %v1269_v2 }
 0x2ef   : > { %v1271_v5 = vmul.f32 1.442695, %v1270_v4 }
 0x2f1   : > { %2722 = vpow2.f32 %v1271_v5 }
 0x2f3   : > { %v2721_v63 = vpop.eup %2720 }
 0x2f4   : > { %v1163_v0 = vsel %vm889_vm2, %v2721_v63, 0.0 }
 0x2f5   : > { %1164 = vadd.xlane.f32.xlu0 %v1163_v0 }
 0x2fb   : > { %v2723_v6 = vpop.eup %2722 }
 0x2fc   : > { %v1273_v7 = vsel %vm889_vm2, %v2723_v6, 0.0 }
 0x2fe   : > { %1059 = vrot.lane.b32.xlu1 %v2949_v10, %s2771_s26  ;;  %s3268_s26 = smov 24  }
 0x30b   : > { %948 = vrot.lane.b32.xlu0 %v2949_v10, %s2772_s28  ;;  %s3294_s28 = sld [smem:[#allocation9_spill]] }
 0x30f   : > { %1279 = vrot.lane.b32.xlu0 %v2949_v10, %s2773_s9  ;;  %s3289_s9 = sld [smem:[#allocation6_spill]] }
 0x315   : > { %v2702_v40 = vld [vmem:[%s3289_s9] sm:$0xff]   ;;  %v2703_v41 = vld [vmem:[%s3289_s9 + $0x8] sm:$0xff]  }
 0x316   : > { %2577 = vmatpush3.bf16.msra.mxu1 %v2702_v40 }
 0x317   : > { %2578 = vmatprep.subr.bf16.mxu1 %v2762_v1 }
 0x31a   : > { %2579 = vmatpush3.bf16.msra.mxu1 %v2703_v41 }
 0x31b   : > { %2592 = vmatprep.subr.bf16.mxu1 %v2762_v1 }
 0x322   : > { %1274 = vadd.xlane.f32.xlu1 %v1273_v7 }
 0x333   : > { %1169 = vrot.lane.b32.xlu1 %v2949_v10, %s2774_s5  ;;  %s3290_s5 = sld [smem:[#allocation7_spill]] }
 0x339   : > { %v2422_v57 = vld [vmem:[%s3290_s5] ss:$0 sm:$0xff] }
 0x372   : > { %v944_v8 = vpop.xlane.xlu0 %943 }
 0x373   : > { %2724 = vrcp.f32 %v944_v8  ;;  %v2704_v8 = vld [vmem:[%s3246_s10] sm:$0xff]  }
 0x37a   : > { %v1055_v9 = vpop.xlane.xlu1 %1054 }
 0x37b   : > { %2726 = vrcp.f32 %v1055_v9  ;;  %v807_v9 = vld [vmem:[%s794_s4] sm:$0xff]  ;;  %s3296_s4 = smov 104  }
 0x37d   : > { %v2725_v11 = vpop.eup %2724 }
 0x37e   : > { %v946_v13 = vmul.f32 %v2725_v11, %v2717_v56  ;;  %v1060_v16 = vpop.permute.xlu1 %1059  ;;  %v1509_v11 = vpack.c.bf16 %v807_v9, %v807_v9 }
 0x37f   : > { %v1065_v19 = vsel %vm953_vm3, %v1060_v16, 0 }
 0x380   : > { %v947_v17 = vpack.c.bf16 %v946_v13, %v946_v13  ;;  %v2707_v13 = vld [vmem:[%s3292_s27 + $0x8] sm:$0xff]  }
 0x382   : > { %v1165_v12 = vpop.xlane.xlu0 %1164 }
 0x383   : > { %2728 = vrcp.f32 %v1165_v12  ;;  %v2706_v12 = vld [vmem:[%s3292_s27] sm:$0xff]  }
 0x385   : > { %v2727_v18 = vpop.eup %2726 }
 0x386   : > { %v949_v14 = vpop.permute.xlu0 %948  ;;  %v1057_v10 = vmul.f32 %v2727_v18, %v2719_v61 }
 0x387   : > { %v955_v15 = vsel %vm953_vm3, %v949_v14, 0 }
 0x388   : > { %2535 = vmatpush3.bf16.msra.mxu0 %v955_v15  ;;  %v1058_v20 = vpack.c.bf16 %v1057_v10, %v1057_v10  ;;  %v2427_v10 = vld [vmem:[%s3294_s28] ss:$0 sm:$0xff] }
 0x389   : > { %2546 = vmatprep.subr.bf16.mxu0 %v2762_v1 }
 0x38a   : > { %v1280_v26 = vpop.permute.xlu0 %1279 }
 0x38b   : > { %2537 = vmatmul.mubr.msk.bf16.vlgmr.msra.gmra.mrb[0].mxu0 %vm889_vm2, %v947_v17  ;;  %v1285_v28 = vsel %vm953_vm3, %v1280_v26, 0 }
 0x38c   : > { %2547 = vmatpush3.bf16.msra.mxu0 %v1065_v19  ;;  %2548 = vmatprep.mubr.msk.bf16.mxu0 %vm2763_vm0, %v2762_v1 }
 0x38d   : > { %2558 = vmatprep.subr.bf16.mxu0 %v2762_v1  ;;  %v2729_v21 = vpop.eup %2728 }
 0x38e   : > { %v1167_v23 = vmul.f32 %v2729_v21, %v2721_v63 }
 0x390   : > { %v1168_v27 = vpack.c.bf16 %v1167_v23, %v1167_v23  ;;  %v2432_v23 = vld [vmem:[%s3247_s11] ss:$0 sm:$0xff] }
 0x393   : > { %2549 = vmatmul.mubr.msk.bf16.vlgmr.msra.gmra.mrb[4].mxu0 %vm889_vm2, %v1058_v20 }
 0x394   : > { %2560 = vmatprep.mubr.msk.bf16.mxu0 %vm2763_vm0, %v2762_v1 }
 0x3af   : > { %v1275_v22 = vpop.xlane.xlu1 %1274 }
 0x3b0   : > { %2730 = vrcp.f32 %v1275_v22 }
 0x3b3   : > { %v1170_v24 = vpop.permute.xlu1 %1169 }
 0x3b4   : > { %v1175_v25 = vsel %vm953_vm3, %v1170_v24, 0 }
 0x3b5   : > { %2559 = vmatpush3.bf16.msra.mxu0 %v1175_v25 }
 0x3b6   : > { %2570 = vmatprep.subr.bf16.mxu0 %v2762_v1 }
 0x3b8   : > { %2561 = vmatmul.mubr.msk.bf16.vlgmr.msra.gmra.mrb[8].mxu0 %vm889_vm2, %v1168_v27 }
 0x3b9   : > { %2571 = vmatpush3.bf16.msra.mxu0 %v1285_v28  ;;  %2572 = vmatprep.mubr.msk.bf16.mxu0 %vm2763_vm0, %v2762_v1 }
 0x3ba   : > { %v2731_v29 = vpop.eup %2730  ;;  %2584 = vmatprep.subr.bf16.mxu0 %v2762_v1 }
 0x3bb   : > { %v1277_v30 = vmul.f32 %v2731_v29, %v2723_v6 }
 0x3bd   : > { %v1278_v31 = vpack.c.bf16 %v1277_v30, %v1277_v30 }
 0x3c0   : > { %2573 = vmatmul.mubr.msk.bf16.vlgmr.msra.gmra.mrb[12].mxu0 %vm889_vm2, %v1278_v31  ;;  %v2428_v31 = vld [vmem:[%s3297_s8] ss:$0 sm:$0xff]  ;;  %s3302_s8 = smov 8  }
 0x3c1   : > { %2588 = vmatprep.mubr.msk.bf16.mxu0 %vm2763_vm0, %v2762_v1  ;;  %2585 = vmatpush3.bf16.msra.mxu0 %v2706_v12 }
 0x3c2   : > { %2586 = vmatprep.subr.bf16.mxu0 %v2762_v1 }
 0x3c5   : > { %2587 = vmatpush3.bf16.msra.mxu0 %v2707_v13 }
 0x3c6   : > { %2600 = vmatprep.subr.bf16.mxu0 %v2762_v1 }
 0x45e   : > { %v991_v32 = vpop.f32.mrb[0].mxu0 }
 0x45f   : > { %v2538_v33 = vpop.f32.mrb[1].mxu0 }
 0x460   : > { %v994_v34 = vpop.f32.mrb[2].mxu0 }
 0x461   : > { %v2539_v35 = vpop.f32.mrb[3].mxu0 }
 0x466   : > { %v1101_v36 = vpop.f32.mrb[4].mxu0 }
 0x467   : > { %1328 = vrot.lane.b32.xlu1 %v1101_v36, %s3270_s0  ;;  %v2550_v37 = vpop.f32.mrb[5].mxu0  ;;  %s3293_s0 = sld [smem:[#allocation8_spill]] }
 0x468   : > { %v1104_v38 = vpop.f32.mrb[6].mxu0 }
 0x469   : > { %v2551_v39 = vpop.f32.mrb[7].mxu0 }
 0x46d   : > { %v2426_v18 = vld [vmem:[%s3293_s0] ss:$0 sm:$0xff] }
 0x48b   : > { %v1211_v42 = vpop.f32.mrb[8].mxu0 }
 0x48c   : > { %1332 = vrot.lane.b32.xlu0 %v1211_v42, %s3269_s3  ;;  %v2562_v43 = vpop.f32.mrb[9].mxu0  ;;  %s3299_s3 = smov 80  }
 0x48d   : > { %v1214_v44 = vpop.f32.mrb[10].mxu0 }
 0x48e   : > { %v2563_v45 = vpop.f32.mrb[11].mxu0 }
 0x493   : > { %v1321_v46 = vpop.f32.mrb[12].mxu0 }
 0x494   : > { %1336 = vrot.lane.b32.xlu1 %v1321_v46, %s3268_s26  ;;  %v2574_v47 = vpop.f32.mrb[13].mxu0  ;;  %s800_s26 = scalar_lea.vmem %s3260_s24, %s3306_s2  ;;  %s3298_s2 = smov 96  }
 0x495   : > { %v1324_v48 = vpop.f32.mrb[14].mxu0  ;;  %v2436_v47 = vld [vmem:[%s800_s26] ss:$0 sm:$0xff]  ;;  %s3303_s26 = smov 16  }
 0x496   : > { %v2575_v49 = vpop.f32.mrb[15].mxu0 }
 0x4d9   : > { %v1329_v50 = vpop.permute.xlu1 %1328 }
 0x4da   : > { %v1339_v52 = vsel %vm889_vm2, %v991_v32, %v1329_v50 }
 0x4fe   : > { %v1333_v51 = vpop.permute.xlu0 %1332 }
 0x4ff   : > { %v1341_v53 = vsel %vm1340_vm4, %v1339_v52, %v1333_v51 }
 0x506   : > { %v1337_v54 = vpop.permute.xlu1 %1336 }
 0x507   : > { %v1343_v55 = vsel %vm1342_vm5, %v1341_v53, %v1337_v54 }
 0x508   : > { %v1344_v56 = vpack.c.bf16 %v1343_v55, %v1343_v55 }
 0x50a   : > { %2581 = vmatmul.mubr.msk.bf16.vlgmr.msra.gmra.mrb[20].mxu1 %vm832_vm1, %v1344_v56 }
 0x50b   : > { %2596 = vmatprep.mubr.msk.bf16.mxu1 %vm2763_vm0, %v2762_v1  ;;  %2593 = vmatpush3.bf16.msra.mxu1 %v2704_v8 }
 0x50c   : > { %2594 = vmatprep.subr.bf16.mxu1 %v2762_v1 }
 0x5dd   : > { %v1405_v58 = vpop.f32.mrb[20].mxu1 }
 0x5de   : > { %v1406_v59 = vadd.f32 %v2422_v57, %v1405_v58  ;;  %v2582_v60 = vpop.f32.mrb[21].mxu1 }
 0x5df   : > { %v1408_v61 = vpop.f32.mrb[22].mxu1 }
 0x5e0   : > { %v2583_v62 = vpop.f32.mrb[23].mxu1  ;;  %v1411_v63 = vadd.f32 %v1406_v59, %v2939_v3  ;;  %v2705_v3 = vld [vmem:[%s3246_s10 + $0x8] sm:$0xff]  }
 0x5e1   : > { %2595 = vmatpush3.bf16.msra.mxu1 %v2705_v3 }
 0x5e2   : > { %v1414_v0 = vsel %vm832_vm1, %v1411_v63, 0.0  ;;  %2606 = vmatprep.subr.bf16.mxu1 %v2762_v1 }
 0x5e3   : > { %1415 = vadd.xlane.f32.xlu0 %v1414_v0 }
 0x5e4   : > { %2597 = vmatmul.mubr.msk.bf16.vlgmr.msra.gmra.mrb[24].mxu1 %vm832_vm1, %v1509_v11 }
 0x5e5   : > { %2608 = vmatprep.mubr.msk.bf16.mxu1 %vm2763_vm0, %v2762_v1 }
 0x670   : > { %v1416_v2 = vpop.xlane.xlu0 %1415 }
 0x671   : > { %v1418_v4 = vmul.f32 0.03125, %v1416_v2 }
 0x673   : > { %v1419_v5 = vsub.f32 %v1411_v63, %v1418_v4 }
 0x675   : > { %v1420_v6 = vmul.f32 %v1419_v5, %v1419_v5 }
 0x677   : > { %v1421_v7 = vsel %vm832_vm1, %v1420_v6, 0.0 }
 0x678   : > { %1422 = vadd.xlane.f32.xlu1 %v1421_v7 }
 0x6b7   : > { %v1570_v24 = vpop.f32.mrb[24].mxu1 }
 0x6b8   : > { %v1571_v25 = vadd.f32 %v2432_v23, %v1570_v24  ;;  %v2598_v26 = vpop.f32.mrb[25].mxu1 }
 0x6b9   : > { %v1573_v27 = vpop.f32.mrb[26].mxu1 }
 0x6ba   : > { %v3087_v28 = vpack.c.bf16 %v1571_v25, %v1571_v25  ;;  %v2599_v29 = vpop.f32.mrb[27].mxu1 }
 0x6bc   : > { %1695 = vrot.lane.b32.xlu0 %v3087_v28, %s2764_s6  ;;  %v1589_v30 = vsel %vm889_vm2, %v3087_v28, 0 }
 0x6c0   : > { %1805 = vrot.lane.b32.xlu0 %v3087_v28, %s3295_s30 }
 0x6c4   : > { %1915 = vrot.lane.b32.xlu0 %v3087_v28, %s3296_s4 }
 0x705   : > { %v1423_v14 = vpop.xlane.xlu1 %1422 }
 0x706   : > { %v1424_v15 = vmul.f32 0.03125, %v1423_v14 }
 0x708   : > { %v1425_v16 = vadd.f32 1e-05, %v1424_v15 }
 0x70a   : > { %2732 = vrsqrt.f32 %v1425_v16 }
 0x714   : > { %v2733_v17 = vpop.eup %2732 }
 0x715   : > { %v1427_v19 = vmul.f32 %v2733_v17, %v1419_v5 }
 0x717   : > { %v1434_v20 = vmul.f32 %v2426_v18, %v1427_v19 }
 0x719   : > { %v3077_v21 = vadd.f32 %v2427_v10, %v1434_v20 }
 0x71b   : > { %v1442_v22 = vpack.c.bf16 %v3077_v21, %v3077_v21 }
 0x71d   : > { %2589 = vmatmul.mubr.msk.bf16.vlgmr.msra.gmra.mrb[16].mxu0 %vm832_vm1, %v1442_v22 }
 0x71e   : > { %2602 = vmatprep.mubr.msk.bf16.mxu0 %vm2763_vm0, %v2762_v1  ;;  %2601 = vmatpush3.bf16.xpose.msra.mxu0 %v1589_v30 }
 0x71f   : > { %2612 = vmatprep.subr.bf16.mxu0 %v2762_v1 }
 0x72e   : > { %v1696_v36 = vpop.permute.xlu0 %1695 }
 0x72f   : > { %v1701_v39 = vsel %vm889_vm2, %v1696_v36, 0 }
 0x732   : > { %v1806_v40 = vpop.permute.xlu0 %1805 }
 0x733   : > { %v1811_v42 = vsel %vm889_vm2, %v1806_v40, 0 }
 0x736   : > { %v1916_v43 = vpop.permute.xlu0 %1915 }
 0x737   : > { %v1921_v45 = vsel %vm889_vm2, %v1916_v43, 0 }
 0x7f0   : > { %v1503_v32 = vpop.f32.mrb[16].mxu0 }
 0x7f1   : > { %v1504_v33 = vadd.f32 %v2428_v31, %v1503_v32  ;;  %v2590_v34 = vpop.f32.mrb[17].mxu0 }
 0x7f2   : > { %v1506_v35 = vpop.f32.mrb[18].mxu0 }
 0x7f3   : > { %v1577_v37 = vpack.c.bf16 %v1504_v33, %v1504_v33  ;;  %v2591_v38 = vpop.f32.mrb[19].mxu0 }
 0x7f5   : > { %1693 = vrot.lane.b32.xlu1 %v1577_v37, %s2764_s6  ;;  %2603 = vmatmul.mubr.msk.bf16.vlgmr.msra.gmra.mrb[20].mxu0 %vm889_vm2, %v1577_v37 }
 0x7f6   : > { %2613 = vmatpush3.bf16.xpose.msra.mxu0 %v1701_v39  ;;  %2614 = vmatprep.mubr.msk.bf16.mxu0 %vm2763_vm0, %v2762_v1 }
 0x7f7   : > { %2624 = vmatprep.subr.bf16.mxu0 %v2762_v1 }
 0x7f9   : > { %1803 = vrot.lane.b32.xlu1 %v1577_v37, %s3295_s30  ;;  %s3300_s30 = smov 72  }
 0x7fd   : > { %1913 = vrot.lane.b32.xlu1 %v1577_v37, %s3296_s4  ;;  %s3301_s4 = smov 88  }
 0x867   : > { %v1694_v41 = vpop.permute.xlu1 %1693 }
 0x868   : > { %2615 = vmatmul.mubr.msk.bf16.vlgmr.msra.gmra.mrb[24].mxu0 %vm889_vm2, %v1694_v41 }
 0x869   : > { %2625 = vmatpush3.bf16.xpose.msra.mxu0 %v1811_v42  ;;  %2626 = vmatprep.mubr.msk.bf16.mxu0 %vm2763_vm0, %v2762_v1 }
 0x86a   : > { %2636 = vmatprep.subr.bf16.mxu0 %v2762_v1 }
 0x86b   : > { %v1804_v44 = vpop.permute.xlu1 %1803 }
 0x86f   : > { %v1914_v46 = vpop.permute.xlu1 %1913 }
 0x870   : > { %2627 = vmatmul.mubr.msk.bf16.vlgmr.msra.gmra.mrb[28].mxu0 %vm889_vm2, %v1804_v44 }
 0x871   : > { %2637 = vmatpush3.bf16.xpose.msra.mxu0 %v1921_v45  ;;  %2638 = vmatprep.mubr.msk.bf16.mxu0 %vm2763_vm0, %v2762_v1 }
 0x872   : > { %2648 = vmatprep.subr.bf16.mxu0 %v2762_v1 }
 0x878   : > { %2639 = vmatmul.mubr.msk.bf16.vlgmr.msra.gmra.mrb[32].mxu0 %vm889_vm2, %v1914_v46 }
 0x879   : > { %2652 = vmatprep.mubr.msk.bf16.mxu0 %vm2763_vm0, %v2762_v1 }
 0x8c8   : > { %v1625_v48 = vpop.f32.mrb[20].mxu0 }
 0x8c9   : > { %v1626_v49 = vadd.f32 %v2436_v47, %v1625_v48  ;;  %v2604_v50 = vpop.f32.mrb[21].mxu0 }
 0x8ca   : > { %v1628_v51 = vpop.f32.mrb[22].mxu0 }
 0x8cb   : > { %v2605_v52 = vpop.f32.mrb[23].mxu0  ;;  %v1631_v53 = vsel %vm889_vm2, %v1626_v49, -inf }
 0x8cc   : > { %1632 = vmax.xlane.f32.xlu0 %v1631_v53 }
 0x93b   : > { %v1737_v54 = vpop.f32.mrb[24].mxu0 }
 0x93c   : > { %v1738_v55 = vadd.f32 %v2436_v47, %v1737_v54  ;;  %v2616_v56 = vpop.f32.mrb[25].mxu0 }
 0x93d   : > { %v1740_v57 = vpop.f32.mrb[26].mxu0 }
 0x93e   : > { %v2617_v58 = vpop.f32.mrb[27].mxu0  ;;  %v1743_v59 = vsel %vm889_vm2, %v1738_v55, -inf }
 0x93f   : > { %1744 = vmax.xlane.f32.xlu1 %v1743_v59  ;;  %v2708_v58 = vld [vmem:[%s3248_s12] sm:$0xff]  }
 0x940   : > { %2649 = vmatpush3.bf16.msra.mxu0 %v2708_v58 }
 0x941   : > { %2650 = vmatprep.subr.bf16.mxu0 %v2762_v1 }
 0x943   : > { %v1847_v60 = vpop.f32.mrb[28].mxu0 }
 0x944   : > { %v1848_v61 = vadd.f32 %v2436_v47, %v1847_v60  ;;  %v2628_v62 = vpop.f32.mrb[29].mxu0 }
 0x945   : > { %v1850_v63 = vpop.f32.mrb[30].mxu0 }
 0x946   : > { %v2629_v0 = vpop.f32.mrb[31].mxu0  ;;  %v1853_v2 = vsel %vm889_vm2, %v1848_v61, -inf  ;;  %v2709_v63 = vld [vmem:[%s3248_s12 + $0x8] sm:$0xff]  }
 0x947   : > { %1854 = vmax.xlane.f32.xlu0 %v1853_v2  ;;  %2651 = vmatpush3.bf16.msra.mxu0 %v2709_v63 }
 0x948   : > { %2664 = vmatprep.subr.bf16.mxu0 %v2762_v1 }
 0x94b   : > { %v1957_v4 = vpop.f32.mrb[32].mxu0 }
 0x94c   : > { %v1958_v5 = vadd.f32 %v2436_v47, %v1957_v4  ;;  %v2640_v6 = vpop.f32.mrb[33].mxu0 }
 0x94d   : > { %v1960_v7 = vpop.f32.mrb[34].mxu0 }
 0x94e   : > { %v2641_v8 = vpop.f32.mrb[35].mxu0  ;;  %v1963_v3 = vsel %vm889_vm2, %v1958_v5, -inf }
 0x94f   : > { %1964 = vmax.xlane.f32.xlu0 %v1963_v3 }
 0x959   : > { %v1633_v9 = vpop.xlane.xlu0 %1632 }
 0x95a   : > { %v1634_v11 = vsub.f32 %v1626_v49, %v1633_v9 }
 0x95c   : > { %v1635_v12 = vmul.f32 1.442695, %v1634_v11 }
 0x95e   : > { %2734 = vpow2.f32 %v1635_v12 }
 0x968   : > { %v2735_v13 = vpop.eup %2734 }
 0x969   : > { %v1637_v14 = vsel %vm889_vm2, %v2735_v13, 0.0 }
 0x96a   : > { %1638 = vadd.xlane.f32.xlu1 %v1637_v14 }
 0x97b   : > { %1644 = vrot.lane.b32.xlu1 %v3087_v28, %s3298_s2  ;;  %s3304_s2 = smov 24  }
 0x9cc   : > { %v1745_v15 = vpop.xlane.xlu1 %1744 }
 0x9cd   : > { %v1746_v16 = vsub.f32 %v1738_v55, %v1745_v15 }
 0x9cf   : > { %v1747_v17 = vmul.f32 1.442695, %v1746_v16 }
 0x9d1   : > { %2736 = vpow2.f32 %v1747_v17  ;;  %v2445_v17 = vld [vmem:[%s3249_s13] ss:$0 sm:$0xff] }
 0x9d4   : > { %v1855_v18 = vpop.xlane.xlu0 %1854 }
 0x9d5   : > { %v1856_v19 = vsub.f32 %v1848_v61, %v1855_v18 }
 0x9d7   : > { %v1857_v10 = vmul.f32 1.442695, %v1856_v19 }
 0x9d9   : > { %2738 = vpow2.f32 %v1857_v10 }
 0x9db   : > { %v2737_v20 = vpop.eup %2736 }
 0x9dc   : > { %v1965_v22 = vpop.xlane.xlu0 %1964  ;;  %v1749_v23 = vsel %vm889_vm2, %v2737_v20, 0.0 }
 0x9dd   : > { %v1966_v24 = vsub.f32 %v1958_v5, %v1965_v22  ;;  %1750 = vadd.xlane.f32.xlu0 %v1749_v23 }
 0x9df   : > { %v1967_v25 = vmul.f32 1.442695, %v1966_v24 }
 0x9e1   : > { %2740 = vpow2.f32 %v1967_v25 }
 0x9e3   : > { %v2739_v26 = vpop.eup %2738 }
 0x9e4   : > { %v1859_v27 = vsel %vm889_vm2, %v2739_v26, 0.0 }
 0x9e5   : > { %1860 = vadd.xlane.f32.xlu1 %v1859_v27 }
 0x9eb   : > { %v2741_v29 = vpop.eup %2740 }
 0x9ec   : > { %v1969_v30 = vsel %vm889_vm2, %v2741_v29, 0.0 }
 0x9ed   : > { %1970 = vadd.xlane.f32.xlu0 %v1969_v30 }
 0x9f6   : > { %1865 = vrot.lane.b32.xlu1 %v3087_v28, %s3299_s3 }
 0x9f7   : > { %v1639_v31 = vpop.xlane.xlu1 %1638 }
 0x9f8   : > { %2742 = vrcp.f32 %v1639_v31  ;;  %v2710_v31 = vld [vmem:[%s3252_s16] sm:$0xff]  }
 0x9fa   : > { %1975 = vrot.lane.b32.xlu1 %v3087_v28, %s3300_s30 }
 0x9fb   : > { %v1645_v32 = vpop.permute.xlu1 %1644 }
 0x9fc   : > { %v1650_v33 = vsel %vm953_vm3, %v1645_v32, 0  ;;  %v2711_v32 = vld [vmem:[%s3252_s16 + $0x8] sm:$0xff]  }
 0x9fd   : > { %2607 = vmatpush3.bf16.msra.mxu1 %v1650_v33  ;;  %v2713_v33 = vld [vmem:[%s3254_s18 + $0x8] sm:$0xff]  }
 0x9fe   : > { %2618 = vmatprep.subr.bf16.mxu1 %v2762_v1 }
 0xa02   : > { %v2743_v34 = vpop.eup %2742 }
 0xa03   : > { %v1641_v35 = vmul.f32 %v2743_v34, %v2735_v13  ;;  %1755 = vrot.lane.b32.xlu0 %v3087_v28, %s3301_s4 }
 0xa05   : > { %v1642_v36 = vpack.c.bf16 %v1641_v35, %v1641_v35 }
 0xa07   : > { %2609 = vmatmul.mubr.msk.bf16.vlgmr.msra.gmra.mrb[28].mxu1 %vm889_vm2, %v1642_v36 }
 0xa08   : > { %2620 = vmatprep.mubr.msk.bf16.mxu1 %vm2763_vm0, %v2762_v1 }
 0xa6a   : > { %v1751_v37 = vpop.xlane.xlu0 %1750 }
 0xa6b   : > { %2744 = vrcp.f32 %v1751_v37 }
 0xa72   : > { %v1861_v38 = vpop.xlane.xlu1 %1860 }
 0xa73   : > { %2746 = vrcp.f32 %v1861_v38  ;;  %v2449_v38 = vld [vmem:[%s3250_s14] ss:$0 sm:$0xff] }
 0xa75   : > { %v2745_v39 = vpop.eup %2744 }
 0xa76   : > { %v1753_v41 = vmul.f32 %v2745_v39, %v2737_v20  ;;  %v1866_v44 = vpop.permute.xlu1 %1865 }
 0xa77   : > { %v1871_v46 = vsel %vm953_vm3, %v1866_v44, 0  ;;  %v2714_v44 = vld [vmem:[%s3254_s18 + $0x10] sm:$0xff]  }
 0xa78   : > { %v1754_v28 = vpack.c.bf16 %v1753_v41, %v1753_v41 }
 0xa7a   : > { %v1971_v40 = vpop.xlane.xlu0 %1970  ;;  %v1976_v48 = vpop.permute.xlu1 %1975 }
 0xa7b   : > { %2748 = vrcp.f32 %v1971_v40  ;;  %v1981_v51 = vsel %vm953_vm3, %v1976_v48, 0  ;;  %v2450_v40 = vld [vmem:[%s3251_s15] ss:$0 sm:$0xff] }
 0xa7d   : > { %v2747_v45 = vpop.eup %2746 }
 0xa7e   : > { %v1756_v42 = vpop.permute.xlu0 %1755  ;;  %v1863_v47 = vmul.f32 %v2747_v45, %v2739_v26  ;;  %v2451_v45 = vld [vmem:[%s3253_s17] ss:$0 sm:$0xff] }
 0xa7f   : > { %v1761_v43 = vsel %vm953_vm3, %v1756_v42, 0 }
 0xa80   : > { %2619 = vmatpush3.bf16.msra.mxu1 %v1761_v43  ;;  %v1864_v49 = vpack.c.bf16 %v1863_v47, %v1863_v47 }
 0xa81   : > { %2630 = vmatprep.subr.bf16.mxu1 %v2762_v1 }
 0xa83   : > { %2621 = vmatmul.mubr.msk.bf16.vlgmr.msra.gmra.mrb[32].mxu1 %vm889_vm2, %v1754_v28  ;;  %v2715_v28 = vld [vmem:[%s3254_s18 + $0x18] sm:$0xff]  }
 0xa84   : > { %2631 = vmatpush3.bf16.msra.mxu1 %v1871_v46  ;;  %2632 = vmatprep.mubr.msk.bf16.mxu1 %vm2763_vm0, %v2762_v1 }
 0xa85   : > { %2642 = vmatprep.subr.bf16.mxu1 %v2762_v1  ;;  %v2749_v50 = vpop.eup %2748 }
 0xa86   : > { %v1973_v52 = vmul.f32 %v2749_v50, %v2741_v29 }
 0xa88   : > { %v1974_v53 = vpack.c.bf16 %v1973_v52, %v1973_v52 }
 0xa8b   : > { %2633 = vmatmul.mubr.msk.bf16.vlgmr.msra.gmra.mrb[36].mxu1 %vm889_vm2, %v1864_v49 }
 0xa8c   : > { %2643 = vmatpush3.bf16.msra.mxu1 %v1981_v51  ;;  %2644 = vmatprep.mubr.msk.bf16.mxu1 %vm2763_vm0, %v2762_v1 }
 0xa8d   : > { %2656 = vmatprep.subr.bf16.mxu1 %v2762_v1 }
 0xa93   : > { %2645 = vmatmul.mubr.msk.bf16.vlgmr.msra.gmra.mrb[40].mxu1 %vm889_vm2, %v1974_v53 }
 0xa94   : > { %2660 = vmatprep.mubr.msk.bf16.mxu1 %vm2763_vm0, %v2762_v1  ;;  %2657 = vmatpush3.bf16.msra.mxu1 %v2710_v31 }
 0xa95   : > { %2658 = vmatprep.subr.bf16.mxu1 %v2762_v1 }
 0xa98   : > { %2659 = vmatpush3.bf16.msra.mxu1 %v2711_v32 }
 0xada   : > { %v1686_v54 = vpop.f32.mrb[28].mxu1 }
 0xadb   : > { %v2610_v55 = vpop.f32.mrb[29].mxu1 }
 0xadc   : > { %v1689_v56 = vpop.f32.mrb[30].mxu1 }
 0xadd   : > { %v2611_v57 = vpop.f32.mrb[31].mxu1 }
 0xb56   : > { %v1797_v59 = vpop.f32.mrb[32].mxu1 }
 0xb57   : > { %2024 = vrot.lane.b32.xlu0 %v1797_v59, %s3302_s8  ;;  %v2622_v60 = vpop.f32.mrb[33].mxu1 }
 0xb58   : > { %v1800_v61 = vpop.f32.mrb[34].mxu1 }
 0xb59   : > { %v2623_v62 = vpop.f32.mrb[35].mxu1 }
 0xb5e   : > { %v1907_v0 = vpop.f32.mrb[36].mxu1 }
 0xb5f   : > { %2028 = vrot.lane.b32.xlu1 %v1907_v0, %s3303_s26  ;;  %v2634_v2 = vpop.f32.mrb[37].mxu1  ;;  %s804_s26 = scalar_lea.vmem %s3261_s25, %s2932_s1 }
 0xb60   : > { %v1910_v4 = vpop.f32.mrb[38].mxu1 }
 0xb61   : > { %v2635_v5 = vpop.f32.mrb[39].mxu1 }
 0xb66   : > { %v2017_v6 = vpop.f32.mrb[40].mxu1 }
 0xb67   : > { %2032 = vrot.lane.b32.xlu0 %v2017_v6, %s3304_s2  ;;  %v2646_v7 = vpop.f32.mrb[41].mxu1 }
 0xb68   : > { %v2020_v8 = vpop.f32.mrb[42].mxu1  ;;  %v2461_v7 = vld [vmem:[%s3256_s20] ss:$0 sm:$0xff] }
 0xb69   : > { %v2647_v3 = vpop.f32.mrb[43].mxu1 }
 0xb6a   : > { %v2462_v3 = vld [vmem:[%s3257_s21] ss:$0 sm:$0xff] }
 0xbc9   : > { %v2025_v9 = vpop.permute.xlu0 %2024 }
 0xbca   : > { %v2035_v12 = vsel %vm889_vm2, %v1686_v54, %v2025_v9 }
 0xbd1   : > { %v2029_v11 = vpop.permute.xlu1 %2028 }
 0xbd2   : > { %v2036_v13 = vsel %vm1340_vm4, %v2035_v12, %v2029_v11 }
 0xbd9   : > { %v2033_v14 = vpop.permute.xlu0 %2032 }
 0xbda   : > { %v2037_v15 = vsel %vm1342_vm5, %v2036_v13, %v2033_v14 }
 0xbdb   : > { %v2038_v16 = vpack.c.bf16 %v2037_v15, %v2037_v15 }
 0xbdd   : > { %2653 = vmatmul.mubr.msk.bf16.vlgmr.msra.gmra.mrb[36].mxu0 %vm832_vm1, %v2038_v16 }
 0xbde   : > { %2672 = vmatprep.mubr.msk.bf16.mxu0 %vm2763_vm0, %v2762_v1 }
 0xcb0   : > { %v2099_v18 = vpop.f32.mrb[36].mxu0 }
 0xcb1   : > { %v2100_v19 = vadd.f32 %v2445_v17, %v2099_v18  ;;  %v2654_v10 = vpop.f32.mrb[37].mxu0 }
 0xcb2   : > { %v2102_v20 = vpop.f32.mrb[38].mxu0 }
 0xcb3   : > { %v2655_v22 = vpop.f32.mrb[39].mxu0  ;;  %v2105_v23 = vadd.f32 %v2100_v19, %v3077_v21  ;;  %v2712_v21 = vld [vmem:[%s3254_s18] sm:$0xff]  }
 0xcb4   : > { %2665 = vmatpush3.bf16.msra.mxu0 %v2712_v21 }
 0xcb5   : > { %v2108_v24 = vsel %vm832_vm1, %v2105_v23, 0.0  ;;  %2666 = vmatprep.subr.bf16.mxu0 %v2762_v1 }
 0xcb6   : > { %2109 = vadd.xlane.f32.xlu1 %v2108_v24 }
 0xcb8   : > { %2667 = vmatpush3.bf16.msra.mxu0 %v2713_v33 }
 0xcb9   : > { %2668 = vmatprep.subr.bf16.mxu0 %v2762_v1 }
 0xcbc   : > { %2669 = vmatpush3.bf16.msra.mxu0 %v2714_v44 }
 0xcbd   : > { %2670 = vmatprep.subr.bf16.mxu0 %v2762_v1  ;;  %v2455_v1 = vld [vmem:[%s3255_s19] ss:$0 sm:$0xff] }
 0xcc0   : > { %2671 = vmatpush3.bf16.msra.mxu0 %v2715_v28 }
 0xd43   : > { %v2110_v25 = vpop.xlane.xlu1 %2109 }
 0xd44   : > { %v2111_v26 = vmul.f32 0.03125, %v2110_v25 }
 0xd46   : > { %v2112_v27 = vsub.f32 %v2105_v23, %v2111_v26 }
 0xd48   : > { %v2113_v29 = vmul.f32 %v2112_v27, %v2112_v27 }
 0xd4a   : > { %v2114_v30 = vsel %vm832_vm1, %v2113_v29, 0.0 }
 0xd4b   : > { %2115 = vadd.xlane.f32.xlu0 %v2114_v30 }
 0xdd8   : > { %v2116_v34 = vpop.xlane.xlu0 %2115 }
 0xdd9   : > { %v2117_v35 = vmul.f32 0.03125, %v2116_v34 }
 0xddb   : > { %v2118_v36 = vadd.f32 1e-05, %v2117_v35 }
 0xddd   : > { %2750 = vrsqrt.f32 %v2118_v36 }
 0xde7   : > { %v2751_v37 = vpop.eup %2750 }
 0xde8   : > { %v2120_v39 = vmul.f32 %v2751_v37, %v2112_v27 }
 0xdea   : > { %v2127_v41 = vmul.f32 %v2449_v38, %v2120_v39 }
 0xdec   : > { %v2134_v42 = vadd.f32 %v2450_v40, %v2127_v41 }
 0xdee   : > { %v2135_v43 = vpack.c.bf16 %v2134_v42, %v2134_v42 }
 0xdf0   : > { %2661 = vmatmul.mubr.msk.bf16.vlgmr.msra.gmra.mrb[44].mxu1 %vm832_vm1, %v2135_v43 }
 0xec3   : > { %v2196_v46 = vpop.f32.mrb[44].mxu1 }
 0xec4   : > { %v2197_v47 = vadd.f32 %v2451_v45, %v2196_v46  ;;  %v2662_v48 = vpop.f32.mrb[45].mxu1 }
 0xec5   : > { %v2199_v49 = vpop.f32.mrb[46].mxu1 }
 0xec6   : > { %v2202_v50 = vmax.f32 %v2197_v47, 0.0  ;;  %v2663_v51 = vpop.f32.mrb[47].mxu1 }
 0xec8   : > { %v2203_v52 = vpack.c.bf16 %v2202_v50, %v2202_v50 }
 0xeca   : > { %2673 = vmatmul.mubr.msk.bf16.vlgmr.msra.gmra.mrb[40].mxu0 %vm2243_vm6, %v2203_v52 }
 0xf9d   : > { %v2281_v53 = vpop.f32.mrb[40].mxu0 }
 0xf9e   : > { %v2282_v54 = vadd.f32 %v2455_v1, %v2281_v53  ;;  %v2674_v55 = vpop.f32.mrb[41].mxu0 }
 0xf9f   : > { %v2284_v56 = vpop.f32.mrb[42].mxu0 }
 0xfa0   : > { %v2675_v57 = vpop.f32.mrb[43].mxu0  ;;  %v2287_v58 = vadd.f32 %v2282_v54, %v2134_v42 }
 0xfa2   : > { %v2290_v59 = vsel %vm832_vm1, %v2287_v58, 0.0 }
 0xfa3   : > { %2291 = vadd.xlane.f32.xlu0 %v2290_v59 }
0x1030   : > { %v2292_v60 = vpop.xlane.xlu0 %2291 }
0x1031   : > { %v2293_v61 = vmul.f32 0.03125, %v2292_v60 }
0x1033   : > { %v2294_v62 = vsub.f32 %v2287_v58, %v2293_v61 }
0x1035   : > { %v2295_v63 = vmul.f32 %v2294_v62, %v2294_v62 }
0x1037   : > { %v2296_v0 = vsel %vm832_vm1, %v2295_v63, 0.0 }
0x1038   : > { %2297 = vadd.xlane.f32.xlu1 %v2296_v0 }
0x10c5   : > { %v2298_v2 = vpop.xlane.xlu1 %2297 }
0x10c6   : > { %v2299_v4 = vmul.f32 0.03125, %v2298_v2 }
0x10c8   : > { %v2300_v5 = vadd.f32 1e-05, %v2299_v4 }
0x10ca   : > { %2752 = vrsqrt.f32 %v2300_v5 }
0x10d4   : > { %v2753_v6 = vpop.eup %2752 }
0x10d5   : > { %v2302_v8 = vmul.f32 %v2753_v6, %v2294_v62 }
0x10d7   : > { %v2309_v9 = vmul.f32 %v2461_v7, %v2302_v8 }
0x10d9   : > { %v2316_v11 = vadd.f32 %v2462_v3, %v2309_v9 }
0x10db   : > { %2317 = vst.msk [vmem:[%s804_s26] sm:$0xff] %vm832_vm1, %v2316_v11 }
0x10dc PF: > { %s35_s29 = sadd.s32 1, %s2760_s29  }
0x10dd   : > { %p32_p4 = scmp.ge.s32.totalorder %s35_s29, 4  }
0x10df   :  { %34 = sbr.rel (!%p32_p4) target bundleno = 11 (0xb), region = 159 }

// kernel: seq2seq_forward.11
= control target key start
LH: loop header
LB: loop body
LE: loop exit
PB: predicated region body
PF: predicated region fallthrough
CT: control target
= control target key end

     0   :  { %vm25_vm0 = vcmask 261120   ;;  %v168_v15 = vmov 0.0   ;;  %vm169_vm1 = vmmov 0   ;;  %s232_s0 = inlined_call_operand.vmem [shape: f32[16,32], index: 0, kind: input, shape index: {}]   ;;  %s233_s3 = inlined_call_operand.vmem [shape: bf16[32,128], index: 3, kind: input, shape index: {}]   ;;  %s234_s1 = inlined_call_operand.vmem [shape: f32[1,32], index: 1, kind: input, shape index: {}]   ;;  %s235_s2 = inlined_call_operand.vmem [shape: f32[1,32], index: 2, kind: input, shape index: {}]   ;;  %s236_s4 = inlined_call_operand.vmem [shape: f32[1,128], index: 4, kind: input, shape index: {}]   ;;  %s237_s5 = inlined_call_operand.vmem [shape: f32[16,128], index: 5, kind: output, shape index: {}]  }
   0x1   :  { %v21_v0 = vld [vmem:[%s232_s0] sm:$0xff]  ;;  %v22_v1 = vld [vmem:[%s232_s0 + $0x8] sm:$0xff]  ;;  %152 = vmatprep.subr.bf16.mxu0 %v168_v15  ;;  %156 = vmatprep.mubr.msk.bf16.mxu0 %vm169_vm1, %v168_v15 }
   0x2   :  { %v26_v2 = vsel %vm25_vm0, %v21_v0, 0.0  ;;  %v29_v3 = vsel %vm25_vm0, %v22_v1, 0.0  ;;  %v162_v14 = vld [vmem:[%s233_s3] sm:$0xff]   ;;  %v163_v16 = vld [vmem:[%s233_s3 + $0x8] sm:$0xff]  }
   0x3   :  { %27 = vadd.xlane.f32.xlu0 %v26_v2  ;;  %153 = vmatpush3.bf16.msra.mxu0 %v162_v14  ;;  %v143_v25 = vld [vmem:[%s234_s1] ss:$0 sm:$0xff] }
   0x4   :  { %154 = vmatprep.subr.bf16.mxu0 %v168_v15  ;;  %v144_v29 = vld [vmem:[%s235_s2] ss:$0 sm:$0xff] }
   0x5   :  { %v145_v34 = vld [vmem:[%s236_s4] ss:$0 sm:$0xff] }
   0x7   :  { %30 = vadd.xlane.f32.xlu0 %v29_v3  ;;  %155 = vmatpush3.bf16.msra.mxu0 %v163_v16 }
  0x90   :  { %v28_v4 = vpop.xlane.xlu0 %27 }
  0x91   :  { %v33_v5 = vmul.f32 0.03125, %v28_v4 }
  0x93   :  { %v35_v6 = vsub.f32 %v21_v0, %v33_v5 }
  0x94   :  { %v31_v7 = vpop.xlane.xlu0 %30 }
  0x95   :  { %v34_v8 = vmul.f32 0.03125, %v31_v7  ;;  %v37_v9 = vmul.f32 %v35_v6, %v35_v6 }
  0x97   :  { %v36_v10 = vsub.f32 %v22_v1, %v34_v8  ;;  %v39_v11 = vsel %vm25_vm0, %v37_v9, 0.0 }
  0x98   :  { %40 = vadd.xlane.f32.xlu1 %v39_v11 }
  0x99   :  { %v38_v12 = vmul.f32 %v36_v10, %v36_v10 }
  0x9b   :  { %v42_v13 = vsel %vm25_vm0, %v38_v12, 0.0 }
  0x9c   :  { %43 = vadd.xlane.f32.xlu1 %v42_v13 }
 0x125   :  { %v41_v17 = vpop.xlane.xlu1 %40 }
 0x126   :  { %v45_v18 = vmul.f32 0.03125, %v41_v17 }
 0x128   :  { %v47_v19 = vadd.f32 1e-05, %v45_v18 }
 0x129   :  { %v44_v20 = vpop.xlane.xlu1 %43 }
 0x12a   :  { %164 = vrsqrt.f32 %v47_v19  ;;  %v46_v21 = vmul.f32 0.03125, %v44_v20 }
 0x12c   :  { %v48_v22 = vadd.f32 1e-05, %v46_v21 }
 0x12e   :  { %166 = vrsqrt.f32 %v48_v22 }
 0x134   :  { %v165_v23 = vpop.eup %164 }
 0x135   :  { %v51_v24 = vmul.f32 %v165_v23, %v35_v6 }
 0x137   :  { %v59_v28 = vmul.f32 %v143_v25, %v51_v24 }
 0x138   :  { %v167_v26 = vpop.eup %166 }
 0x139   :  { %v52_v27 = vmul.f32 %v167_v26, %v36_v10  ;;  %v67_v31 = vadd.f32 %v144_v29, %v59_v28 }
 0x13b   :  { %v60_v30 = vmul.f32 %v143_v25, %v52_v27 }
 0x13d   :  { %v68_v32 = vadd.f32 %v144_v29, %v60_v30 }
 0x13f   :  { %v69_v33 = vpack.c.bf16 %v68_v32, %v67_v31 }
 0x141   :  { %157 = vmatmul.mubr.msk.bf16.vlgmr.msra.gmra.mrb[0].mxu0 %vm25_vm0, %v69_v33 }
 0x214   :  { %v130_v35 = vpop.f32.mrb[0].mxu0 }
 0x215   :  { %v131_v36 = vadd.f32 %v145_v34, %v130_v35  ;;  %v158_v37 = vpop.f32.mrb[1].mxu0 }
 0x216   :  { %v133_v38 = vpop.f32.mrb[2].mxu0 }
 0x217   :  { %137 = vst [vmem:[%s237_s5] sm:$0xff] %v131_v36  ;;  %v134_v39 = vadd.f32 %v145_v34, %v133_v38  ;;  %v159_v40 = vpop.f32.mrb[3].mxu0 }
 0x219   :  { %138 = vst [vmem:[%s237_s5 + $0x8] sm:$0xff] %v134_v39 }

// kernel: seq2seq_forward.10
= control target key start
LH: loop header
LB: loop body
LE: loop exit
PB: predicated region body
PF: predicated region fallthrough
CT: control target
= control target key end

     0   :  { %s3343_s0 = inlined_call_operand.vmem [shape: f32[2,8,32], index: 0, kind: input, shape index: {}]   ;;  %s3344_s1 = inlined_call_operand.vmem [shape: f32[2,8,32], index: 1, kind: input, shape index: {}]   ;;  %s3345_s2 = inlined_call_operand.vmem [shape: bf16[32,96], index: 2, kind: input, shape index: {}]   ;;  %s3346_s3 = inlined_call_operand.vmem [shape: f32[1,96], index: 3, kind: input, shape index: {}]   ;;  %s3347_s4 = inlined_call_operand.vmem [shape: bf16[32,32], index: 4, kind: input, shape index: {}]   ;;  %s3348_s5 = inlined_call_operand.vmem [shape: f32[1,32], index: 5, kind: input, shape index: {}]   ;;  %s3349_s6 = inlined_call_operand.vmem [shape: f32[1,32], index: 6, kind: input, shape index: {}]   ;;  %s3350_s7 = inlined_call_operand.vmem [shape: f32[1,32], index: 7, kind: input, shape index: {}]   ;;  %s3351_s8 = inlined_call_operand.vmem [shape: bf16[32,32], index: 8, kind: input, shape index: {}]   ;;  %s3352_s9 = inlined_call_operand.vmem [shape: f32[1,32], index: 9, kind: input, shape index: {}]   ;;  %s3353_s10 = inlined_call_operand.vmem [shape: bf16[32,64], index: 10, kind: input, shape index: {}]   ;;  %s3354_s11 = inlined_call_operand.vmem [shape: f32[1,64], index: 11, kind: input, shape index: {}]   ;;  %s3355_s12 = inlined_call_operand.vmem [shape: bf16[32,32], index: 12, kind: input, shape index: {}]   ;;  %s3356_s13 = inlined_call_operand.vmem [shape: f32[1,32], index: 13, kind: input, shape index: {}]   ;;  %s3357_s14 = inlined_call_operand.vmem [shape: f32[1,32], index: 14, kind: input, shape index: {}]   ;;  %s3358_s15 = inlined_call_operand.vmem [shape: f32[1,32], index: 15, kind: input, shape index: {}]   ;;  %s3359_s16 = inlined_call_operand.vmem [shape: bf16[32,64], index: 16, kind: input, shape index: {}]   ;;  %s3360_s17 = inlined_call_operand.vmem [shape: f32[1,64], index: 17, kind: input, shape index: {}]   ;;  %s3361_s18 = inlined_call_operand.vmem [shape: bf16[64,32], index: 18, kind: input, shape index: {}]   ;;  %s3362_s19 = inlined_call_operand.vmem [shape: f32[1,32], index: 19, kind: input, shape index: {}]   ;;  %s3363_s20 = inlined_call_operand.vmem [shape: f32[1,32], index: 20, kind: input, shape index: {}]   ;;  %s3364_s21 = inlined_call_operand.hbm [shape: f32[1,32], index: 21, kind: input, shape index: {}]   ;;  %s3365_s22 = inlined_call_operand.vmem [shape: f32[8,8], index: 22, kind: input, shape index: {}]   ;;  %s3366_s23 = inlined_call_operand.vmem [shape: f32[2,1,8], index: 23, kind: input, shape index: {}]   ;;  %s3367_s24 = inlined_call_operand.vmem [shape: f32[2,1,8], index: 24, kind: input, shape index: {}]   ;;  %s3368_s25 = inlined_call_operand.vmem [shape: f32[2,8,32], index: 25, kind: output, shape index: {}]  }
   0x1   :  { %3385 = sst [smem:[#allocation5_spill]] %s3343_s0 }
   0x2   :  { %3386 = sst [smem:[#allocation6_spill]] %s3344_s1 }
   0x3   :  { %3387 = sst [smem:[#allocation7_spill]] %s3345_s2 }
   0x4   :  { %3388 = sst [smem:[#allocation8_spill]] %s3346_s3 }
   0x5   :  { %3389 = sst [smem:[#allocation9_spill]] %s3347_s4 }
   0x6   :  { %3390 = sst [smem:[#allocation10_spill]] %s3348_s5 }
   0x7   :  { %3391 = sst [smem:[#allocation11_spill]] %s3349_s6 }
   0x8   :  { %3392 = sst [smem:[#allocation12_spill]] %s3350_s7 }
   0x9   :  { %3393 = sst [smem:[#allocation13_spill]] %s3351_s8 }
   0xa   :  { %3394 = sst [smem:[#allocation14_spill]] %s3352_s9 }
   0xb   :  { %30 = vsyncpa [#allocation3], 0  ;;  %s2979_s29 = smov 0  }
   0xc LB: > { %s2985_s2 = sadd.s32 4294967295, %s2830_s29   ;;  %p2428_p0 = scmp.ge.s32.totalorder %s2830_s29, 1  ;;  %s2830_s29 = sphi %s2979_s29, %s36_s29  }
   0xd   : > { %p612_p1 = scmp.lt.s32.totalorder %s2830_s29, 3  ;;  %p3372_p3 = scmp.eq.s32.totalorder %s2985_s2, 0 }
   0xe   : > { %s2832_s30 = smov [#allocation2]   ;;  %s2792_s8 = scalar_lea.hbm %s3364_s21, 16 }
   0xf   : > { %p2989_p2 = pnand %p2428_p0, %p612_p1  ;;  %s682_s7 = sshll.u32 %s2832_s30, 4  ;;  %s683_s7 = int_to_ptr.vmem [resolvable:$true] %s682_s7 }
  0x10   : > { %p2793_p6 = scmp.ne.s32.totalorder %s3364_s21, %s2792_s8  ;;  %p2799_p10 = scmp.lt.u32.totalorder %s2792_s8, %s3364_s21 }
  0x11   : > { %s3395_s6 = scalar_select %p2989_p2, 1, 0 }
  0x12   : > { %p2707_p4 = pneg %p2989_p2 }
  0x14   : > { %p2998_p5 = pnand %p3372_p3, %p2707_p4 }
  0x16   : > { %p2794_p7 = pneg %p2998_p5 }
  0x18   : > { %p2795_p8 = pnand %p2794_p7, %p2793_p6 }
  0x1a   : > { %p2796_p9 = pneg %p2795_p8 }
  0x1c   : > { %p2801_p11 = pnand %p2799_p10, %p2796_p9 }
  0x1e   : > { %2804 = shalt.err (!%p2801_p11)
}
  0x1f   : > { %s2805_s5 = scalar_lea.vmem %s683_s7, 16  ;;  %s2812_s0 = scalar_lea.vmem %s683_s7, 32 }
  0x20   : > { %p2806_p12 = scmp.ne.s32.totalorder %s683_s7, %s2805_s5  ;;  %p2813_p1 = scmp.lt.s32.totalorder %s683_s7, %s683_s7 }
  0x21   : > { %p2814_p4 = scmp.lt.s32.totalorder %s2812_s0, %s2805_s5 }
  0x22   : > { %p2808_p13 = pnand %p2806_p12, %p2794_p7 }
  0x23   : > { %p2815_p3 = por %p2814_p4, %p2813_p1 }
  0x24   : > { %p2809_p0 = pneg %p2808_p13 }
  0x26   : > { %p2816_p2 = pnand %p2815_p3, %p2809_p0 }
  0x28   : > { %2819 = shalt.err (!%p2816_p2)
}
  0x29   : > { %2710 = dma.hbm_to_vmem [thread:$0]  (!%p2998_p5), %s3364_s21, 16, %s683_s7, [#allocation3]  }
  0x2a   : > { %p3397_p6 = scmp.ne.s32.totalorder %s3395_s6, 0 }
  0x2b   : > { %p3398_p8 = scmp.eq.s32.totalorder (!%p3397_p6), %s2985_s2, 0 }
  0x2c   : > { %724 = sbr.rel (%p3397_p6) target bundleno = 4354 (0x1102), region = 120 }
  0x33   : > { %2825 = dma.done.wait (%p3398_p8), [#allocation3], 16   ;;  %p3399_p7 = pmov %p3398_p8 }
  0x34   : > { %p800_p9 = scmp.lt.s32.totalorder %s2985_s2, 1  ;;  %v2833_v0 = vmov 0.0   ;;  %vm2834_vm0 = vmmov 0   ;;  %s3400_s1 = sld [smem:[#allocation5_spill]]  ;;  %vm845_vm1 = vcmask 261120   ;;  %vm902_vm2 = vcmask 64512  }
  0x35   : > { %2827 = vsyncadd (%p3399_p7), [#allocation3], 4294967280  ;;  %2547 = vmatprep.subr.bf16.mxu1 %v2833_v0  ;;  %2551 = vmatprep.mubr.msk.bf16.mxu1 %vm2834_vm0, %v2833_v0  ;;  %s3401_s28 = sld [smem:[#allocation7_spill]]  ;;  %s3402_s26 = sld [smem:[#allocation8_spill]]  ;;  %v889_v23 = vld [vmem:[%s3365_s22] sm:$0xff]  ;;  %vm966_vm3 = vcmask 1043456  }
  0x36   : > { %s3420_s2 = smov (!%p800_p9, %s2985_s2), 1  ;;  %2561 = vmatprep.subr.bf16.mxu0 %v2833_v0  ;;  %2563 = vmatprep.mubr.msk.bf16.mxu0 %vm2834_vm0, %v2833_v0  ;;  %s2835_s7 = smov 120   ;;  %vm1353_vm4 = vcmask 130048   ;;  %vm1355_vm5 = vcmask 195584   ;;  %vm2256_vm6 = vcmask 523264  }
  0x37   : > { %s3035_s6 = sshll.u32 %s3420_s2, 3  ;;  %s3380_s3 = smov 96  }
  0x38   : > { %s3375_s27 = smov 72   ;;  %s3383_s4 = smov 112  }
  0x39   : > { %s3381_s9 = smov 104   ;;  %s810_s30 = scalar_lea.vmem %s3366_s23, %s3420_s2 }
  0x3a   : > { %s803_s8 = scalar_lea.vmem %s3400_s1, %s3035_s6  ;;  %s3376_s1 = smov 80   ;;  %v2440_v24 = vld [vmem:[%s810_s30] ss:$0 sm:$0xff] }
  0x3b   : > { %v2738_v1 = vld [vmem:[%s3401_s28] sm:$0xff]   ;;  %v2739_v2 = vld [vmem:[%s3401_s28 + $0x8] sm:$0xff]   ;;  %v897_v25 = vadd.f32 %v2440_v24, %v889_v23  ;;  %s2843_s5 = smov 64   ;;  %s2844_s0 = smov 40  }
  0x3c   : > { %2548 = vmatpush3.bf16.msra.mxu1 %v2738_v1  ;;  %v3047_v3 = vld [vmem:[%s803_s8] sm:$0xff]  ;;  %s3374_s8 = smov 88   ;;  %s2845_s30 = smov 48  }
  0x3d   : > { %2549 = vmatprep.subr.bf16.mxu1 %v2833_v0  ;;  %v821_v4 = vpack.c.bf16 %v3047_v3, %v3047_v3  ;;  %v2436_v5 = vld [vmem:[%s3402_s26] ss:$0 sm:$0xff]  ;;  %s3379_s26 = smov 8  }
  0x40   : > { %2550 = vmatpush3.bf16.msra.mxu1 %v2739_v2 }
  0x41   : > { %2555 = vmatprep.subr.bf16.mxu1 %v2833_v0 }
  0x43   : > { %2552 = vmatmul.mubr.msk.bf16.vlgmr.msra.gmra.mrb[0].mxu1 %vm845_vm1, %v821_v4 }
  0x44   : > { %2557 = vmatprep.mubr.msk.bf16.mxu1 %vm2834_vm0, %v2833_v0 }
 0x116   : > { %v883_v6 = vpop.f32.mrb[0].mxu1 }
 0x117   : > { %v884_v7 = vadd.f32 %v2436_v5, %v883_v6  ;;  %v2553_v8 = vpop.f32.mrb[1].mxu1 }
 0x118   : > { %v886_v9 = vpop.f32.mrb[2].mxu1 }
 0x119   : > { %v3059_v10 = vpack.c.bf16 %v884_v7, %v884_v7  ;;  %v2554_v11 = vpop.f32.mrb[3].mxu1 }
 0x11b   : > { %1010 = vrot.lane.b32.xlu1 %v3059_v10, %s2835_s7  ;;  %900 = vrot.lane.b32.xlu0 %v3059_v10, %s3380_s3  ;;  %s3405_s3 = sld [smem:[#allocation6_spill]] }
 0x11f   : > { %1122 = vrot.lane.b32.xlu1 %v3059_v10, %s3376_s1  ;;  %1012 = vrot.lane.b32.xlu0 %v3059_v10, %s3374_s8  ;;  %s2842_s8 = smov 56   ;;  %s3378_s1 = smov 16  }
 0x123   : > { %1232 = vrot.lane.b32.xlu1 %v3059_v10, %s3375_s27  ;;  %1120 = vrot.lane.b32.xlu0 %v3059_v10, %s3383_s4  ;;  %s3406_s4 = sld [smem:[#allocation13_spill]]  ;;  %s3411_s27 = sld [smem:[#allocation14_spill]] }
 0x127   : > { %1230 = vrot.lane.b32.xlu0 %v3059_v10, %s3381_s9  ;;  %s807_s9 = scalar_lea.vmem %s3405_s3, %s3035_s6  ;;  %s3409_s3 = smov 112  }
 0x18d   : > { %v901_v12 = vpop.permute.xlu0 %900  ;;  %v1011_v15 = vpop.permute.xlu1 %1010 }
 0x18e   : > { %v907_v13 = vsel %vm902_vm2, %v901_v12, 0 }
 0x18f   : > { %2556 = vmatpush3.bf16.xpose.msra.mxu1 %v907_v13 }
 0x190   : > { %2567 = vmatprep.subr.bf16.mxu1 %v2833_v0 }
 0x191   : > { %v1013_v14 = vpop.permute.xlu0 %1012  ;;  %v1123_v17 = vpop.permute.xlu1 %1122 }
 0x192   : > { %v1018_v16 = vsel %vm902_vm2, %v1013_v14, 0  ;;  %v1128_v18 = vsel %vm902_vm2, %v1123_v17, 0 }
 0x195   : > { %v1233_v19 = vpop.permute.xlu1 %1232  ;;  %v1121_v20 = vpop.permute.xlu0 %1120 }
 0x196   : > { %2558 = vmatmul.mubr.msk.bf16.vlgmr.msra.gmra.mrb[4].mxu1 %vm902_vm2, %v3059_v10  ;;  %v1238_v21 = vsel %vm902_vm2, %v1233_v19, 0 }
 0x197   : > { %2568 = vmatpush3.bf16.xpose.msra.mxu1 %v1018_v16  ;;  %2569 = vmatprep.mubr.msk.bf16.mxu1 %vm2834_vm0, %v2833_v0 }
 0x198   : > { %2579 = vmatprep.subr.bf16.mxu1 %v2833_v0 }
 0x199   : > { %v1231_v22 = vpop.permute.xlu0 %1230 }
 0x19e   : > { %2570 = vmatmul.mubr.msk.bf16.vlgmr.msra.gmra.mrb[8].mxu1 %vm902_vm2, %v1011_v15 }
 0x19f   : > { %2580 = vmatpush3.bf16.xpose.msra.mxu1 %v1128_v18  ;;  %2581 = vmatprep.mubr.msk.bf16.mxu1 %vm2834_vm0, %v2833_v0 }
 0x1a0   : > { %2591 = vmatprep.subr.bf16.mxu1 %v2833_v0 }
 0x1a6   : > { %2582 = vmatmul.mubr.msk.bf16.vlgmr.msra.gmra.mrb[12].mxu1 %vm902_vm2, %v1121_v20 }
 0x1a7   : > { %2592 = vmatpush3.bf16.xpose.msra.mxu1 %v1238_v21  ;;  %2593 = vmatprep.mubr.msk.bf16.mxu1 %vm2834_vm0, %v2833_v0 }
 0x1a8   : > { %2603 = vmatprep.subr.bf16.mxu1 %v2833_v0 }
 0x1ae   : > { %2594 = vmatmul.mubr.msk.bf16.vlgmr.msra.gmra.mrb[16].mxu1 %vm902_vm2, %v1231_v22 }
 0x1af   : > { %2607 = vmatprep.mubr.msk.bf16.mxu1 %vm2834_vm0, %v2833_v0 }
 0x269   : > { %v943_v26 = vpop.f32.mrb[4].mxu1 }
 0x26a   : > { %v944_v27 = vadd.f32 %v943_v26, %v897_v25  ;;  %v2559_v28 = vpop.f32.mrb[5].mxu1 }
 0x26b   : > { %v946_v29 = vpop.f32.mrb[6].mxu1 }
 0x26c   : > { %v2560_v30 = vpop.f32.mrb[7].mxu1  ;;  %v949_v31 = vsel %vm902_vm2, %v944_v27, -inf }
 0x26d   : > { %950 = vmax.xlane.f32.xlu1 %v949_v31 }
 0x271   : > { %v1054_v32 = vpop.f32.mrb[8].mxu1 }
 0x272   : > { %v1055_v33 = vadd.f32 %v1054_v32, %v897_v25  ;;  %v2571_v34 = vpop.f32.mrb[9].mxu1 }
 0x273   : > { %v1057_v35 = vpop.f32.mrb[10].mxu1 }
 0x274   : > { %v2572_v36 = vpop.f32.mrb[11].mxu1  ;;  %v1060_v37 = vsel %vm902_vm2, %v1055_v33, -inf }
 0x275   : > { %1061 = vmax.xlane.f32.xlu0 %v1060_v37 }
 0x279   : > { %v1164_v38 = vpop.f32.mrb[12].mxu1 }
 0x27a   : > { %v1165_v39 = vadd.f32 %v1164_v38, %v897_v25  ;;  %v2583_v40 = vpop.f32.mrb[13].mxu1 }
 0x27b   : > { %v1167_v41 = vpop.f32.mrb[14].mxu1 }
 0x27c   : > { %v2584_v42 = vpop.f32.mrb[15].mxu1  ;;  %v1170_v43 = vsel %vm902_vm2, %v1165_v39, -inf }
 0x27d   : > { %1171 = vmax.xlane.f32.xlu0 %v1170_v43 }
 0x281   : > { %v1274_v44 = vpop.f32.mrb[16].mxu1 }
 0x282   : > { %v1275_v45 = vadd.f32 %v1274_v44, %v897_v25  ;;  %v2595_v46 = vpop.f32.mrb[17].mxu1 }
 0x283   : > { %v1277_v47 = vpop.f32.mrb[18].mxu1 }
 0x284   : > { %v2596_v48 = vpop.f32.mrb[19].mxu1  ;;  %v1280_v49 = vsel %vm902_vm2, %v1275_v45, -inf }
 0x285   : > { %1281 = vmax.xlane.f32.xlu1 %v1280_v49 }
 0x2fa   : > { %v951_v50 = vpop.xlane.xlu1 %950 }
 0x2fb   : > { %v952_v51 = vsub.f32 %v944_v27, %v951_v50 }
 0x2fd   : > { %v953_v52 = vmul.f32 1.442695, %v952_v51 }
 0x2ff   : > { %2754 = vpow2.f32 %v953_v52 }
 0x302   : > { %v1062_v53 = vpop.xlane.xlu0 %1061 }
 0x303   : > { %v1063_v54 = vsub.f32 %v1055_v33, %v1062_v53 }
 0x305   : > { %v1064_v55 = vmul.f32 1.442695, %v1063_v54 }
 0x307   : > { %2756 = vpow2.f32 %v1064_v55 }
 0x309   : > { %v2755_v56 = vpop.eup %2754 }
 0x30a   : > { %v1172_v57 = vpop.xlane.xlu0 %1171  ;;  %v955_v58 = vsel %vm902_vm2, %v2755_v56, 0.0 }
 0x30b   : > { %v1173_v59 = vsub.f32 %v1165_v39, %v1172_v57  ;;  %956 = vadd.xlane.f32.xlu0 %v955_v58 }
 0x30d   : > { %v1174_v60 = vmul.f32 1.442695, %v1173_v59 }
 0x30f   : > { %2758 = vpow2.f32 %v1174_v60 }
 0x311   : > { %v2757_v61 = vpop.eup %2756 }
 0x312   : > { %v1066_v62 = vsel %vm902_vm2, %v2757_v61, 0.0  ;;  %v1282_v2 = vpop.xlane.xlu1 %1281 }
 0x313   : > { %1067 = vadd.xlane.f32.xlu1 %v1066_v62  ;;  %v1283_v4 = vsub.f32 %v1275_v45, %v1282_v2 }
 0x315   : > { %v1284_v5 = vmul.f32 1.442695, %v1283_v4 }
 0x317   : > { %2760 = vpow2.f32 %v1284_v5 }
 0x319   : > { %v2759_v63 = vpop.eup %2758 }
 0x31a   : > { %v1176_v1 = vsel %vm902_vm2, %v2759_v63, 0.0 }
 0x31b   : > { %1177 = vadd.xlane.f32.xlu0 %v1176_v1 }
 0x321   : > { %v2761_v6 = vpop.eup %2760 }
 0x322   : > { %v1286_v7 = vsel %vm902_vm2, %v2761_v6, 0.0 }
 0x324   : > { %1072 = vrot.lane.b32.xlu1 %v3059_v10, %s2842_s8  ;;  %s3377_s8 = smov 24  }
 0x331   : > { %961 = vrot.lane.b32.xlu0 %v3059_v10, %s2843_s5  ;;  %s3408_s5 = sld [smem:[#allocation12_spill]] }
 0x335   : > { %1292 = vrot.lane.b32.xlu0 %v3059_v10, %s2844_s0  ;;  %s3403_s0 = sld [smem:[#allocation9_spill]] }
 0x33b   : > { %v2740_v40 = vld [vmem:[%s3403_s0] sm:$0xff]   ;;  %v2741_v41 = vld [vmem:[%s3403_s0 + $0x8] sm:$0xff]  }
 0x33c   : > { %2604 = vmatpush3.bf16.msra.mxu1 %v2740_v40 }
 0x33d   : > { %2605 = vmatprep.subr.bf16.mxu1 %v2833_v0 }
 0x340   : > { %2606 = vmatpush3.bf16.msra.mxu1 %v2741_v41 }
 0x341   : > { %2619 = vmatprep.subr.bf16.mxu1 %v2833_v0 }
 0x348   : > { %1287 = vadd.xlane.f32.xlu1 %v1286_v7 }
 0x359   : > { %1182 = vrot.lane.b32.xlu1 %v3059_v10, %s2845_s30  ;;  %s3404_s30 = sld [smem:[#allocation10_spill]] }
 0x35f   : > { %v2449_v57 = vld [vmem:[%s3404_s30] ss:$0 sm:$0xff] }
 0x398   : > { %v957_v8 = vpop.xlane.xlu0 %956 }
 0x399   : > { %2762 = vrcp.f32 %v957_v8  ;;  %v2742_v8 = vld [vmem:[%s3353_s10] sm:$0xff]  }
 0x3a0   : > { %v1068_v9 = vpop.xlane.xlu1 %1067 }
 0x3a1   : > { %2764 = vrcp.f32 %v1068_v9  ;;  %v820_v9 = vld [vmem:[%s807_s9] sm:$0xff]  ;;  %s3410_s9 = smov 104  }
 0x3a3   : > { %v2763_v11 = vpop.eup %2762 }
 0x3a4   : > { %v959_v13 = vmul.f32 %v2763_v11, %v2755_v56  ;;  %v1073_v16 = vpop.permute.xlu1 %1072  ;;  %v1522_v11 = vpack.c.bf16 %v820_v9, %v820_v9 }
 0x3a5   : > { %v1078_v19 = vsel %vm966_vm3, %v1073_v16, 0 }
 0x3a6   : > { %v960_v17 = vpack.c.bf16 %v959_v13, %v959_v13  ;;  %v2745_v13 = vld [vmem:[%s3406_s4 + $0x8] sm:$0xff]  }
 0x3a8   : > { %v1178_v12 = vpop.xlane.xlu0 %1177 }
 0x3a9   : > { %2766 = vrcp.f32 %v1178_v12  ;;  %v2744_v12 = vld [vmem:[%s3406_s4] sm:$0xff]  }
 0x3ab   : > { %v2765_v18 = vpop.eup %2764 }
 0x3ac   : > { %v962_v14 = vpop.permute.xlu0 %961  ;;  %v1070_v10 = vmul.f32 %v2765_v18, %v2757_v61 }
 0x3ad   : > { %v968_v15 = vsel %vm966_vm3, %v962_v14, 0 }
 0x3ae   : > { %2562 = vmatpush3.bf16.msra.mxu0 %v968_v15  ;;  %v1071_v20 = vpack.c.bf16 %v1070_v10, %v1070_v10  ;;  %v2454_v10 = vld [vmem:[%s3408_s5] ss:$0 sm:$0xff] }
 0x3af   : > { %2573 = vmatprep.subr.bf16.mxu0 %v2833_v0 }
 0x3b0   : > { %v1293_v26 = vpop.permute.xlu0 %1292 }
 0x3b1   : > { %2564 = vmatmul.mubr.msk.bf16.vlgmr.msra.gmra.mrb[0].mxu0 %vm902_vm2, %v960_v17  ;;  %v1298_v28 = vsel %vm966_vm3, %v1293_v26, 0 }
 0x3b2   : > { %2574 = vmatpush3.bf16.msra.mxu0 %v1078_v19  ;;  %2575 = vmatprep.mubr.msk.bf16.mxu0 %vm2834_vm0, %v2833_v0 }
 0x3b3   : > { %2585 = vmatprep.subr.bf16.mxu0 %v2833_v0  ;;  %v2767_v21 = vpop.eup %2766 }
 0x3b4   : > { %v1180_v23 = vmul.f32 %v2767_v21, %v2759_v63 }
 0x3b6   : > { %v1181_v27 = vpack.c.bf16 %v1180_v23, %v1180_v23  ;;  %v2459_v23 = vld [vmem:[%s3354_s11] ss:$0 sm:$0xff] }
 0x3b9   : > { %2576 = vmatmul.mubr.msk.bf16.vlgmr.msra.gmra.mrb[4].mxu0 %vm902_vm2, %v1071_v20 }
 0x3ba   : > { %2587 = vmatprep.mubr.msk.bf16.mxu0 %vm2834_vm0, %v2833_v0 }
 0x3d5   : > { %v1288_v22 = vpop.xlane.xlu1 %1287 }
 0x3d6   : > { %2768 = vrcp.f32 %v1288_v22 }
 0x3d9   : > { %v1183_v24 = vpop.permute.xlu1 %1182 }
 0x3da   : > { %v1188_v25 = vsel %vm966_vm3, %v1183_v24, 0 }
 0x3db   : > { %2586 = vmatpush3.bf16.msra.mxu0 %v1188_v25 }
 0x3dc   : > { %2597 = vmatprep.subr.bf16.mxu0 %v2833_v0 }
 0x3de   : > { %2588 = vmatmul.mubr.msk.bf16.vlgmr.msra.gmra.mrb[8].mxu0 %vm902_vm2, %v1181_v27 }
 0x3df   : > { %2598 = vmatpush3.bf16.msra.mxu0 %v1298_v28  ;;  %2599 = vmatprep.mubr.msk.bf16.mxu0 %vm2834_vm0, %v2833_v0 }
 0x3e0   : > { %v2769_v29 = vpop.eup %2768  ;;  %2611 = vmatprep.subr.bf16.mxu0 %v2833_v0 }
 0x3e1   : > { %v1290_v30 = vmul.f32 %v2769_v29, %v2761_v6 }
 0x3e3   : > { %v1291_v31 = vpack.c.bf16 %v1290_v30, %v1290_v30 }
 0x3e6   : > { %2600 = vmatmul.mubr.msk.bf16.vlgmr.msra.gmra.mrb[12].mxu0 %vm902_vm2, %v1291_v31  ;;  %v2455_v31 = vld [vmem:[%s3411_s27] ss:$0 sm:$0xff]  ;;  %s3416_s27 = smov 8  }
 0x3e7   : > { %2615 = vmatprep.mubr.msk.bf16.mxu0 %vm2834_vm0, %v2833_v0  ;;  %2612 = vmatpush3.bf16.msra.mxu0 %v2744_v12 }
 0x3e8   : > { %2613 = vmatprep.subr.bf16.mxu0 %v2833_v0 }
 0x3eb   : > { %2614 = vmatpush3.bf16.msra.mxu0 %v2745_v13 }
 0x3ec   : > { %2627 = vmatprep.subr.bf16.mxu0 %v2833_v0 }
 0x484   : > { %v1004_v32 = vpop.f32.mrb[0].mxu0 }
 0x485   : > { %v2565_v33 = vpop.f32.mrb[1].mxu0 }
 0x486   : > { %v1007_v34 = vpop.f32.mrb[2].mxu0 }
 0x487   : > { %v2566_v35 = vpop.f32.mrb[3].mxu0 }
 0x48c   : > { %v1114_v36 = vpop.f32.mrb[4].mxu0 }
 0x48d   : > { %1341 = vrot.lane.b32.xlu1 %v1114_v36, %s3379_s26  ;;  %v2577_v37 = vpop.f32.mrb[5].mxu0  ;;  %s3407_s26 = sld [smem:[#allocation11_spill]] }
 0x48e   : > { %v1117_v38 = vpop.f32.mrb[6].mxu0 }
 0x48f   : > { %v2578_v39 = vpop.f32.mrb[7].mxu0 }
 0x493   : > { %v2453_v18 = vld [vmem:[%s3407_s26] ss:$0 sm:$0xff] }
 0x4b1   : > { %v1224_v42 = vpop.f32.mrb[8].mxu0 }
 0x4b2   : > { %1345 = vrot.lane.b32.xlu0 %v1224_v42, %s3378_s1  ;;  %v2589_v43 = vpop.f32.mrb[9].mxu0  ;;  %s3413_s1 = smov 80  }
 0x4b3   : > { %v1227_v44 = vpop.f32.mrb[10].mxu0 }
 0x4b4   : > { %v2590_v45 = vpop.f32.mrb[11].mxu0 }
 0x4b9   : > { %v1334_v46 = vpop.f32.mrb[12].mxu0 }
 0x4ba   : > { %1349 = vrot.lane.b32.xlu1 %v1334_v46, %s3377_s8  ;;  %v2601_v47 = vpop.f32.mrb[13].mxu0  ;;  %s813_s8 = scalar_lea.vmem %s3367_s24, %s3420_s2  ;;  %s3412_s2 = smov 96  }
 0x4bb   : > { %v1337_v48 = vpop.f32.mrb[14].mxu0  ;;  %v2463_v47 = vld [vmem:[%s813_s8] ss:$0 sm:$0xff]  ;;  %s3417_s8 = smov 16  }
 0x4bc   : > { %v2602_v49 = vpop.f32.mrb[15].mxu0 }
 0x4ff   : > { %v1342_v50 = vpop.permute.xlu1 %1341 }
 0x500   : > { %v1352_v52 = vsel %vm902_vm2, %v1004_v32, %v1342_v50 }
 0x524   : > { %v1346_v51 = vpop.permute.xlu0 %1345 }
 0x525   : > { %v1354_v53 = vsel %vm1353_vm4, %v1352_v52, %v1346_v51 }
 0x52c   : > { %v1350_v54 = vpop.permute.xlu1 %1349 }
 0x52d   : > { %v1356_v55 = vsel %vm1355_vm5, %v1354_v53, %v1350_v54 }
 0x52e   : > { %v1357_v56 = vpack.c.bf16 %v1356_v55, %v1356_v55 }
 0x530   : > { %2608 = vmatmul.mubr.msk.bf16.vlgmr.msra.gmra.mrb[20].mxu1 %vm845_vm1, %v1357_v56 }
 0x531   : > { %2623 = vmatprep.mubr.msk.bf16.mxu1 %vm2834_vm0, %v2833_v0  ;;  %2620 = vmatpush3.bf16.msra.mxu1 %v2742_v8 }
 0x532   : > { %2621 = vmatprep.subr.bf16.mxu1 %v2833_v0 }
 0x603   : > { %v1418_v58 = vpop.f32.mrb[20].mxu1 }
 0x604   : > { %v1419_v59 = vadd.f32 %v2449_v57, %v1418_v58  ;;  %v2609_v60 = vpop.f32.mrb[21].mxu1 }
 0x605   : > { %v1421_v61 = vpop.f32.mrb[22].mxu1 }
 0x606   : > { %v2610_v62 = vpop.f32.mrb[23].mxu1  ;;  %v1424_v63 = vadd.f32 %v1419_v59, %v3047_v3  ;;  %v2743_v3 = vld [vmem:[%s3353_s10 + $0x8] sm:$0xff]  }
 0x607   : > { %2622 = vmatpush3.bf16.msra.mxu1 %v2743_v3 }
 0x608   : > { %v1427_v1 = vsel %vm845_vm1, %v1424_v63, 0.0  ;;  %2633 = vmatprep.subr.bf16.mxu1 %v2833_v0 }
 0x609   : > { %1428 = vadd.xlane.f32.xlu0 %v1427_v1 }
 0x60a   : > { %2624 = vmatmul.mubr.msk.bf16.vlgmr.msra.gmra.mrb[24].mxu1 %vm845_vm1, %v1522_v11 }
 0x60b   : > { %2635 = vmatprep.mubr.msk.bf16.mxu1 %vm2834_vm0, %v2833_v0 }
 0x696   : > { %v1429_v2 = vpop.xlane.xlu0 %1428 }
 0x697   : > { %v1431_v4 = vmul.f32 0.03125, %v1429_v2 }
 0x699   : > { %v1432_v5 = vsub.f32 %v1424_v63, %v1431_v4 }
 0x69b   : > { %v1433_v6 = vmul.f32 %v1432_v5, %v1432_v5 }
 0x69d   : > { %v1434_v7 = vsel %vm845_vm1, %v1433_v6, 0.0 }
 0x69e   : > { %1435 = vadd.xlane.f32.xlu1 %v1434_v7 }
 0x6dd   : > { %v1583_v24 = vpop.f32.mrb[24].mxu1 }
 0x6de   : > { %v1584_v25 = vadd.f32 %v2459_v23, %v1583_v24  ;;  %v2625_v26 = vpop.f32.mrb[25].mxu1 }
 0x6df   : > { %v1586_v27 = vpop.f32.mrb[26].mxu1 }
 0x6e0   : > { %v3197_v28 = vpack.c.bf16 %v1584_v25, %v1584_v25  ;;  %v2626_v29 = vpop.f32.mrb[27].mxu1 }
 0x6e2   : > { %1708 = vrot.lane.b32.xlu0 %v3197_v28, %s2835_s7  ;;  %v1602_v30 = vsel %vm902_vm2, %v3197_v28, 0 }
 0x6e6   : > { %1818 = vrot.lane.b32.xlu0 %v3197_v28, %s3409_s3 }
 0x6ea   : > { %1928 = vrot.lane.b32.xlu0 %v3197_v28, %s3410_s9 }
 0x72b   : > { %v1436_v14 = vpop.xlane.xlu1 %1435 }
 0x72c   : > { %v1437_v15 = vmul.f32 0.03125, %v1436_v14 }
 0x72e   : > { %v1438_v16 = vadd.f32 1e-05, %v1437_v15 }
 0x730   : > { %2770 = vrsqrt.f32 %v1438_v16 }
 0x73a   : > { %v2771_v17 = vpop.eup %2770 }
 0x73b   : > { %v1440_v19 = vmul.f32 %v2771_v17, %v1432_v5 }
 0x73d   : > { %v1447_v20 = vmul.f32 %v2453_v18, %v1440_v19 }
 0x73f   : > { %v3187_v21 = vadd.f32 %v2454_v10, %v1447_v20 }
 0x741   : > { %v1455_v22 = vpack.c.bf16 %v3187_v21, %v3187_v21 }
 0x743   : > { %2616 = vmatmul.mubr.msk.bf16.vlgmr.msra.gmra.mrb[16].mxu0 %vm845_vm1, %v1455_v22 }
 0x744   : > { %2629 = vmatprep.mubr.msk.bf16.mxu0 %vm2834_vm0, %v2833_v0  ;;  %2628 = vmatpush3.bf16.xpose.msra.mxu0 %v1602_v30 }
 0x745   : > { %2639 = vmatprep.subr.bf16.mxu0 %v2833_v0 }
 0x754   : > { %v1709_v36 = vpop.permute.xlu0 %1708 }
 0x755   : > { %v1714_v39 = vsel %vm902_vm2, %v1709_v36, 0 }
 0x758   : > { %v1819_v40 = vpop.permute.xlu0 %1818 }
 0x759   : > { %v1824_v42 = vsel %vm902_vm2, %v1819_v40, 0 }
 0x75c   : > { %v1929_v43 = vpop.permute.xlu0 %1928 }
 0x75d   : > { %v1934_v45 = vsel %vm902_vm2, %v1929_v43, 0 }
 0x816   : > { %v1516_v32 = vpop.f32.mrb[16].mxu0 }
 0x817   : > { %v1517_v33 = vadd.f32 %v2455_v31, %v1516_v32  ;;  %v2617_v34 = vpop.f32.mrb[17].mxu0 }
 0x818   : > { %v1519_v35 = vpop.f32.mrb[18].mxu0 }
 0x819   : > { %v1590_v37 = vpack.c.bf16 %v1517_v33, %v1517_v33  ;;  %v2618_v38 = vpop.f32.mrb[19].mxu0 }
 0x81b   : > { %1706 = vrot.lane.b32.xlu1 %v1590_v37, %s2835_s7  ;;  %2630 = vmatmul.mubr.msk.bf16.vlgmr.msra.gmra.mrb[20].mxu0 %vm902_vm2, %v1590_v37  ;;  %s817_s7 = scalar_lea.vmem %s3368_s25, %s3035_s6 }
 0x81c   : > { %2640 = vmatpush3.bf16.xpose.msra.mxu0 %v1714_v39  ;;  %2641 = vmatprep.mubr.msk.bf16.mxu0 %vm2834_vm0, %v2833_v0 }
 0x81d   : > { %2651 = vmatprep.subr.bf16.mxu0 %v2833_v0 }
 0x81f   : > { %1816 = vrot.lane.b32.xlu1 %v1590_v37, %s3409_s3  ;;  %s3414_s3 = smov 72  }
 0x823   : > { %1926 = vrot.lane.b32.xlu1 %v1590_v37, %s3410_s9  ;;  %s3415_s9 = smov 88  }
 0x88d   : > { %v1707_v41 = vpop.permute.xlu1 %1706 }
 0x88e   : > { %2642 = vmatmul.mubr.msk.bf16.vlgmr.msra.gmra.mrb[24].mxu0 %vm902_vm2, %v1707_v41 }
 0x88f   : > { %2652 = vmatpush3.bf16.xpose.msra.mxu0 %v1824_v42  ;;  %2653 = vmatprep.mubr.msk.bf16.mxu0 %vm2834_vm0, %v2833_v0 }
 0x890   : > { %2663 = vmatprep.subr.bf16.mxu0 %v2833_v0 }
 0x891   : > { %v1817_v44 = vpop.permute.xlu1 %1816 }
 0x895   : > { %v1927_v46 = vpop.permute.xlu1 %1926 }
 0x896   : > { %2654 = vmatmul.mubr.msk.bf16.vlgmr.msra.gmra.mrb[28].mxu0 %vm902_vm2, %v1817_v44 }
 0x897   : > { %2664 = vmatpush3.bf16.xpose.msra.mxu0 %v1934_v45  ;;  %2665 = vmatprep.mubr.msk.bf16.mxu0 %vm2834_vm0, %v2833_v0 }
 0x898   : > { %2675 = vmatprep.subr.bf16.mxu0 %v2833_v0 }
 0x89e   : > { %2666 = vmatmul.mubr.msk.bf16.vlgmr.msra.gmra.mrb[32].mxu0 %vm902_vm2, %v1927_v46 }
 0x89f   : > { %2679 = vmatprep.mubr.msk.bf16.mxu0 %vm2834_vm0, %v2833_v0 }
 0x8ee   : > { %v1638_v48 = vpop.f32.mrb[20].mxu0 }
 0x8ef   : > { %v1639_v49 = vadd.f32 %v2463_v47, %v1638_v48  ;;  %v2631_v50 = vpop.f32.mrb[21].mxu0 }
 0x8f0   : > { %v1641_v51 = vpop.f32.mrb[22].mxu0 }
 0x8f1   : > { %v2632_v52 = vpop.f32.mrb[23].mxu0  ;;  %v1644_v53 = vsel %vm902_vm2, %v1639_v49, -inf }
 0x8f2   : > { %1645 = vmax.xlane.f32.xlu0 %v1644_v53 }
 0x961   : > { %v1750_v54 = vpop.f32.mrb[24].mxu0 }
 0x962   : > { %v1751_v55 = vadd.f32 %v2463_v47, %v1750_v54  ;;  %v2643_v56 = vpop.f32.mrb[25].mxu0 }
 0x963   : > { %v1753_v57 = vpop.f32.mrb[26].mxu0 }
 0x964   : > { %v2644_v58 = vpop.f32.mrb[27].mxu0  ;;  %v1756_v59 = vsel %vm902_vm2, %v1751_v55, -inf }
 0x965   : > { %1757 = vmax.xlane.f32.xlu1 %v1756_v59  ;;  %v2746_v58 = vld [vmem:[%s3355_s12] sm:$0xff]  }
 0x966   : > { %2676 = vmatpush3.bf16.msra.mxu0 %v2746_v58 }
 0x967   : > { %2677 = vmatprep.subr.bf16.mxu0 %v2833_v0 }
 0x969   : > { %v1860_v60 = vpop.f32.mrb[28].mxu0 }
 0x96a   : > { %v1861_v61 = vadd.f32 %v2463_v47, %v1860_v60  ;;  %v2655_v62 = vpop.f32.mrb[29].mxu0 }
 0x96b   : > { %v1863_v63 = vpop.f32.mrb[30].mxu0 }
 0x96c   : > { %v2656_v1 = vpop.f32.mrb[31].mxu0  ;;  %v1866_v2 = vsel %vm902_vm2, %v1861_v61, -inf  ;;  %v2747_v63 = vld [vmem:[%s3355_s12 + $0x8] sm:$0xff]  }
 0x96d   : > { %1867 = vmax.xlane.f32.xlu0 %v1866_v2  ;;  %2678 = vmatpush3.bf16.msra.mxu0 %v2747_v63 }
 0x96e   : > { %2691 = vmatprep.subr.bf16.mxu0 %v2833_v0 }
 0x971   : > { %v1970_v4 = vpop.f32.mrb[32].mxu0 }
 0x972   : > { %v1971_v5 = vadd.f32 %v2463_v47, %v1970_v4  ;;  %v2667_v6 = vpop.f32.mrb[33].mxu0 }
 0x973   : > { %v1973_v7 = vpop.f32.mrb[34].mxu0 }
 0x974   : > { %v2668_v8 = vpop.f32.mrb[35].mxu0  ;;  %v1976_v3 = vsel %vm902_vm2, %v1971_v5, -inf }
 0x975   : > { %1977 = vmax.xlane.f32.xlu0 %v1976_v3 }
 0x97f   : > { %v1646_v9 = vpop.xlane.xlu0 %1645 }
 0x980   : > { %v1647_v11 = vsub.f32 %v1639_v49, %v1646_v9 }
 0x982   : > { %v1648_v12 = vmul.f32 1.442695, %v1647_v11 }
 0x984   : > { %2772 = vpow2.f32 %v1648_v12 }
 0x98e   : > { %v2773_v13 = vpop.eup %2772 }
 0x98f   : > { %v1650_v14 = vsel %vm902_vm2, %v2773_v13, 0.0 }
 0x990   : > { %1651 = vadd.xlane.f32.xlu1 %v1650_v14 }
 0x9a1   : > { %1657 = vrot.lane.b32.xlu1 %v3197_v28, %s3412_s2  ;;  %s3418_s2 = smov 24  }
 0x9f2   : > { %v1758_v15 = vpop.xlane.xlu1 %1757 }
 0x9f3   : > { %v1759_v16 = vsub.f32 %v1751_v55, %v1758_v15 }
 0x9f5   : > { %v1760_v17 = vmul.f32 1.442695, %v1759_v16 }
 0x9f7   : > { %2774 = vpow2.f32 %v1760_v17  ;;  %v2472_v17 = vld [vmem:[%s3356_s13] ss:$0 sm:$0xff] }
 0x9fa   : > { %v1868_v18 = vpop.xlane.xlu0 %1867 }
 0x9fb   : > { %v1869_v19 = vsub.f32 %v1861_v61, %v1868_v18 }
 0x9fd   : > { %v1870_v10 = vmul.f32 1.442695, %v1869_v19 }
 0x9ff   : > { %2776 = vpow2.f32 %v1870_v10 }
 0xa01   : > { %v2775_v20 = vpop.eup %2774 }
 0xa02   : > { %v1978_v22 = vpop.xlane.xlu0 %1977  ;;  %v1762_v23 = vsel %vm902_vm2, %v2775_v20, 0.0 }
 0xa03   : > { %v1979_v24 = vsub.f32 %v1971_v5, %v1978_v22  ;;  %1763 = vadd.xlane.f32.xlu0 %v1762_v23 }
 0xa05   : > { %v1980_v25 = vmul.f32 1.442695, %v1979_v24 }
 0xa07   : > { %2778 = vpow2.f32 %v1980_v25 }
 0xa09   : > { %v2777_v26 = vpop.eup %2776 }
 0xa0a   : > { %v1872_v27 = vsel %vm902_vm2, %v2777_v26, 0.0 }
 0xa0b   : > { %1873 = vadd.xlane.f32.xlu1 %v1872_v27 }
 0xa11   : > { %v2779_v29 = vpop.eup %2778 }
 0xa12   : > { %v1982_v30 = vsel %vm902_vm2, %v2779_v29, 0.0 }
 0xa13   : > { %1983 = vadd.xlane.f32.xlu0 %v1982_v30 }
 0xa1c   : > { %1878 = vrot.lane.b32.xlu1 %v3197_v28, %s3413_s1 }
 0xa1d   : > { %v1652_v31 = vpop.xlane.xlu1 %1651 }
 0xa1e   : > { %2780 = vrcp.f32 %v1652_v31  ;;  %v2748_v31 = vld [vmem:[%s3359_s16] sm:$0xff]  }
 0xa20   : > { %1988 = vrot.lane.b32.xlu1 %v3197_v28, %s3414_s3 }
 0xa21   : > { %v1658_v32 = vpop.permute.xlu1 %1657 }
 0xa22   : > { %v1663_v33 = vsel %vm966_vm3, %v1658_v32, 0  ;;  %v2749_v32 = vld [vmem:[%s3359_s16 + $0x8] sm:$0xff]  }
 0xa23   : > { %2634 = vmatpush3.bf16.msra.mxu1 %v1663_v33  ;;  %v2751_v33 = vld [vmem:[%s3361_s18 + $0x8] sm:$0xff]  }
 0xa24   : > { %2645 = vmatprep.subr.bf16.mxu1 %v2833_v0 }
 0xa28   : > { %v2781_v34 = vpop.eup %2780 }
 0xa29   : > { %v1654_v35 = vmul.f32 %v2781_v34, %v2773_v13  ;;  %1768 = vrot.lane.b32.xlu0 %v3197_v28, %s3415_s9 }
 0xa2b   : > { %v1655_v36 = vpack.c.bf16 %v1654_v35, %v1654_v35 }
 0xa2d   : > { %2636 = vmatmul.mubr.msk.bf16.vlgmr.msra.gmra.mrb[28].mxu1 %vm902_vm2, %v1655_v36 }
 0xa2e   : > { %2647 = vmatprep.mubr.msk.bf16.mxu1 %vm2834_vm0, %v2833_v0 }
 0xa90   : > { %v1764_v37 = vpop.xlane.xlu0 %1763 }
 0xa91   : > { %2782 = vrcp.f32 %v1764_v37 }
 0xa98   : > { %v1874_v38 = vpop.xlane.xlu1 %1873 }
 0xa99   : > { %2784 = vrcp.f32 %v1874_v38  ;;  %v2476_v38 = vld [vmem:[%s3357_s14] ss:$0 sm:$0xff] }
 0xa9b   : > { %v2783_v39 = vpop.eup %2782 }
 0xa9c   : > { %v1766_v41 = vmul.f32 %v2783_v39, %v2775_v20  ;;  %v1879_v44 = vpop.permute.xlu1 %1878 }
 0xa9d   : > { %v1884_v46 = vsel %vm966_vm3, %v1879_v44, 0  ;;  %v2752_v44 = vld [vmem:[%s3361_s18 + $0x10] sm:$0xff]  }
 0xa9e   : > { %v1767_v28 = vpack.c.bf16 %v1766_v41, %v1766_v41 }
 0xaa0   : > { %v1984_v40 = vpop.xlane.xlu0 %1983  ;;  %v1989_v48 = vpop.permute.xlu1 %1988 }
 0xaa1   : > { %2786 = vrcp.f32 %v1984_v40  ;;  %v1994_v51 = vsel %vm966_vm3, %v1989_v48, 0  ;;  %v2477_v40 = vld [vmem:[%s3358_s15] ss:$0 sm:$0xff] }
 0xaa3   : > { %v2785_v45 = vpop.eup %2784 }
 0xaa4   : > { %v1769_v42 = vpop.permute.xlu0 %1768  ;;  %v1876_v47 = vmul.f32 %v2785_v45, %v2777_v26  ;;  %v2478_v45 = vld [vmem:[%s3360_s17] ss:$0 sm:$0xff] }
 0xaa5   : > { %v1774_v43 = vsel %vm966_vm3, %v1769_v42, 0 }
 0xaa6   : > { %2646 = vmatpush3.bf16.msra.mxu1 %v1774_v43  ;;  %v1877_v49 = vpack.c.bf16 %v1876_v47, %v1876_v47 }
 0xaa7   : > { %2657 = vmatprep.subr.bf16.mxu1 %v2833_v0 }
 0xaa9   : > { %2648 = vmatmul.mubr.msk.bf16.vlgmr.msra.gmra.mrb[32].mxu1 %vm902_vm2, %v1767_v28  ;;  %v2753_v28 = vld [vmem:[%s3361_s18 + $0x18] sm:$0xff]  }
 0xaaa   : > { %2658 = vmatpush3.bf16.msra.mxu1 %v1884_v46  ;;  %2659 = vmatprep.mubr.msk.bf16.mxu1 %vm2834_vm0, %v2833_v0 }
 0xaab   : > { %2669 = vmatprep.subr.bf16.mxu1 %v2833_v0  ;;  %v2787_v50 = vpop.eup %2786 }
 0xaac   : > { %v1986_v52 = vmul.f32 %v2787_v50, %v2779_v29 }
 0xaae   : > { %v1987_v53 = vpack.c.bf16 %v1986_v52, %v1986_v52 }
 0xab1   : > { %2660 = vmatmul.mubr.msk.bf16.vlgmr.msra.gmra.mrb[36].mxu1 %vm902_vm2, %v1877_v49 }
 0xab2   : > { %2670 = vmatpush3.bf16.msra.mxu1 %v1994_v51  ;;  %2671 = vmatprep.mubr.msk.bf16.mxu1 %vm2834_vm0, %v2833_v0 }
 0xab3   : > { %2683 = vmatprep.subr.bf16.mxu1 %v2833_v0 }
 0xab9   : > { %2672 = vmatmul.mubr.msk.bf16.vlgmr.msra.gmra.mrb[40].mxu1 %vm902_vm2, %v1987_v53 }
 0xaba   : > { %2687 = vmatprep.mubr.msk.bf16.mxu1 %vm2834_vm0, %v2833_v0  ;;  %2684 = vmatpush3.bf16.msra.mxu1 %v2748_v31 }
 0xabb   : > { %2685 = vmatprep.subr.bf16.mxu1 %v2833_v0 }
 0xabe   : > { %2686 = vmatpush3.bf16.msra.mxu1 %v2749_v32 }
 0xb00   : > { %v1699_v54 = vpop.f32.mrb[28].mxu1 }
 0xb01   : > { %v2637_v55 = vpop.f32.mrb[29].mxu1 }
 0xb02   : > { %v1702_v56 = vpop.f32.mrb[30].mxu1 }
 0xb03   : > { %v2638_v57 = vpop.f32.mrb[31].mxu1 }
 0xb7c   : > { %v1810_v59 = vpop.f32.mrb[32].mxu1 }
 0xb7d   : > { %2037 = vrot.lane.b32.xlu0 %v1810_v59, %s3416_s27  ;;  %v2649_v60 = vpop.f32.mrb[33].mxu1 }
 0xb7e   : > { %v1813_v61 = vpop.f32.mrb[34].mxu1 }
 0xb7f   : > { %v2650_v62 = vpop.f32.mrb[35].mxu1 }
 0xb84   : > { %v1920_v1 = vpop.f32.mrb[36].mxu1 }
 0xb85   : > { %2041 = vrot.lane.b32.xlu1 %v1920_v1, %s3417_s8  ;;  %v2661_v2 = vpop.f32.mrb[37].mxu1 }
 0xb86   : > { %v1923_v4 = vpop.f32.mrb[38].mxu1 }
 0xb87   : > { %v2662_v5 = vpop.f32.mrb[39].mxu1 }
 0xb8c   : > { %v2030_v6 = vpop.f32.mrb[40].mxu1 }
 0xb8d   : > { %2045 = vrot.lane.b32.xlu0 %v2030_v6, %s3418_s2  ;;  %v2673_v7 = vpop.f32.mrb[41].mxu1 }
 0xb8e   : > { %v2033_v8 = vpop.f32.mrb[42].mxu1  ;;  %v2488_v7 = vld [vmem:[%s3363_s20] ss:$0 sm:$0xff] }
 0xb8f   : > { %v2674_v3 = vpop.f32.mrb[43].mxu1 }
 0xb90   : > { %v2489_v3 = vld [vmem:[#allocation2] ss:$0 sm:$0xff] }
 0xbef   : > { %v2038_v9 = vpop.permute.xlu0 %2037 }
 0xbf0   : > { %v2048_v12 = vsel %vm902_vm2, %v1699_v54, %v2038_v9 }
 0xbf7   : > { %v2042_v11 = vpop.permute.xlu1 %2041 }
 0xbf8   : > { %v2049_v13 = vsel %vm1353_vm4, %v2048_v12, %v2042_v11 }
 0xbff   : > { %v2046_v14 = vpop.permute.xlu0 %2045 }
 0xc00   : > { %v2050_v15 = vsel %vm1355_vm5, %v2049_v13, %v2046_v14 }
 0xc01   : > { %v2051_v16 = vpack.c.bf16 %v2050_v15, %v2050_v15 }
 0xc03   : > { %2680 = vmatmul.mubr.msk.bf16.vlgmr.msra.gmra.mrb[36].mxu0 %vm845_vm1, %v2051_v16 }
 0xc04   : > { %2699 = vmatprep.mubr.msk.bf16.mxu0 %vm2834_vm0, %v2833_v0 }
 0xcd6   : > { %v2112_v18 = vpop.f32.mrb[36].mxu0 }
 0xcd7   : > { %v2113_v19 = vadd.f32 %v2472_v17, %v2112_v18  ;;  %v2681_v10 = vpop.f32.mrb[37].mxu0 }
 0xcd8   : > { %v2115_v20 = vpop.f32.mrb[38].mxu0 }
 0xcd9   : > { %v2682_v22 = vpop.f32.mrb[39].mxu0  ;;  %v2118_v23 = vadd.f32 %v2113_v19, %v3187_v21  ;;  %v2750_v21 = vld [vmem:[%s3361_s18] sm:$0xff]  }
 0xcda   : > { %2692 = vmatpush3.bf16.msra.mxu0 %v2750_v21 }
 0xcdb   : > { %v2121_v24 = vsel %vm845_vm1, %v2118_v23, 0.0  ;;  %2693 = vmatprep.subr.bf16.mxu0 %v2833_v0 }
 0xcdc   : > { %2122 = vadd.xlane.f32.xlu1 %v2121_v24 }
 0xcde   : > { %2694 = vmatpush3.bf16.msra.mxu0 %v2751_v33 }
 0xcdf   : > { %2695 = vmatprep.subr.bf16.mxu0 %v2833_v0 }
 0xce2   : > { %2696 = vmatpush3.bf16.msra.mxu0 %v2752_v44 }
 0xce3   : > { %2697 = vmatprep.subr.bf16.mxu0 %v2833_v0  ;;  %v2482_v0 = vld [vmem:[%s3362_s19] ss:$0 sm:$0xff] }
 0xce6   : > { %2698 = vmatpush3.bf16.msra.mxu0 %v2753_v28 }
 0xd69   : > { %v2123_v25 = vpop.xlane.xlu1 %2122 }
 0xd6a   : > { %v2124_v26 = vmul.f32 0.03125, %v2123_v25 }
 0xd6c   : > { %v2125_v27 = vsub.f32 %v2118_v23, %v2124_v26 }
 0xd6e   : > { %v2126_v29 = vmul.f32 %v2125_v27, %v2125_v27 }
 0xd70   : > { %v2127_v30 = vsel %vm845_vm1, %v2126_v29, 0.0 }
 0xd71   : > { %2128 = vadd.xlane.f32.xlu0 %v2127_v30 }
 0xdfe   : > { %v2129_v34 = vpop.xlane.xlu0 %2128 }
 0xdff   : > { %v2130_v35 = vmul.f32 0.03125, %v2129_v34 }
 0xe01   : > { %v2131_v36 = vadd.f32 1e-05, %v2130_v35 }
 0xe03   : > { %2788 = vrsqrt.f32 %v2131_v36 }
 0xe0d   : > { %v2789_v37 = vpop.eup %2788 }
 0xe0e   : > { %v2133_v39 = vmul.f32 %v2789_v37, %v2125_v27 }
 0xe10   : > { %v2140_v41 = vmul.f32 %v2476_v38, %v2133_v39 }
 0xe12   : > { %v2147_v42 = vadd.f32 %v2477_v40, %v2140_v41 }
 0xe14   : > { %v2148_v43 = vpack.c.bf16 %v2147_v42, %v2147_v42 }
 0xe16   : > { %2688 = vmatmul.mubr.msk.bf16.vlgmr.msra.gmra.mrb[44].mxu1 %vm845_vm1, %v2148_v43 }
 0xee9   : > { %v2209_v46 = vpop.f32.mrb[44].mxu1 }
 0xeea   : > { %v2210_v47 = vadd.f32 %v2478_v45, %v2209_v46  ;;  %v2689_v48 = vpop.f32.mrb[45].mxu1 }
 0xeeb   : > { %v2212_v49 = vpop.f32.mrb[46].mxu1 }
 0xeec   : > { %v2215_v50 = vmax.f32 %v2210_v47, 0.0  ;;  %v2690_v51 = vpop.f32.mrb[47].mxu1 }
 0xeee   : > { %v2216_v52 = vpack.c.bf16 %v2215_v50, %v2215_v50 }
 0xef0   : > { %2700 = vmatmul.mubr.msk.bf16.vlgmr.msra.gmra.mrb[40].mxu0 %vm2256_vm6, %v2216_v52 }
 0xfc3   : > { %v2294_v53 = vpop.f32.mrb[40].mxu0 }
 0xfc4   : > { %v2295_v54 = vadd.f32 %v2482_v0, %v2294_v53  ;;  %v2701_v55 = vpop.f32.mrb[41].mxu0 }
 0xfc5   : > { %v2297_v56 = vpop.f32.mrb[42].mxu0 }
 0xfc6   : > { %v2702_v57 = vpop.f32.mrb[43].mxu0  ;;  %v2300_v58 = vadd.f32 %v2295_v54, %v2147_v42 }
 0xfc8   : > { %v2303_v59 = vsel %vm845_vm1, %v2300_v58, 0.0 }
 0xfc9   : > { %2304 = vadd.xlane.f32.xlu0 %v2303_v59 }
0x1056   : > { %v2305_v60 = vpop.xlane.xlu0 %2304 }
0x1057   : > { %v2306_v61 = vmul.f32 0.03125, %v2305_v60 }
0x1059   : > { %v2307_v62 = vsub.f32 %v2300_v58, %v2306_v61 }
0x105b   : > { %v2308_v63 = vmul.f32 %v2307_v62, %v2307_v62 }
0x105d   : > { %v2309_v1 = vsel %vm845_vm1, %v2308_v63, 0.0 }
0x105e   : > { %2310 = vadd.xlane.f32.xlu1 %v2309_v1 }
0x10eb   : > { %v2311_v2 = vpop.xlane.xlu1 %2310 }
0x10ec   : > { %v2312_v4 = vmul.f32 0.03125, %v2311_v2 }
0x10ee   : > { %v2313_v5 = vadd.f32 1e-05, %v2312_v4 }
0x10f0   : > { %2790 = vrsqrt.f32 %v2313_v5 }
0x10fa   : > { %v2791_v6 = vpop.eup %2790 }
0x10fb   : > { %v2315_v8 = vmul.f32 %v2791_v6, %v2307_v62 }
0x10fd   : > { %v2322_v9 = vmul.f32 %v2488_v7, %v2315_v8 }
0x10ff   : > { %v2329_v11 = vadd.f32 %v2489_v3, %v2322_v9 }
0x1101   : > { %2330 = vst.msk [vmem:[%s817_s7] sm:$0xff] %vm845_vm1, %v2329_v11 }
0x1102 PF: > { %s36_s29 = sadd.s32 1, %s2830_s29  }
0x1103   : > { %p33_p2 = scmp.ge.s32.totalorder %s36_s29, 4  }
0x1105   :  { %35 = sbr.rel (!%p33_p2) target bundleno = 12 (0xc), region = 164 }
0x110c   :  { %2350 = vsyncpa [#allocation3], 1 }
0x110d   :  { %2352 = vsyncpa [#allocation3 + $0x1], 1 }

</bundles_post_ra>
